<compile_context>
chip_gen: v7x
topology: tpu7x:2x2x1
jax: 0.10.0
libtpu: 0.0.40
codegen_flags: <defaults>
</compile_context>

<pallas_src>
import functools

import numpy as np
import jax
import jax.numpy as jnp
from jax import lax
from jax.experimental import pallas as pl
from jax.experimental.pallas import tpu as pltpu

NEG_SLOPE = 0.01                       # PyTorch nn.LeakyReLU default
LEFT_BC, RIGHT_BC, DELTA_T = 10.0, 10.0, 1.0
COUT = 16                              # C2D_Cout in the module
F_HID = 2000                           # dense layer width


def _apply_act(x, act):
    if act == "relu":
        return jnp.maximum(x, 0.0)
    if act == "leaky_relu":
        return jnp.where(x >= 0.0, x, NEG_SLOPE * x)
    if act == "leaky_relu_relu":       # nn.LeakyReLU() followed by nn.ReLU()
        return jnp.maximum(jnp.where(x >= 0.0, x, NEG_SLOPE * x), 0.0)
    return x


# --------------------------- fused forward kernel ----------------------------

def rmm_fused_kernel(x_ref,
                     w1, w2, w3, w4, w5, w6,
                     b1, b2, b3, b4, b5, b6,
                     mk1, mk2, mk3,
                     sw1, sw2, sw3,
                     wd, bd, wo, bo,
                     o_ref, *, dims):
    """Per-sample fused forward: conv stack + pools + flatten + dense + out.

    Activation layout: (C, M) with M = H*W flattened row-major over (h, w);
    channels on sublanes, the wide spatial axis on the 128-lane dimension.
    """
    (H0, W0), (H1, W1), (H2, W2) = dims

    def conv3x3(xv, w_ref, b_ref, mk_ref, Wd, act):
        cin, M = xv.shape
        pad = Wd + 1                                    # covers largest tap shift
        zeros = jnp.zeros((cin, pad), jnp.float32)
        xp = jnp.concatenate([zeros, xv, zeros], axis=1)        # (cin, M + 2*pad)
        taps = []
        for k in range(9):                              # build taps once, K-stack
            dy, dx = divmod(k, 3)
            off = (dy - 1) * Wd + (dx - 1)
            taps.append(xp[:, pad + off: pad + off + M] * mk_ref[k:k + 1, :])
        stacked = jnp.concatenate(taps, axis=0).astype(jnp.bfloat16)  # (9*cin, M)
        acc = jnp.dot(w_ref[...], stacked,              # ONE dot, K = 9*cin
                      preferred_element_type=jnp.float32)
        return _apply_act(acc + b_ref[...], act)

    def maxpool2x2(av, sw_ref, Hd, Wd):
        C, M = av.shape
        ap = jnp.concatenate([av, jnp.zeros((C, Wd + 1), jnp.float32)], axis=1)
        d = av
        for off in (1, Wd, Wd + 1):                     # other 3 taps of the window
            d = jnp.maximum(d, ap[:, off: off + M])
        K = Hd // 2
        # Stack the even-h row chunks on sublanes, select even w with an exact
        # (Wd, Wd//2) 0/1 dot (linear cost -- no quadratic selection matrix).
        chunks = [d[:, 2 * hp * Wd: 2 * hp * Wd + Wd] for hp in range(K)]
        stacked = jnp.concatenate(chunks, axis=0)                  # (C*K, Wd)
        sel = jnp.dot(stacked, sw_ref[...],
                      preferred_element_type=jnp.float32)          # (C*K, Wd//2)
        pieces = [sel[i * C:(i + 1) * C, :] for i in range(K)]
        return jnp.concatenate(pieces, axis=1)                     # (C, M//4)

    x = x_ref[0]                                        # (cin_pad, H0*W0)
    a = conv3x3(x, w1, b1, mk1, W0, "leaky_relu_relu")
    a = conv3x3(a, w2, b2, mk1, W0, "relu")
    a = maxpool2x2(a, sw1, H0, W0)
    a = conv3x3(a, w3, b3, mk2, W1, "leaky_relu")
    a = conv3x3(a, w4, b4, mk2, W1, "relu")
    a = maxpool2x2(a, sw2, H1, W1)
    a = conv3x3(a, w5, b5, mk3, W2, "leaky_relu")
    a = conv3x3(a, w6, b6, mk3, W2, "relu")
    a = maxpool2x2(a, sw3, H2, W2)                      # (COUT, S3)

    # Flatten in PyTorch NCHW order -> (1, COUT*S3); boundary features are
    # constants and were folded into bd in the wrapper (exact).
    feat = jnp.concatenate([a[c:c + 1, :] for c in range(a.shape[0])], axis=1)
    h = jnp.dot(feat.astype(jnp.bfloat16), wd[...],
                preferred_element_type=jnp.float32) + bd[...]      # (1, 2000)
    o = jnp.dot(h.astype(jnp.bfloat16), wo[...],
                preferred_element_type=jnp.float32) + bo[...]      # (1, H*W)
    o_ref[0] = o.astype(o_ref.dtype)


# -------------------- static helper tensors (trace-time numpy) ---------------

def _conv_masks(H, W):
    """(9, H*W) 0/1 masks: tap k=(dy,dx) valid iff (h+dy-1, w+dx-1) in-bounds."""
    M = H * W
    m = np.arange(M)
    h, w = m // W, m % W
    masks = np.zeros((9, M), np.float32)
    for k in range(9):
        dy, dx = divmod(k, 3)
        hh, ww = h + dy - 1, w + dx - 1
        masks[k] = ((hh >= 0) & (hh < H) & (ww >= 0) & (ww < W)).astype(np.float32)
    return jnp.asarray(masks)


def _even_sel(W):
    """(W, W//2) 0/1 matrix selecting even columns of a W-wide row chunk."""
    s = np.zeros((W, W // 2), np.float32)
    s[2 * np.arange(W // 2), np.arange(W // 2)] = 1.0
    return jnp.asarray(s)


def _prep_conv_w(w_oihw):
    """OIHW (Cout, Cin, 3, 3) -> (Cout, 9*Cin_pad) bf16, column = k*Cin_pad + ci."""
    cout, cin = w_oihw.shape[0], w_oihw.shape[1]
    cp = ((cin + 7) // 8) * 8
    wp = jnp.pad(w_oihw, ((0, 0), (0, cp - cin), (0, 0), (0, 0)))
    return jnp.transpose(wp, (0, 2, 3, 1)).reshape(cout, 9 * cp).astype(jnp.bfloat16)


def _const_spec(shape):
    zeros = (0,) * len(shape)
    return pl.BlockSpec(shape, lambda n: zeros)


# ------------------------------ full forward ---------------------------------

def rmm_nn_forward(x_nchw, params):
    N, Cin, H, W = x_nchw.shape
    assert H % 8 == 0 and W % 8 == 0, "three 2x2 pools need H, W divisible by 8"
    H1, W1 = H // 2, W // 2
    H2, W2 = H1 // 2, W1 // 2
    H3, W3 = H2 // 2, W2 // 2
    S3, HW = H3 * W3, H * W
    cin_pad = ((Cin + 7) // 8) * 8

    # (N, Cin, H, W) -> (N, cin_pad, H*W): channels on sublanes, spatial on lanes.
    xk = jnp.pad(x_nchw.reshape(N, Cin, HW), ((0, 0), (0, cin_pad - Cin), (0, 0)))

    ws = [_prep_conv_w(params[f"w{i}"]) for i in range(1, 7)]
    bs = [params[f"b{i}"].reshape(COUT, 1) for i in range(1, 7)]
    mks = [_conv_masks(H, W), _conv_masks(H1, W1), _conv_masks(H2, W2)]
    sws = [_even_sel(W), _even_sel(W1), _even_sel(W2)]

    # Dense head: boundary features are per-sample constants -> fold into bias.
    # TODO(synk): nn.Dropout() applied as identity (eval-mode semantics);
    #             training-mode stochastic masking is not reproduced.
    F_conv = COUT * S3
    wd_full = params["wd"]                                    # (F_conv+3, 2000)
    wd_c = wd_full[:F_conv].astype(jnp.bfloat16)              # (64, 2000) bf16
    bd_eff = (params["bd"]
              + LEFT_BC * wd_full[F_conv]
              + RIGHT_BC * wd_full[F_conv + 1]
              + DELTA_T * wd_full[F_conv + 2]).reshape(1, F_HID)
    wo_b = params["wo"].astype(jnp.bfloat16)                  # (2000, HW) bf16
    bo = params["bo"].reshape(1, HW)

    operands = [xk] + ws + bs + mks + sws + [wd_c, bd_eff, wo_b, bo]

    in_specs = [pl.BlockSpec((1, cin_pad, HW), lambda n: (n, 0, 0))]
    in_specs += [_const_spec(tuple(a.shape)) for a in operands[1:]]

    out = pl.pallas_call(
        functools.partial(rmm_fused_kernel,
                          dims=((H, W), (H1, W1), (H2, W2))),
        grid=(N,),
        out_shape=jax.ShapeDtypeStruct((N, 1, HW), jnp.float32),
        in_specs=in_specs,
        out_specs=pl.BlockSpec((1, 1, HW), lambda n: (n, 0, 0)),
        compiler_params=pltpu.CompilerParams(
            dimension_semantics=("parallel",),        # 2nd TC on v7x takes half N
            vmem_limit_bytes=32 * 1024 * 1024),
    )(*operands)
    return out.reshape(N, HW)


# ------------------------------ parameter init --------------------------------

def _uniform(key, shape, fan_in):
    bound = 1.0 / float(np.sqrt(fan_in))
    return jax.random.uniform(key, shape, jnp.float32, -bound, bound)


def init_params(key, channels, Hin, Win):
    keys = jax.random.split(key, 16)
    p = {}
    cins = [channels] + [COUT] * 5
    for idx, cin in enumerate(cins, start=1):
        fan = cin * 9
        p[f"w{idx}"] = _uniform(keys[2 * idx - 2], (COUT, cin, 3, 3), fan)
        p[f"b{idx}"] = _uniform(keys[2 * idx - 1], (COUT,), fan)
    f_in = COUT * (Hin // 8) * (Win // 8) + 3
    f_out = Hin * Win
    # PyTorch Linear weight is (out, in); store transposed (in, out) for x @ W.
    p["wd"] = _uniform(keys[12], (F_HID, f_in), f_in).T       # (f_in, 2000)
    p["bd"] = _uniform(keys[13], (F_HID,), f_in)
    p["wo"] = _uniform(keys[14], (f_out, F_HID), F_HID).T     # (2000, f_out)
    p["bo"] = _uniform(keys[15], (f_out,), F_HID)
    return p


# --------------------------- pure-JAX reference -------------------------------

def rmm_nn_reference(x, params):
    def conv(h, w, b):
        y = lax.conv_general_dilated(
            h, w, window_strides=(1, 1), padding=((1, 1), (1, 1)),
            dimension_numbers=("NCHW", "OIHW", "NCHW"),
            precision=lax.Precision.HIGHEST)
        return y + b.reshape(1, -1, 1, 1)

    def lrelu(h):
        return jnp.where(h >= 0, h, NEG_SLOPE * h)

    def pool(h):
        n, c, hh, ww = h.shape
        return jnp.max(h.reshape(n, c, hh // 2, 2, ww // 2, 2), axis=(3, 5))

    a = jnp.maximum(lrelu(conv(x, params["w1"], params["b1"])), 0.0)
    a = jnp.maximum(conv(a, params["w2"], params["b2"]), 0.0)
    a = pool(a)
    a = lrelu(conv(a, params["w3"], params["b3"]))
    a = jnp.maximum(conv(a, params["w4"], params["b4"]), 0.0)
    a = pool(a)
    a = lrelu(conv(a, params["w5"], params["b5"]))
    a = jnp.maximum(conv(a, params["w6"], params["b6"]), 0.0)
    a = pool(a)
    n = a.shape[0]
    feat = a.reshape(n, -1)
    bounds = jnp.tile(jnp.array([[LEFT_BC, RIGHT_BC, DELTA_T]], jnp.float32),
                      (n, 1))
    feat = jnp.concatenate([feat, bounds], axis=1)
    hdn = jnp.dot(feat, params["wd"], precision=lax.Precision.HIGHEST) + params["bd"]
    return jnp.dot(hdn, params["wo"], precision=lax.Precision.HIGHEST) + params["bo"]


# ----------------------------------- main --------------------------------------

if __name__ == "__main__":
    B, C, H, W = 2, 4, 16, 16     # small shapes consistent with the module
    key = jax.random.PRNGKey(0)
    kx, kp = jax.random.split(key)
    x = jax.random.normal(kx, (B, C, H, W), jnp.float32)
    params = init_params(kp, C, H, W)

    fwd = jax.jit(rmm_nn_forward)
    y = fwd(x, params)
    jax.block_until_ready(y)

    assert y.shape == (B, H * W), y.shape
    assert y.dtype == jnp.float32
    assert bool(jnp.all(jnp.isfinite(y)))

    # Correctness check against a pure-JAX f32 reference (tolerance absorbs the
    # bf16 matmul operands used on the MXU inside the kernel).
    y_ref = jax.jit(rmm_nn_reference)(x, params)
    max_err = float(jnp.max(jnp.abs(y - y_ref)))
    assert bool(jnp.allclose(y, y_ref, rtol=5e-2, atol=5e-2)), \
        f"mismatch vs reference, max abs err {max_err}"

    print("KERNEL_OK")
</pallas_src>

<mosaic_0001>
module attributes {stable_mosaic.version = 11 : i64} {
  func.func @rmm_fused_kernel(%arg0: i32, %arg1: memref<1x8x256xf32, #tpu.memory_space<vmem>>, %arg2: memref<16x72xbf16, #tpu.memory_space<vmem>>, %arg3: memref<16x144xbf16, #tpu.memory_space<vmem>>, %arg4: memref<16x144xbf16, #tpu.memory_space<vmem>>, %arg5: memref<16x144xbf16, #tpu.memory_space<vmem>>, %arg6: memref<16x144xbf16, #tpu.memory_space<vmem>>, %arg7: memref<16x144xbf16, #tpu.memory_space<vmem>>, %arg8: memref<16x1xf32, #tpu.memory_space<vmem>>, %arg9: memref<16x1xf32, #tpu.memory_space<vmem>>, %arg10: memref<16x1xf32, #tpu.memory_space<vmem>>, %arg11: memref<16x1xf32, #tpu.memory_space<vmem>>, %arg12: memref<16x1xf32, #tpu.memory_space<vmem>>, %arg13: memref<16x1xf32, #tpu.memory_space<vmem>>, %arg14: memref<9x256xf32, #tpu.memory_space<vmem>>, %arg15: memref<9x64xf32, #tpu.memory_space<vmem>>, %arg16: memref<9x16xf32, #tpu.memory_space<vmem>>, %arg17: memref<16x8xf32, #tpu.memory_space<vmem>>, %arg18: memref<8x4xf32, #tpu.memory_space<vmem>>, %arg19: memref<4x2xf32, #tpu.memory_space<vmem>>, %arg20: memref<64x2000xbf16, #tpu.memory_space<vmem>>, %arg21: memref<1x2000xf32, #tpu.memory_space<vmem>>, %arg22: memref<2000x256xbf16, #tpu.memory_space<vmem>>, %arg23: memref<1x256xf32, #tpu.memory_space<vmem>>, %arg24: memref<1x1x256xf32, #tpu.memory_space<vmem>>) attributes {dimension_semantics = [#tpu.dimension_semantics<parallel>], iteration_bounds = array<i64: 2>, scalar_prefetch = 0 : i64, scratch_operands = 0 : i64, tpu.core_type = #tpu.core_type<tc>, window_params = [{transform_indices = @transform_0, window_bounds = array<i64: 1, 8, 256>}, {pipeline_mode = #tpu.pipeline_mode<synchronous>, transform_indices = @transform_1, window_bounds = array<i64: 16, 72>}, {pipeline_mode = #tpu.pipeline_mode<synchronous>, transform_indices = @transform_2, window_bounds = array<i64: 16, 144>}, {pipeline_mode = #tpu.pipeline_mode<synchronous>, transform_indices = @transform_3, window_bounds = array<i64: 16, 144>}, {pipeline_mode = #tpu.pipeline_mode<synchronous>, transform_indices = @transform_4, window_bounds = array<i64: 16, 144>}, {pipeline_mode = #tpu.pipeline_mode<synchronous>, transform_indices = @transform_5, window_bounds = array<i64: 16, 144>}, {pipeline_mode = #tpu.pipeline_mode<synchronous>, transform_indices = @transform_6, window_bounds = array<i64: 16, 144>}, {pipeline_mode = #tpu.pipeline_mode<synchronous>, transform_indices = @transform_7, window_bounds = array<i64: 16, 1>}, {pipeline_mode = #tpu.pipeline_mode<synchronous>, transform_indices = @transform_8, window_bounds = array<i64: 16, 1>}, {pipeline_mode = #tpu.pipeline_mode<synchronous>, transform_indices = @transform_9, window_bounds = array<i64: 16, 1>}, {pipeline_mode = #tpu.pipeline_mode<synchronous>, transform_indices = @transform_10, window_bounds = array<i64: 16, 1>}, {pipeline_mode = #tpu.pipeline_mode<synchronous>, transform_indices = @transform_11, window_bounds = array<i64: 16, 1>}, {pipeline_mode = #tpu.pipeline_mode<synchronous>, transform_indices = @transform_12, window_bounds = array<i64: 16, 1>}, {pipeline_mode = #tpu.pipeline_mode<synchronous>, transform_indices = @transform_13, window_bounds = array<i64: 9, 256>}, {pipeline_mode = #tpu.pipeline_mode<synchronous>, transform_indices = @transform_14, window_bounds = array<i64: 9, 64>}, {pipeline_mode = #tpu.pipeline_mode<synchronous>, transform_indices = @transform_15, window_bounds = array<i64: 9, 16>}, {pipeline_mode = #tpu.pipeline_mode<synchronous>, transform_indices = @transform_16, window_bounds = array<i64: 16, 8>}, {pipeline_mode = #tpu.pipeline_mode<synchronous>, transform_indices = @transform_17, window_bounds = array<i64: 8, 4>}, {pipeline_mode = #tpu.pipeline_mode<synchronous>, transform_indices = @transform_18, window_bounds = array<i64: 4, 2>}, {pipeline_mode = #tpu.pipeline_mode<synchronous>, transform_indices = @transform_19, window_bounds = array<i64: 64, 2000>}, {pipeline_mode = #tpu.pipeline_mode<synchronous>, transform_indices = @transform_20, window_bounds = array<i64: 1, 2000>}, {pipeline_mode = #tpu.pipeline_mode<synchronous>, transform_indices = @transform_21, window_bounds = array<i64: 2000, 256>}, {pipeline_mode = #tpu.pipeline_mode<synchronous>, transform_indices = @transform_22, window_bounds = array<i64: 1, 256>}, {transform_indices = @transform_23, window_bounds = array<i64: 1, 1, 256>}]} {
    %c0 = arith.constant 0 : index
    %c0_0 = arith.constant 0 : index
    %c0_1 = arith.constant 0 : index
    %0 = vector.load %arg1[%c0, %c0_0, %c0_1] : memref<1x8x256xf32, #tpu.memory_space<vmem>>, vector<1x8x256xf32>
    %1 = vector.shape_cast %0 : vector<1x8x256xf32> to vector<8x256xf32>
    %cst = arith.constant 0.000000e+00 : f32
    %2 = vector.broadcast %cst : f32 to vector<8x17xf32>
    %3 = tpu.concatenate %2, %1, %2 in 1 : vector<8x17xf32>, vector<8x256xf32>, vector<8x17xf32> -> vector<8x290xf32>
    %4 = vector.extract_strided_slice %3 {offsets = [0, 0], sizes = [8, 256], strides = [1, 1]} : vector<8x290xf32> to vector<8x256xf32>
    %c0_2 = arith.constant 0 : index
    %c0_3 = arith.constant 0 : index
    %5 = vector.load %arg14[%c0_2, %c0_3] : memref<9x256xf32, #tpu.memory_space<vmem>>, vector<1x256xf32>
    %6 = vector.broadcast %5 : vector<1x256xf32> to vector<8x256xf32>
    %7 = arith.mulf %4, %6 : vector<8x256xf32>
    %8 = vector.extract_strided_slice %3 {offsets = [0, 1], sizes = [8, 256], strides = [1, 1]} : vector<8x290xf32> to vector<8x256xf32>
    %c1 = arith.constant 1 : index
    %c0_4 = arith.constant 0 : index
    %9 = vector.load %arg14[%c1, %c0_4] : memref<9x256xf32, #tpu.memory_space<vmem>>, vector<1x256xf32>
    %10 = vector.broadcast %9 : vector<1x256xf32> to vector<8x256xf32>
    %11 = arith.mulf %8, %10 : vector<8x256xf32>
    %12 = vector.extract_strided_slice %3 {offsets = [0, 2], sizes = [8, 256], strides = [1, 1]} : vector<8x290xf32> to vector<8x256xf32>
    %c2 = arith.constant 2 : index
    %c0_5 = arith.constant 0 : index
    %13 = vector.load %arg14[%c2, %c0_5] : memref<9x256xf32, #tpu.memory_space<vmem>>, vector<1x256xf32>
    %14 = vector.broadcast %13 : vector<1x256xf32> to vector<8x256xf32>
    %15 = arith.mulf %12, %14 : vector<8x256xf32>
    %16 = vector.extract_strided_slice %3 {offsets = [0, 16], sizes = [8, 256], strides = [1, 1]} : vector<8x290xf32> to vector<8x256xf32>
    %c3 = arith.constant 3 : index
    %c0_6 = arith.constant 0 : index
    %17 = vector.load %arg14[%c3, %c0_6] : memref<9x256xf32, #tpu.memory_space<vmem>>, vector<1x256xf32>
    %18 = vector.broadcast %17 : vector<1x256xf32> to vector<8x256xf32>
    %19 = arith.mulf %16, %18 : vector<8x256xf32>
    %20 = vector.extract_strided_slice %3 {offsets = [0, 17], sizes = [8, 256], strides = [1, 1]} : vector<8x290xf32> to vector<8x256xf32>
    %c4 = arith.constant 4 : index
    %c0_7 = arith.constant 0 : index
    %21 = vector.load %arg14[%c4, %c0_7] : memref<9x256xf32, #tpu.memory_space<vmem>>, vector<1x256xf32>
    %22 = vector.broadcast %21 : vector<1x256xf32> to vector<8x256xf32>
    %23 = arith.mulf %20, %22 : vector<8x256xf32>
    %24 = vector.extract_strided_slice %3 {offsets = [0, 18], sizes = [8, 256], strides = [1, 1]} : vector<8x290xf32> to vector<8x256xf32>
    %c5 = arith.constant 5 : index
    %c0_8 = arith.constant 0 : index
    %25 = vector.load %arg14[%c5, %c0_8] : memref<9x256xf32, #tpu.memory_space<vmem>>, vector<1x256xf32>
    %26 = vector.broadcast %25 : vector<1x256xf32> to vector<8x256xf32>
    %27 = arith.mulf %24, %26 : vector<8x256xf32>
    %28 = vector.extract_strided_slice %3 {offsets = [0, 32], sizes = [8, 256], strides = [1, 1]} : vector<8x290xf32> to vector<8x256xf32>
    %c6 = arith.constant 6 : index
    %c0_9 = arith.constant 0 : index
    %29 = vector.load %arg14[%c6, %c0_9] : memref<9x256xf32, #tpu.memory_space<vmem>>, vector<1x256xf32>
    %30 = vector.broadcast %29 : vector<1x256xf32> to vector<8x256xf32>
    %31 = arith.mulf %28, %30 : vector<8x256xf32>
    %32 = vector.extract_strided_slice %3 {offsets = [0, 33], sizes = [8, 256], strides = [1, 1]} : vector<8x290xf32> to vector<8x256xf32>
    %c7 = arith.constant 7 : index
    %c0_10 = arith.constant 0 : index
    %33 = vector.load %arg14[%c7, %c0_10] : memref<9x256xf32, #tpu.memory_space<vmem>>, vector<1x256xf32>
    %34 = vector.broadcast %33 : vector<1x256xf32> to vector<8x256xf32>
    %35 = arith.mulf %32, %34 : vector<8x256xf32>
    %36 = vector.extract_strided_slice %3 {offsets = [0, 34], sizes = [8, 256], strides = [1, 1]} : vector<8x290xf32> to vector<8x256xf32>
    %c8 = arith.constant 8 : index
    %c0_11 = arith.constant 0 : index
    %37 = vector.load %arg14[%c8, %c0_11] : memref<9x256xf32, #tpu.memory_space<vmem>>, vector<1x256xf32>
    %38 = vector.broadcast %37 : vector<1x256xf32> to vector<8x256xf32>
    %39 = arith.mulf %36, %38 : vector<8x256xf32>
    %40 = tpu.concatenate %7, %11, %15, %19, %23, %27, %31, %35, %39 in 0 : vector<8x256xf32>, vector<8x256xf32>, vector<8x256xf32>, vector<8x256xf32>, vector<8x256xf32>, vector<8x256xf32>, vector<8x256xf32>, vector<8x256xf32>, vector<8x256xf32> -> vector<72x256xf32>
    %41 = arith.truncf %40 : vector<72x256xf32> to vector<72x256xbf16>
    %c0_12 = arith.constant 0 : index
    %c0_13 = arith.constant 0 : index
    %42 = vector.load %arg2[%c0_12, %c0_13] : memref<16x72xbf16, #tpu.memory_space<vmem>>, vector<16x72xbf16>
    %cst_14 = arith.constant dense<0.000000e+00> : vector<16x256xf32>
    %43 = tpu.matmul %42, %41, %cst_14 {dimension_numbers = #tpu.dot_dimension_numbers<[1], [0], [0], [1], [0, 0, 1, 1], [], []>} : vector<16x72xbf16>, vector<72x256xbf16>, vector<16x256xf32> -> vector<16x256xf32>
    %c0_15 = arith.constant 0 : index
    %c0_16 = arith.constant 0 : index
    %44 = vector.load %arg8[%c0_15, %c0_16] : memref<16x1xf32, #tpu.memory_space<vmem>>, vector<16x1xf32>
    %45 = vector.broadcast %44 : vector<16x1xf32> to vector<16x256xf32>
    %46 = arith.addf %43, %45 : vector<16x256xf32>
    %cst_17 = arith.constant 0.000000e+00 : f32
    %47 = vector.broadcast %cst_17 : f32 to vector<16x256xf32>
    %48 = arith.cmpf oge, %46, %47 : vector<16x256xf32>
    %cst_18 = arith.constant 0.00999999977 : f32
    %49 = vector.broadcast %cst_18 : f32 to vector<16x256xf32>
    %50 = arith.mulf %49, %46 : vector<16x256xf32>
    %51 = arith.select %48, %46, %50 : vector<16x256xi1>, vector<16x256xf32>
    %cst_19 = arith.constant 0.000000e+00 : f32
    %52 = vector.broadcast %cst_19 : f32 to vector<16x256xf32>
    %53 = arith.maximumf %51, %52 : vector<16x256xf32>
    %cst_20 = arith.constant 0.000000e+00 : f32
    %54 = vector.broadcast %cst_20 : f32 to vector<16x17xf32>
    %55 = tpu.concatenate %54, %53, %54 in 1 : vector<16x17xf32>, vector<16x256xf32>, vector<16x17xf32> -> vector<16x290xf32>
    %56 = vector.extract_strided_slice %55 {offsets = [0, 0], sizes = [16, 256], strides = [1, 1]} : vector<16x290xf32> to vector<16x256xf32>
    %c0_21 = arith.constant 0 : index
    %c0_22 = arith.constant 0 : index
    %57 = vector.load %arg14[%c0_21, %c0_22] : memref<9x256xf32, #tpu.memory_space<vmem>>, vector<1x256xf32>
    %58 = vector.broadcast %57 : vector<1x256xf32> to vector<16x256xf32>
    %59 = arith.mulf %56, %58 : vector<16x256xf32>
    %60 = vector.extract_strided_slice %55 {offsets = [0, 1], sizes = [16, 256], strides = [1, 1]} : vector<16x290xf32> to vector<16x256xf32>
    %c1_23 = arith.constant 1 : index
    %c0_24 = arith.constant 0 : index
    %61 = vector.load %arg14[%c1_23, %c0_24] : memref<9x256xf32, #tpu.memory_space<vmem>>, vector<1x256xf32>
    %62 = vector.broadcast %61 : vector<1x256xf32> to vector<16x256xf32>
    %63 = arith.mulf %60, %62 : vector<16x256xf32>
    %64 = vector.extract_strided_slice %55 {offsets = [0, 2], sizes = [16, 256], strides = [1, 1]} : vector<16x290xf32> to vector<16x256xf32>
    %c2_25 = arith.constant 2 : index
    %c0_26 = arith.constant 0 : index
    %65 = vector.load %arg14[%c2_25, %c0_26] : memref<9x256xf32, #tpu.memory_space<vmem>>, vector<1x256xf32>
    %66 = vector.broadcast %65 : vector<1x256xf32> to vector<16x256xf32>
    %67 = arith.mulf %64, %66 : vector<16x256xf32>
    %68 = vector.extract_strided_slice %55 {offsets = [0, 16], sizes = [16, 256], strides = [1, 1]} : vector<16x290xf32> to vector<16x256xf32>
    %c3_27 = arith.constant 3 : index
    %c0_28 = arith.constant 0 : index
    %69 = vector.load %arg14[%c3_27, %c0_28] : memref<9x256xf32, #tpu.memory_space<vmem>>, vector<1x256xf32>
    %70 = vector.broadcast %69 : vector<1x256xf32> to vector<16x256xf32>
    %71 = arith.mulf %68, %70 : vector<16x256xf32>
    %72 = vector.extract_strided_slice %55 {offsets = [0, 17], sizes = [16, 256], strides = [1, 1]} : vector<16x290xf32> to vector<16x256xf32>
    %c4_29 = arith.constant 4 : index
    %c0_30 = arith.constant 0 : index
    %73 = vector.load %arg14[%c4_29, %c0_30] : memref<9x256xf32, #tpu.memory_space<vmem>>, vector<1x256xf32>
    %74 = vector.broadcast %73 : vector<1x256xf32> to vector<16x256xf32>
    %75 = arith.mulf %72, %74 : vector<16x256xf32>
    %76 = vector.extract_strided_slice %55 {offsets = [0, 18], sizes = [16, 256], strides = [1, 1]} : vector<16x290xf32> to vector<16x256xf32>
    %c5_31 = arith.constant 5 : index
    %c0_32 = arith.constant 0 : index
    %77 = vector.load %arg14[%c5_31, %c0_32] : memref<9x256xf32, #tpu.memory_space<vmem>>, vector<1x256xf32>
    %78 = vector.broadcast %77 : vector<1x256xf32> to vector<16x256xf32>
    %79 = arith.mulf %76, %78 : vector<16x256xf32>
    %80 = vector.extract_strided_slice %55 {offsets = [0, 32], sizes = [16, 256], strides = [1, 1]} : vector<16x290xf32> to vector<16x256xf32>
    %c6_33 = arith.constant 6 : index
    %c0_34 = arith.constant 0 : index
    %81 = vector.load %arg14[%c6_33, %c0_34] : memref<9x256xf32, #tpu.memory_space<vmem>>, vector<1x256xf32>
    %82 = vector.broadcast %81 : vector<1x256xf32> to vector<16x256xf32>
    %83 = arith.mulf %80, %82 : vector<16x256xf32>
    %84 = vector.extract_strided_slice %55 {offsets = [0, 33], sizes = [16, 256], strides = [1, 1]} : vector<16x290xf32> to vector<16x256xf32>
    %c7_35 = arith.constant 7 : index
    %c0_36 = arith.constant 0 : index
    %85 = vector.load %arg14[%c7_35, %c0_36] : memref<9x256xf32, #tpu.memory_space<vmem>>, vector<1x256xf32>
    %86 = vector.broadcast %85 : vector<1x256xf32> to vector<16x256xf32>
    %87 = arith.mulf %84, %86 : vector<16x256xf32>
    %88 = vector.extract_strided_slice %55 {offsets = [0, 34], sizes = [16, 256], strides = [1, 1]} : vector<16x290xf32> to vector<16x256xf32>
    %c8_37 = arith.constant 8 : index
    %c0_38 = arith.constant 0 : index
    %89 = vector.load %arg14[%c8_37, %c0_38] : memref<9x256xf32, #tpu.memory_space<vmem>>, vector<1x256xf32>
    %90 = vector.broadcast %89 : vector<1x256xf32> to vector<16x256xf32>
    %91 = arith.mulf %88, %90 : vector<16x256xf32>
    %92 = tpu.concatenate %59, %63, %67, %71, %75, %79, %83, %87, %91 in 0 : vector<16x256xf32>, vector<16x256xf32>, vector<16x256xf32>, vector<16x256xf32>, vector<16x256xf32>, vector<16x256xf32>, vector<16x256xf32>, vector<16x256xf32>, vector<16x256xf32> -> vector<144x256xf32>
    %93 = arith.truncf %92 : vector<144x256xf32> to vector<144x256xbf16>
    %c0_39 = arith.constant 0 : index
    %c0_40 = arith.constant 0 : index
    %94 = vector.load %arg3[%c0_39, %c0_40] : memref<16x144xbf16, #tpu.memory_space<vmem>>, vector<16x144xbf16>
    %cst_41 = arith.constant dense<0.000000e+00> : vector<16x256xf32>
    %95 = tpu.matmul %94, %93, %cst_41 {dimension_numbers = #tpu.dot_dimension_numbers<[1], [0], [0], [1], [0, 0, 1, 1], [], []>} : vector<16x144xbf16>, vector<144x256xbf16>, vector<16x256xf32> -> vector<16x256xf32>
    %c0_42 = arith.constant 0 : index
    %c0_43 = arith.constant 0 : index
    %96 = vector.load %arg9[%c0_42, %c0_43] : memref<16x1xf32, #tpu.memory_space<vmem>>, vector<16x1xf32>
    %97 = vector.broadcast %96 : vector<16x1xf32> to vector<16x256xf32>
    %98 = arith.addf %95, %97 : vector<16x256xf32>
    %cst_44 = arith.constant 0.000000e+00 : f32
    %99 = vector.broadcast %cst_44 : f32 to vector<16x256xf32>
    %100 = arith.maximumf %98, %99 : vector<16x256xf32>
    %cst_45 = arith.constant 0.000000e+00 : f32
    %101 = vector.broadcast %cst_45 : f32 to vector<16x17xf32>
    %102 = tpu.concatenate %100, %101 in 1 : vector<16x256xf32>, vector<16x17xf32> -> vector<16x273xf32>
    %103 = vector.extract_strided_slice %102 {offsets = [0, 1], sizes = [16, 256], strides = [1, 1]} : vector<16x273xf32> to vector<16x256xf32>
    %104 = arith.maximumf %100, %103 : vector<16x256xf32>
    %105 = vector.extract_strided_slice %102 {offsets = [0, 16], sizes = [16, 256], strides = [1, 1]} : vector<16x273xf32> to vector<16x256xf32>
    %106 = arith.maximumf %104, %105 : vector<16x256xf32>
    %107 = vector.extract_strided_slice %102 {offsets = [0, 17], sizes = [16, 256], strides = [1, 1]} : vector<16x273xf32> to vector<16x256xf32>
    %108 = arith.maximumf %106, %107 : vector<16x256xf32>
    %109 = vector.extract_strided_slice %108 {offsets = [0, 0], sizes = [16, 16], strides = [1, 1]} : vector<16x256xf32> to vector<16x16xf32>
    %110 = vector.extract_strided_slice %108 {offsets = [0, 32], sizes = [16, 16], strides = [1, 1]} : vector<16x256xf32> to vector<16x16xf32>
    %111 = vector.extract_strided_slice %108 {offsets = [0, 64], sizes = [16, 16], strides = [1, 1]} : vector<16x256xf32> to vector<16x16xf32>
    %112 = vector.extract_strided_slice %108 {offsets = [0, 96], sizes = [16, 16], strides = [1, 1]} : vector<16x256xf32> to vector<16x16xf32>
    %113 = vector.extract_strided_slice %108 {offsets = [0, 128], sizes = [16, 16], strides = [1, 1]} : vector<16x256xf32> to vector<16x16xf32>
    %114 = vector.extract_strided_slice %108 {offsets = [0, 160], sizes = [16, 16], strides = [1, 1]} : vector<16x256xf32> to vector<16x16xf32>
    %115 = vector.extract_strided_slice %108 {offsets = [0, 192], sizes = [16, 16], strides = [1, 1]} : vector<16x256xf32> to vector<16x16xf32>
    %116 = vector.extract_strided_slice %108 {offsets = [0, 224], sizes = [16, 16], strides = [1, 1]} : vector<16x256xf32> to vector<16x16xf32>
    %117 = tpu.concatenate %109, %110, %111, %112, %113, %114, %115, %116 in 0 : vector<16x16xf32>, vector<16x16xf32>, vector<16x16xf32>, vector<16x16xf32>, vector<16x16xf32>, vector<16x16xf32>, vector<16x16xf32>, vector<16x16xf32> -> vector<128x16xf32>
    %c0_46 = arith.constant 0 : index
    %c0_47 = arith.constant 0 : index
    %118 = vector.load %arg17[%c0_46, %c0_47] : memref<16x8xf32, #tpu.memory_space<vmem>>, vector<16x8xf32>
    %cst_48 = arith.constant dense<0.000000e+00> : vector<128x8xf32>
    %119 = tpu.matmul %117, %118, %cst_48 {dimension_numbers = #tpu.dot_dimension_numbers<[1], [0], [0], [1], [0, 0, 1, 1], [], []>} : vector<128x16xf32>, vector<16x8xf32>, vector<128x8xf32> -> vector<128x8xf32>
    %120 = vector.extract_strided_slice %119 {offsets = [0, 0], sizes = [16, 8], strides = [1, 1]} : vector<128x8xf32> to vector<16x8xf32>
    %121 = vector.extract_strided_slice %119 {offsets = [16, 0], sizes = [16, 8], strides = [1, 1]} : vector<128x8xf32> to vector<16x8xf32>
    %122 = vector.extract_strided_slice %119 {offsets = [32, 0], sizes = [16, 8], strides = [1, 1]} : vector<128x8xf32> to vector<16x8xf32>
    %123 = vector.extract_strided_slice %119 {offsets = [48, 0], sizes = [16, 8], strides = [1, 1]} : vector<128x8xf32> to vector<16x8xf32>
    %124 = vector.extract_strided_slice %119 {offsets = [64, 0], sizes = [16, 8], strides = [1, 1]} : vector<128x8xf32> to vector<16x8xf32>
    %125 = vector.extract_strided_slice %119 {offsets = [80, 0], sizes = [16, 8], strides = [1, 1]} : vector<128x8xf32> to vector<16x8xf32>
    %126 = vector.extract_strided_slice %119 {offsets = [96, 0], sizes = [16, 8], strides = [1, 1]} : vector<128x8xf32> to vector<16x8xf32>
    %127 = vector.extract_strided_slice %119 {offsets = [112, 0], sizes = [16, 8], strides = [1, 1]} : vector<128x8xf32> to vector<16x8xf32>
    %128 = tpu.concatenate %120, %121, %122, %123, %124, %125, %126, %127 in 1 : vector<16x8xf32>, vector<16x8xf32>, vector<16x8xf32>, vector<16x8xf32>, vector<16x8xf32>, vector<16x8xf32>, vector<16x8xf32>, vector<16x8xf32> -> vector<16x64xf32>
    %cst_49 = arith.constant 0.000000e+00 : f32
    %129 = vector.broadcast %cst_49 : f32 to vector<16x9xf32>
    %130 = tpu.concatenate %129, %128, %129 in 1 : vector<16x9xf32>, vector<16x64xf32>, vector<16x9xf32> -> vector<16x82xf32>
    %131 = vector.extract_strided_slice %130 {offsets = [0, 0], sizes = [16, 64], strides = [1, 1]} : vector<16x82xf32> to vector<16x64xf32>
    %c0_50 = arith.constant 0 : index
    %c0_51 = arith.constant 0 : index
    %132 = vector.load %arg15[%c0_50, %c0_51] : memref<9x64xf32, #tpu.memory_space<vmem>>, vector<1x64xf32>
    %133 = vector.broadcast %132 : vector<1x64xf32> to vector<16x64xf32>
    %134 = arith.mulf %131, %133 : vector<16x64xf32>
    %135 = vector.extract_strided_slice %130 {offsets = [0, 1], sizes = [16, 64], strides = [1, 1]} : vector<16x82xf32> to vector<16x64xf32>
    %c1_52 = arith.constant 1 : index
    %c0_53 = arith.constant 0 : index
    %136 = vector.load %arg15[%c1_52, %c0_53] : memref<9x64xf32, #tpu.memory_space<vmem>>, vector<1x64xf32>
    %137 = vector.broadcast %136 : vector<1x64xf32> to vector<16x64xf32>
    %138 = arith.mulf %135, %137 : vector<16x64xf32>
    %139 = vector.extract_strided_slice %130 {offsets = [0, 2], sizes = [16, 64], strides = [1, 1]} : vector<16x82xf32> to vector<16x64xf32>
    %c2_54 = arith.constant 2 : index
    %c0_55 = arith.constant 0 : index
    %140 = vector.load %arg15[%c2_54, %c0_55] : memref<9x64xf32, #tpu.memory_space<vmem>>, vector<1x64xf32>
    %141 = vector.broadcast %140 : vector<1x64xf32> to vector<16x64xf32>
    %142 = arith.mulf %139, %141 : vector<16x64xf32>
    %143 = vector.extract_strided_slice %130 {offsets = [0, 8], sizes = [16, 64], strides = [1, 1]} : vector<16x82xf32> to vector<16x64xf32>
    %c3_56 = arith.constant 3 : index
    %c0_57 = arith.constant 0 : index
    %144 = vector.load %arg15[%c3_56, %c0_57] : memref<9x64xf32, #tpu.memory_space<vmem>>, vector<1x64xf32>
    %145 = vector.broadcast %144 : vector<1x64xf32> to vector<16x64xf32>
    %146 = arith.mulf %143, %145 : vector<16x64xf32>
    %147 = vector.extract_strided_slice %130 {offsets = [0, 9], sizes = [16, 64], strides = [1, 1]} : vector<16x82xf32> to vector<16x64xf32>
    %c4_58 = arith.constant 4 : index
    %c0_59 = arith.constant 0 : index
    %148 = vector.load %arg15[%c4_58, %c0_59] : memref<9x64xf32, #tpu.memory_space<vmem>>, vector<1x64xf32>
    %149 = vector.broadcast %148 : vector<1x64xf32> to vector<16x64xf32>
    %150 = arith.mulf %147, %149 : vector<16x64xf32>
    %151 = vector.extract_strided_slice %130 {offsets = [0, 10], sizes = [16, 64], strides = [1, 1]} : vector<16x82xf32> to vector<16x64xf32>
    %c5_60 = arith.constant 5 : index
    %c0_61 = arith.constant 0 : index
    %152 = vector.load %arg15[%c5_60, %c0_61] : memref<9x64xf32, #tpu.memory_space<vmem>>, vector<1x64xf32>
    %153 = vector.broadcast %152 : vector<1x64xf32> to vector<16x64xf32>
    %154 = arith.mulf %151, %153 : vector<16x64xf32>
    %155 = vector.extract_strided_slice %130 {offsets = [0, 16], sizes = [16, 64], strides = [1, 1]} : vector<16x82xf32> to vector<16x64xf32>
    %c6_62 = arith.constant 6 : index
    %c0_63 = arith.constant 0 : index
    %156 = vector.load %arg15[%c6_62, %c0_63] : memref<9x64xf32, #tpu.memory_space<vmem>>, vector<1x64xf32>
    %157 = vector.broadcast %156 : vector<1x64xf32> to vector<16x64xf32>
    %158 = arith.mulf %155, %157 : vector<16x64xf32>
    %159 = vector.extract_strided_slice %130 {offsets = [0, 17], sizes = [16, 64], strides = [1, 1]} : vector<16x82xf32> to vector<16x64xf32>
    %c7_64 = arith.constant 7 : index
    %c0_65 = arith.constant 0 : index
    %160 = vector.load %arg15[%c7_64, %c0_65] : memref<9x64xf32, #tpu.memory_space<vmem>>, vector<1x64xf32>
    %161 = vector.broadcast %160 : vector<1x64xf32> to vector<16x64xf32>
    %162 = arith.mulf %159, %161 : vector<16x64xf32>
    %163 = vector.extract_strided_slice %130 {offsets = [0, 18], sizes = [16, 64], strides = [1, 1]} : vector<16x82xf32> to vector<16x64xf32>
    %c8_66 = arith.constant 8 : index
    %c0_67 = arith.constant 0 : index
    %164 = vector.load %arg15[%c8_66, %c0_67] : memref<9x64xf32, #tpu.memory_space<vmem>>, vector<1x64xf32>
    %165 = vector.broadcast %164 : vector<1x64xf32> to vector<16x64xf32>
    %166 = arith.mulf %163, %165 : vector<16x64xf32>
    %167 = tpu.concatenate %134, %138, %142, %146, %150, %154, %158, %162, %166 in 0 : vector<16x64xf32>, vector<16x64xf32>, vector<16x64xf32>, vector<16x64xf32>, vector<16x64xf32>, vector<16x64xf32>, vector<16x64xf32>, vector<16x64xf32>, vector<16x64xf32> -> vector<144x64xf32>
    %168 = arith.truncf %167 : vector<144x64xf32> to vector<144x64xbf16>
    %c0_68 = arith.constant 0 : index
    %c0_69 = arith.constant 0 : index
    %169 = vector.load %arg4[%c0_68, %c0_69] : memref<16x144xbf16, #tpu.memory_space<vmem>>, vector<16x144xbf16>
    %cst_70 = arith.constant dense<0.000000e+00> : vector<16x64xf32>
    %170 = tpu.matmul %169, %168, %cst_70 {dimension_numbers = #tpu.dot_dimension_numbers<[1], [0], [0], [1], [0, 0, 1, 1], [], []>} : vector<16x144xbf16>, vector<144x64xbf16>, vector<16x64xf32> -> vector<16x64xf32>
    %c0_71 = arith.constant 0 : index
    %c0_72 = arith.constant 0 : index
    %171 = vector.load %arg10[%c0_71, %c0_72] : memref<16x1xf32, #tpu.memory_space<vmem>>, vector<16x1xf32>
    %172 = vector.broadcast %171 : vector<16x1xf32> to vector<16x64xf32>
    %173 = arith.addf %170, %172 : vector<16x64xf32>
    %cst_73 = arith.constant 0.000000e+00 : f32
    %174 = vector.broadcast %cst_73 : f32 to vector<16x64xf32>
    %175 = arith.cmpf oge, %173, %174 : vector<16x64xf32>
    %cst_74 = arith.constant 0.00999999977 : f32
    %176 = vector.broadcast %cst_74 : f32 to vector<16x64xf32>
    %177 = arith.mulf %176, %173 : vector<16x64xf32>
    %178 = arith.select %175, %173, %177 : vector<16x64xi1>, vector<16x64xf32>
    %cst_75 = arith.constant 0.000000e+00 : f32
    %179 = vector.broadcast %cst_75 : f32 to vector<16x9xf32>
    %180 = tpu.concatenate %179, %178, %179 in 1 : vector<16x9xf32>, vector<16x64xf32>, vector<16x9xf32> -> vector<16x82xf32>
    %181 = vector.extract_strided_slice %180 {offsets = [0, 0], sizes = [16, 64], strides = [1, 1]} : vector<16x82xf32> to vector<16x64xf32>
    %c0_76 = arith.constant 0 : index
    %c0_77 = arith.constant 0 : index
    %182 = vector.load %arg15[%c0_76, %c0_77] : memref<9x64xf32, #tpu.memory_space<vmem>>, vector<1x64xf32>
    %183 = vector.broadcast %182 : vector<1x64xf32> to vector<16x64xf32>
    %184 = arith.mulf %181, %183 : vector<16x64xf32>
    %185 = vector.extract_strided_slice %180 {offsets = [0, 1], sizes = [16, 64], strides = [1, 1]} : vector<16x82xf32> to vector<16x64xf32>
    %c1_78 = arith.constant 1 : index
    %c0_79 = arith.constant 0 : index
    %186 = vector.load %arg15[%c1_78, %c0_79] : memref<9x64xf32, #tpu.memory_space<vmem>>, vector<1x64xf32>
    %187 = vector.broadcast %186 : vector<1x64xf32> to vector<16x64xf32>
    %188 = arith.mulf %185, %187 : vector<16x64xf32>
    %189 = vector.extract_strided_slice %180 {offsets = [0, 2], sizes = [16, 64], strides = [1, 1]} : vector<16x82xf32> to vector<16x64xf32>
    %c2_80 = arith.constant 2 : index
    %c0_81 = arith.constant 0 : index
    %190 = vector.load %arg15[%c2_80, %c0_81] : memref<9x64xf32, #tpu.memory_space<vmem>>, vector<1x64xf32>
    %191 = vector.broadcast %190 : vector<1x64xf32> to vector<16x64xf32>
    %192 = arith.mulf %189, %191 : vector<16x64xf32>
    %193 = vector.extract_strided_slice %180 {offsets = [0, 8], sizes = [16, 64], strides = [1, 1]} : vector<16x82xf32> to vector<16x64xf32>
    %c3_82 = arith.constant 3 : index
    %c0_83 = arith.constant 0 : index
    %194 = vector.load %arg15[%c3_82, %c0_83] : memref<9x64xf32, #tpu.memory_space<vmem>>, vector<1x64xf32>
    %195 = vector.broadcast %194 : vector<1x64xf32> to vector<16x64xf32>
    %196 = arith.mulf %193, %195 : vector<16x64xf32>
    %197 = vector.extract_strided_slice %180 {offsets = [0, 9], sizes = [16, 64], strides = [1, 1]} : vector<16x82xf32> to vector<16x64xf32>
    %c4_84 = arith.constant 4 : index
    %c0_85 = arith.constant 0 : index
    %198 = vector.load %arg15[%c4_84, %c0_85] : memref<9x64xf32, #tpu.memory_space<vmem>>, vector<1x64xf32>
    %199 = vector.broadcast %198 : vector<1x64xf32> to vector<16x64xf32>
    %200 = arith.mulf %197, %199 : vector<16x64xf32>
    %201 = vector.extract_strided_slice %180 {offsets = [0, 10], sizes = [16, 64], strides = [1, 1]} : vector<16x82xf32> to vector<16x64xf32>
    %c5_86 = arith.constant 5 : index
    %c0_87 = arith.constant 0 : index
    %202 = vector.load %arg15[%c5_86, %c0_87] : memref<9x64xf32, #tpu.memory_space<vmem>>, vector<1x64xf32>
    %203 = vector.broadcast %202 : vector<1x64xf32> to vector<16x64xf32>
    %204 = arith.mulf %201, %203 : vector<16x64xf32>
    %205 = vector.extract_strided_slice %180 {offsets = [0, 16], sizes = [16, 64], strides = [1, 1]} : vector<16x82xf32> to vector<16x64xf32>
    %c6_88 = arith.constant 6 : index
    %c0_89 = arith.constant 0 : index
    %206 = vector.load %arg15[%c6_88, %c0_89] : memref<9x64xf32, #tpu.memory_space<vmem>>, vector<1x64xf32>
    %207 = vector.broadcast %206 : vector<1x64xf32> to vector<16x64xf32>
    %208 = arith.mulf %205, %207 : vector<16x64xf32>
    %209 = vector.extract_strided_slice %180 {offsets = [0, 17], sizes = [16, 64], strides = [1, 1]} : vector<16x82xf32> to vector<16x64xf32>
    %c7_90 = arith.constant 7 : index
    %c0_91 = arith.constant 0 : index
    %210 = vector.load %arg15[%c7_90, %c0_91] : memref<9x64xf32, #tpu.memory_space<vmem>>, vector<1x64xf32>
    %211 = vector.broadcast %210 : vector<1x64xf32> to vector<16x64xf32>
    %212 = arith.mulf %209, %211 : vector<16x64xf32>
    %213 = vector.extract_strided_slice %180 {offsets = [0, 18], sizes = [16, 64], strides = [1, 1]} : vector<16x82xf32> to vector<16x64xf32>
    %c8_92 = arith.constant 8 : index
    %c0_93 = arith.constant 0 : index
    %214 = vector.load %arg15[%c8_92, %c0_93] : memref<9x64xf32, #tpu.memory_space<vmem>>, vector<1x64xf32>
    %215 = vector.broadcast %214 : vector<1x64xf32> to vector<16x64xf32>
    %216 = arith.mulf %213, %215 : vector<16x64xf32>
    %217 = tpu.concatenate %184, %188, %192, %196, %200, %204, %208, %212, %216 in 0 : vector<16x64xf32>, vector<16x64xf32>, vector<16x64xf32>, vector<16x64xf32>, vector<16x64xf32>, vector<16x64xf32>, vector<16x64xf32>, vector<16x64xf32>, vector<16x64xf32> -> vector<144x64xf32>
    %218 = arith.truncf %217 : vector<144x64xf32> to vector<144x64xbf16>
    %c0_94 = arith.constant 0 : index
    %c0_95 = arith.constant 0 : index
    %219 = vector.load %arg5[%c0_94, %c0_95] : memref<16x144xbf16, #tpu.memory_space<vmem>>, vector<16x144xbf16>
    %cst_96 = arith.constant dense<0.000000e+00> : vector<16x64xf32>
    %220 = tpu.matmul %219, %218, %cst_96 {dimension_numbers = #tpu.dot_dimension_numbers<[1], [0], [0], [1], [0, 0, 1, 1], [], []>} : vector<16x144xbf16>, vector<144x64xbf16>, vector<16x64xf32> -> vector<16x64xf32>
    %c0_97 = arith.constant 0 : index
    %c0_98 = arith.constant 0 : index
    %221 = vector.load %arg11[%c0_97, %c0_98] : memref<16x1xf32, #tpu.memory_space<vmem>>, vector<16x1xf32>
    %222 = vector.broadcast %221 : vector<16x1xf32> to vector<16x64xf32>
    %223 = arith.addf %220, %222 : vector<16x64xf32>
    %cst_99 = arith.constant 0.000000e+00 : f32
    %224 = vector.broadcast %cst_99 : f32 to vector<16x64xf32>
    %225 = arith.maximumf %223, %224 : vector<16x64xf32>
    %cst_100 = arith.constant 0.000000e+00 : f32
    %226 = vector.broadcast %cst_100 : f32 to vector<16x9xf32>
    %227 = tpu.concatenate %225, %226 in 1 : vector<16x64xf32>, vector<16x9xf32> -> vector<16x73xf32>
    %228 = vector.extract_strided_slice %227 {offsets = [0, 1], sizes = [16, 64], strides = [1, 1]} : vector<16x73xf32> to vector<16x64xf32>
    %229 = arith.maximumf %225, %228 : vector<16x64xf32>
    %230 = vector.extract_strided_slice %227 {offsets = [0, 8], sizes = [16, 64], strides = [1, 1]} : vector<16x73xf32> to vector<16x64xf32>
    %231 = arith.maximumf %229, %230 : vector<16x64xf32>
    %232 = vector.extract_strided_slice %227 {offsets = [0, 9], sizes = [16, 64], strides = [1, 1]} : vector<16x73xf32> to vector<16x64xf32>
    %233 = arith.maximumf %231, %232 : vector<16x64xf32>
    %234 = vector.extract_strided_slice %233 {offsets = [0, 0], sizes = [16, 8], strides = [1, 1]} : vector<16x64xf32> to vector<16x8xf32>
    %235 = vector.extract_strided_slice %233 {offsets = [0, 16], sizes = [16, 8], strides = [1, 1]} : vector<16x64xf32> to vector<16x8xf32>
    %236 = vector.extract_strided_slice %233 {offsets = [0, 32], sizes = [16, 8], strides = [1, 1]} : vector<16x64xf32> to vector<16x8xf32>
    %237 = vector.extract_strided_slice %233 {offsets = [0, 48], sizes = [16, 8], strides = [1, 1]} : vector<16x64xf32> to vector<16x8xf32>
    %238 = tpu.concatenate %234, %235, %236, %237 in 0 : vector<16x8xf32>, vector<16x8xf32>, vector<16x8xf32>, vector<16x8xf32> -> vector<64x8xf32>
    %c0_101 = arith.constant 0 : index
    %c0_102 = arith.constant 0 : index
    %239 = vector.load %arg18[%c0_101, %c0_102] : memref<8x4xf32, #tpu.memory_space<vmem>>, vector<8x4xf32>
    %cst_103 = arith.constant dense<0.000000e+00> : vector<64x4xf32>
    %240 = tpu.matmul %238, %239, %cst_103 {dimension_numbers = #tpu.dot_dimension_numbers<[1], [0], [0], [1], [0, 0, 1, 1], [], []>} : vector<64x8xf32>, vector<8x4xf32>, vector<64x4xf32> -> vector<64x4xf32>
    %241 = vector.extract_strided_slice %240 {offsets = [0, 0], sizes = [16, 4], strides = [1, 1]} : vector<64x4xf32> to vector<16x4xf32>
    %242 = vector.extract_strided_slice %240 {offsets = [16, 0], sizes = [16, 4], strides = [1, 1]} : vector<64x4xf32> to vector<16x4xf32>
    %243 = vector.extract_strided_slice %240 {offsets = [32, 0], sizes = [16, 4], strides = [1, 1]} : vector<64x4xf32> to vector<16x4xf32>
    %244 = vector.extract_strided_slice %240 {offsets = [48, 0], sizes = [16, 4], strides = [1, 1]} : vector<64x4xf32> to vector<16x4xf32>
    %245 = tpu.concatenate %241, %242, %243, %244 in 1 : vector<16x4xf32>, vector<16x4xf32>, vector<16x4xf32>, vector<16x4xf32> -> vector<16x16xf32>
    %cst_104 = arith.constant 0.000000e+00 : f32
    %246 = vector.broadcast %cst_104 : f32 to vector<16x5xf32>
    %247 = tpu.concatenate %246, %245, %246 in 1 : vector<16x5xf32>, vector<16x16xf32>, vector<16x5xf32> -> vector<16x26xf32>
    %248 = vector.extract_strided_slice %247 {offsets = [0, 0], sizes = [16, 16], strides = [1, 1]} : vector<16x26xf32> to vector<16x16xf32>
    %c0_105 = arith.constant 0 : index
    %c0_106 = arith.constant 0 : index
    %249 = vector.load %arg16[%c0_105, %c0_106] : memref<9x16xf32, #tpu.memory_space<vmem>>, vector<1x16xf32>
    %250 = vector.broadcast %249 : vector<1x16xf32> to vector<16x16xf32>
    %251 = arith.mulf %248, %250 : vector<16x16xf32>
    %252 = vector.extract_strided_slice %247 {offsets = [0, 1], sizes = [16, 16], strides = [1, 1]} : vector<16x26xf32> to vector<16x16xf32>
    %c1_107 = arith.constant 1 : index
    %c0_108 = arith.constant 0 : index
    %253 = vector.load %arg16[%c1_107, %c0_108] : memref<9x16xf32, #tpu.memory_space<vmem>>, vector<1x16xf32>
    %254 = vector.broadcast %253 : vector<1x16xf32> to vector<16x16xf32>
    %255 = arith.mulf %252, %254 : vector<16x16xf32>
    %256 = vector.extract_strided_slice %247 {offsets = [0, 2], sizes = [16, 16], strides = [1, 1]} : vector<16x26xf32> to vector<16x16xf32>
    %c2_109 = arith.constant 2 : index
    %c0_110 = arith.constant 0 : index
    %257 = vector.load %arg16[%c2_109, %c0_110] : memref<9x16xf32, #tpu.memory_space<vmem>>, vector<1x16xf32>
    %258 = vector.broadcast %257 : vector<1x16xf32> to vector<16x16xf32>
    %259 = arith.mulf %256, %258 : vector<16x16xf32>
    %260 = vector.extract_strided_slice %247 {offsets = [0, 4], sizes = [16, 16], strides = [1, 1]} : vector<16x26xf32> to vector<16x16xf32>
    %c3_111 = arith.constant 3 : index
    %c0_112 = arith.constant 0 : index
    %261 = vector.load %arg16[%c3_111, %c0_112] : memref<9x16xf32, #tpu.memory_space<vmem>>, vector<1x16xf32>
    %262 = vector.broadcast %261 : vector<1x16xf32> to vector<16x16xf32>
    %263 = arith.mulf %260, %262 : vector<16x16xf32>
    %264 = vector.extract_strided_slice %247 {offsets = [0, 5], sizes = [16, 16], strides = [1, 1]} : vector<16x26xf32> to vector<16x16xf32>
    %c4_113 = arith.constant 4 : index
    %c0_114 = arith.constant 0 : index
    %265 = vector.load %arg16[%c4_113, %c0_114] : memref<9x16xf32, #tpu.memory_space<vmem>>, vector<1x16xf32>
    %266 = vector.broadcast %265 : vector<1x16xf32> to vector<16x16xf32>
    %267 = arith.mulf %264, %266 : vector<16x16xf32>
    %268 = vector.extract_strided_slice %247 {offsets = [0, 6], sizes = [16, 16], strides = [1, 1]} : vector<16x26xf32> to vector<16x16xf32>
    %c5_115 = arith.constant 5 : index
    %c0_116 = arith.constant 0 : index
    %269 = vector.load %arg16[%c5_115, %c0_116] : memref<9x16xf32, #tpu.memory_space<vmem>>, vector<1x16xf32>
    %270 = vector.broadcast %269 : vector<1x16xf32> to vector<16x16xf32>
    %271 = arith.mulf %268, %270 : vector<16x16xf32>
    %272 = vector.extract_strided_slice %247 {offsets = [0, 8], sizes = [16, 16], strides = [1, 1]} : vector<16x26xf32> to vector<16x16xf32>
    %c6_117 = arith.constant 6 : index
    %c0_118 = arith.constant 0 : index
    %273 = vector.load %arg16[%c6_117, %c0_118] : memref<9x16xf32, #tpu.memory_space<vmem>>, vector<1x16xf32>
    %274 = vector.broadcast %273 : vector<1x16xf32> to vector<16x16xf32>
    %275 = arith.mulf %272, %274 : vector<16x16xf32>
    %276 = vector.extract_strided_slice %247 {offsets = [0, 9], sizes = [16, 16], strides = [1, 1]} : vector<16x26xf32> to vector<16x16xf32>
    %c7_119 = arith.constant 7 : index
    %c0_120 = arith.constant 0 : index
    %277 = vector.load %arg16[%c7_119, %c0_120] : memref<9x16xf32, #tpu.memory_space<vmem>>, vector<1x16xf32>
    %278 = vector.broadcast %277 : vector<1x16xf32> to vector<16x16xf32>
    %279 = arith.mulf %276, %278 : vector<16x16xf32>
    %280 = vector.extract_strided_slice %247 {offsets = [0, 10], sizes = [16, 16], strides = [1, 1]} : vector<16x26xf32> to vector<16x16xf32>
    %c8_121 = arith.constant 8 : index
    %c0_122 = arith.constant 0 : index
    %281 = vector.load %arg16[%c8_121, %c0_122] : memref<9x16xf32, #tpu.memory_space<vmem>>, vector<1x16xf32>
    %282 = vector.broadcast %281 : vector<1x16xf32> to vector<16x16xf32>
    %283 = arith.mulf %280, %282 : vector<16x16xf32>
    %284 = tpu.concatenate %251, %255, %259, %263, %267, %271, %275, %279, %283 in 0 : vector<16x16xf32>, vector<16x16xf32>, vector<16x16xf32>, vector<16x16xf32>, vector<16x16xf32>, vector<16x16xf32>, vector<16x16xf32>, vector<16x16xf32>, vector<16x16xf32> -> vector<144x16xf32>
    %285 = arith.truncf %284 : vector<144x16xf32> to vector<144x16xbf16>
    %c0_123 = arith.constant 0 : index
    %c0_124 = arith.constant 0 : index
    %286 = vector.load %arg6[%c0_123, %c0_124] : memref<16x144xbf16, #tpu.memory_space<vmem>>, vector<16x144xbf16>
    %cst_125 = arith.constant dense<0.000000e+00> : vector<16x16xf32>
    %287 = tpu.matmul %286, %285, %cst_125 {dimension_numbers = #tpu.dot_dimension_numbers<[1], [0], [0], [1], [0, 0, 1, 1], [], []>} : vector<16x144xbf16>, vector<144x16xbf16>, vector<16x16xf32> -> vector<16x16xf32>
    %c0_126 = arith.constant 0 : index
    %c0_127 = arith.constant 0 : index
    %288 = vector.load %arg12[%c0_126, %c0_127] : memref<16x1xf32, #tpu.memory_space<vmem>>, vector<16x1xf32>
    %289 = vector.broadcast %288 : vector<16x1xf32> to vector<16x16xf32>
    %290 = arith.addf %287, %289 : vector<16x16xf32>
    %cst_128 = arith.constant 0.000000e+00 : f32
    %291 = vector.broadcast %cst_128 : f32 to vector<16x16xf32>
    %292 = arith.cmpf oge, %290, %291 : vector<16x16xf32>
    %cst_129 = arith.constant 0.00999999977 : f32
    %293 = vector.broadcast %cst_129 : f32 to vector<16x16xf32>
    %294 = arith.mulf %293, %290 : vector<16x16xf32>
    %295 = arith.select %292, %290, %294 : vector<16x16xi1>, vector<16x16xf32>
    %cst_130 = arith.constant 0.000000e+00 : f32
    %296 = vector.broadcast %cst_130 : f32 to vector<16x5xf32>
    %297 = tpu.concatenate %296, %295, %296 in 1 : vector<16x5xf32>, vector<16x16xf32>, vector<16x5xf32> -> vector<16x26xf32>
    %298 = vector.extract_strided_slice %297 {offsets = [0, 0], sizes = [16, 16], strides = [1, 1]} : vector<16x26xf32> to vector<16x16xf32>
    %c0_131 = arith.constant 0 : index
    %c0_132 = arith.constant 0 : index
    %299 = vector.load %arg16[%c0_131, %c0_132] : memref<9x16xf32, #tpu.memory_space<vmem>>, vector<1x16xf32>
    %300 = vector.broadcast %299 : vector<1x16xf32> to vector<16x16xf32>
    %301 = arith.mulf %298, %300 : vector<16x16xf32>
    %302 = vector.extract_strided_slice %297 {offsets = [0, 1], sizes = [16, 16], strides = [1, 1]} : vector<16x26xf32> to vector<16x16xf32>
    %c1_133 = arith.constant 1 : index
    %c0_134 = arith.constant 0 : index
    %303 = vector.load %arg16[%c1_133, %c0_134] : memref<9x16xf32, #tpu.memory_space<vmem>>, vector<1x16xf32>
    %304 = vector.broadcast %303 : vector<1x16xf32> to vector<16x16xf32>
    %305 = arith.mulf %302, %304 : vector<16x16xf32>
    %306 = vector.extract_strided_slice %297 {offsets = [0, 2], sizes = [16, 16], strides = [1, 1]} : vector<16x26xf32> to vector<16x16xf32>
    %c2_135 = arith.constant 2 : index
    %c0_136 = arith.constant 0 : index
    %307 = vector.load %arg16[%c2_135, %c0_136] : memref<9x16xf32, #tpu.memory_space<vmem>>, vector<1x16xf32>
    %308 = vector.broadcast %307 : vector<1x16xf32> to vector<16x16xf32>
    %309 = arith.mulf %306, %308 : vector<16x16xf32>
    %310 = vector.extract_strided_slice %297 {offsets = [0, 4], sizes = [16, 16], strides = [1, 1]} : vector<16x26xf32> to vector<16x16xf32>
    %c3_137 = arith.constant 3 : index
    %c0_138 = arith.constant 0 : index
    %311 = vector.load %arg16[%c3_137, %c0_138] : memref<9x16xf32, #tpu.memory_space<vmem>>, vector<1x16xf32>
    %312 = vector.broadcast %311 : vector<1x16xf32> to vector<16x16xf32>
    %313 = arith.mulf %310, %312 : vector<16x16xf32>
    %314 = vector.extract_strided_slice %297 {offsets = [0, 5], sizes = [16, 16], strides = [1, 1]} : vector<16x26xf32> to vector<16x16xf32>
    %c4_139 = arith.constant 4 : index
    %c0_140 = arith.constant 0 : index
    %315 = vector.load %arg16[%c4_139, %c0_140] : memref<9x16xf32, #tpu.memory_space<vmem>>, vector<1x16xf32>
    %316 = vector.broadcast %315 : vector<1x16xf32> to vector<16x16xf32>
    %317 = arith.mulf %314, %316 : vector<16x16xf32>
    %318 = vector.extract_strided_slice %297 {offsets = [0, 6], sizes = [16, 16], strides = [1, 1]} : vector<16x26xf32> to vector<16x16xf32>
    %c5_141 = arith.constant 5 : index
    %c0_142 = arith.constant 0 : index
    %319 = vector.load %arg16[%c5_141, %c0_142] : memref<9x16xf32, #tpu.memory_space<vmem>>, vector<1x16xf32>
    %320 = vector.broadcast %319 : vector<1x16xf32> to vector<16x16xf32>
    %321 = arith.mulf %318, %320 : vector<16x16xf32>
    %322 = vector.extract_strided_slice %297 {offsets = [0, 8], sizes = [16, 16], strides = [1, 1]} : vector<16x26xf32> to vector<16x16xf32>
    %c6_143 = arith.constant 6 : index
    %c0_144 = arith.constant 0 : index
    %323 = vector.load %arg16[%c6_143, %c0_144] : memref<9x16xf32, #tpu.memory_space<vmem>>, vector<1x16xf32>
    %324 = vector.broadcast %323 : vector<1x16xf32> to vector<16x16xf32>
    %325 = arith.mulf %322, %324 : vector<16x16xf32>
    %326 = vector.extract_strided_slice %297 {offsets = [0, 9], sizes = [16, 16], strides = [1, 1]} : vector<16x26xf32> to vector<16x16xf32>
    %c7_145 = arith.constant 7 : index
    %c0_146 = arith.constant 0 : index
    %327 = vector.load %arg16[%c7_145, %c0_146] : memref<9x16xf32, #tpu.memory_space<vmem>>, vector<1x16xf32>
    %328 = vector.broadcast %327 : vector<1x16xf32> to vector<16x16xf32>
    %329 = arith.mulf %326, %328 : vector<16x16xf32>
    %330 = vector.extract_strided_slice %297 {offsets = [0, 10], sizes = [16, 16], strides = [1, 1]} : vector<16x26xf32> to vector<16x16xf32>
    %c8_147 = arith.constant 8 : index
    %c0_148 = arith.constant 0 : index
    %331 = vector.load %arg16[%c8_147, %c0_148] : memref<9x16xf32, #tpu.memory_space<vmem>>, vector<1x16xf32>
    %332 = vector.broadcast %331 : vector<1x16xf32> to vector<16x16xf32>
    %333 = arith.mulf %330, %332 : vector<16x16xf32>
    %334 = tpu.concatenate %301, %305, %309, %313, %317, %321, %325, %329, %333 in 0 : vector<16x16xf32>, vector<16x16xf32>, vector<16x16xf32>, vector<16x16xf32>, vector<16x16xf32>, vector<16x16xf32>, vector<16x16xf32>, vector<16x16xf32>, vector<16x16xf32> -> vector<144x16xf32>
    %335 = arith.truncf %334 : vector<144x16xf32> to vector<144x16xbf16>
    %c0_149 = arith.constant 0 : index
    %c0_150 = arith.constant 0 : index
    %336 = vector.load %arg7[%c0_149, %c0_150] : memref<16x144xbf16, #tpu.memory_space<vmem>>, vector<16x144xbf16>
    %cst_151 = arith.constant dense<0.000000e+00> : vector<16x16xf32>
    %337 = tpu.matmul %336, %335, %cst_151 {dimension_numbers = #tpu.dot_dimension_numbers<[1], [0], [0], [1], [0, 0, 1, 1], [], []>} : vector<16x144xbf16>, vector<144x16xbf16>, vector<16x16xf32> -> vector<16x16xf32>
    %c0_152 = arith.constant 0 : index
    %c0_153 = arith.constant 0 : index
    %338 = vector.load %arg13[%c0_152, %c0_153] : memref<16x1xf32, #tpu.memory_space<vmem>>, vector<16x1xf32>
    %339 = vector.broadcast %338 : vector<16x1xf32> to vector<16x16xf32>
    %340 = arith.addf %337, %339 : vector<16x16xf32>
    %cst_154 = arith.constant 0.000000e+00 : f32
    %341 = vector.broadcast %cst_154 : f32 to vector<16x16xf32>
    %342 = arith.maximumf %340, %341 : vector<16x16xf32>
    %cst_155 = arith.constant 0.000000e+00 : f32
    %343 = vector.broadcast %cst_155 : f32 to vector<16x5xf32>
    %344 = tpu.concatenate %342, %343 in 1 : vector<16x16xf32>, vector<16x5xf32> -> vector<16x21xf32>
    %345 = vector.extract_strided_slice %344 {offsets = [0, 1], sizes = [16, 16], strides = [1, 1]} : vector<16x21xf32> to vector<16x16xf32>
    %346 = arith.maximumf %342, %345 : vector<16x16xf32>
    %347 = vector.extract_strided_slice %344 {offsets = [0, 4], sizes = [16, 16], strides = [1, 1]} : vector<16x21xf32> to vector<16x16xf32>
    %348 = arith.maximumf %346, %347 : vector<16x16xf32>
    %349 = vector.extract_strided_slice %344 {offsets = [0, 5], sizes = [16, 16], strides = [1, 1]} : vector<16x21xf32> to vector<16x16xf32>
    %350 = arith.maximumf %348, %349 : vector<16x16xf32>
    %351 = vector.extract_strided_slice %350 {offsets = [0, 0], sizes = [16, 4], strides = [1, 1]} : vector<16x16xf32> to vector<16x4xf32>
    %352 = vector.extract_strided_slice %350 {offsets = [0, 8], sizes = [16, 4], strides = [1, 1]} : vector<16x16xf32> to vector<16x4xf32>
    %353 = tpu.concatenate %351, %352 in 0 : vector<16x4xf32>, vector<16x4xf32> -> vector<32x4xf32>
    %c0_156 = arith.constant 0 : index
    %c0_157 = arith.constant 0 : index
    %354 = vector.load %arg19[%c0_156, %c0_157] : memref<4x2xf32, #tpu.memory_space<vmem>>, vector<4x2xf32>
    %cst_158 = arith.constant dense<0.000000e+00> : vector<32x2xf32>
    %355 = tpu.matmul %353, %354, %cst_158 {dimension_numbers = #tpu.dot_dimension_numbers<[1], [0], [0], [1], [0, 0, 1, 1], [], []>} : vector<32x4xf32>, vector<4x2xf32>, vector<32x2xf32> -> vector<32x2xf32>
    %356 = vector.extract_strided_slice %355 {offsets = [0, 0], sizes = [16, 2], strides = [1, 1]} : vector<32x2xf32> to vector<16x2xf32>
    %357 = vector.extract_strided_slice %355 {offsets = [16, 0], sizes = [16, 2], strides = [1, 1]} : vector<32x2xf32> to vector<16x2xf32>
    %358 = tpu.concatenate %356, %357 in 1 : vector<16x2xf32>, vector<16x2xf32> -> vector<16x4xf32>
    %359 = vector.extract_strided_slice %358 {offsets = [0, 0], sizes = [1, 4], strides = [1, 1]} : vector<16x4xf32> to vector<1x4xf32>
    %360 = vector.extract_strided_slice %358 {offsets = [1, 0], sizes = [1, 4], strides = [1, 1]} : vector<16x4xf32> to vector<1x4xf32>
    %361 = vector.extract_strided_slice %358 {offsets = [2, 0], sizes = [1, 4], strides = [1, 1]} : vector<16x4xf32> to vector<1x4xf32>
    %362 = vector.extract_strided_slice %358 {offsets = [3, 0], sizes = [1, 4], strides = [1, 1]} : vector<16x4xf32> to vector<1x4xf32>
    %363 = vector.extract_strided_slice %358 {offsets = [4, 0], sizes = [1, 4], strides = [1, 1]} : vector<16x4xf32> to vector<1x4xf32>
    %364 = vector.extract_strided_slice %358 {offsets = [5, 0], sizes = [1, 4], strides = [1, 1]} : vector<16x4xf32> to vector<1x4xf32>
    %365 = vector.extract_strided_slice %358 {offsets = [6, 0], sizes = [1, 4], strides = [1, 1]} : vector<16x4xf32> to vector<1x4xf32>
    %366 = vector.extract_strided_slice %358 {offsets = [7, 0], sizes = [1, 4], strides = [1, 1]} : vector<16x4xf32> to vector<1x4xf32>
    %367 = vector.extract_strided_slice %358 {offsets = [8, 0], sizes = [1, 4], strides = [1, 1]} : vector<16x4xf32> to vector<1x4xf32>
    %368 = vector.extract_strided_slice %358 {offsets = [9, 0], sizes = [1, 4], strides = [1, 1]} : vector<16x4xf32> to vector<1x4xf32>
    %369 = vector.extract_strided_slice %358 {offsets = [10, 0], sizes = [1, 4], strides = [1, 1]} : vector<16x4xf32> to vector<1x4xf32>
    %370 = vector.extract_strided_slice %358 {offsets = [11, 0], sizes = [1, 4], strides = [1, 1]} : vector<16x4xf32> to vector<1x4xf32>
    %371 = vector.extract_strided_slice %358 {offsets = [12, 0], sizes = [1, 4], strides = [1, 1]} : vector<16x4xf32> to vector<1x4xf32>
    %372 = vector.extract_strided_slice %358 {offsets = [13, 0], sizes = [1, 4], strides = [1, 1]} : vector<16x4xf32> to vector<1x4xf32>
    %373 = vector.extract_strided_slice %358 {offsets = [14, 0], sizes = [1, 4], strides = [1, 1]} : vector<16x4xf32> to vector<1x4xf32>
    %374 = vector.extract_strided_slice %358 {offsets = [15, 0], sizes = [1, 4], strides = [1, 1]} : vector<16x4xf32> to vector<1x4xf32>
    %375 = tpu.concatenate %359, %360, %361, %362, %363, %364, %365, %366, %367, %368, %369, %370, %371, %372, %373, %374 in 1 : vector<1x4xf32>, vector<1x4xf32>, vector<1x4xf32>, vector<1x4xf32>, vector<1x4xf32>, vector<1x4xf32>, vector<1x4xf32>, vector<1x4xf32>, vector<1x4xf32>, vector<1x4xf32>, vector<1x4xf32>, vector<1x4xf32>, vector<1x4xf32>, vector<1x4xf32>, vector<1x4xf32>, vector<1x4xf32> -> vector<1x64xf32>
    %376 = arith.truncf %375 : vector<1x64xf32> to vector<1x64xbf16>
    %c0_159 = arith.constant 0 : index
    %c0_160 = arith.constant 0 : index
    %377 = vector.load %arg20[%c0_159, %c0_160] : memref<64x2000xbf16, #tpu.memory_space<vmem>>, vector<64x2000xbf16>
    %cst_161 = arith.constant dense<0.000000e+00> : vector<1x2000xf32>
    %378 = tpu.matmul %376, %377, %cst_161 {dimension_numbers = #tpu.dot_dimension_numbers<[1], [0], [0], [1], [0, 0, 1, 1], [], []>} : vector<1x64xbf16>, vector<64x2000xbf16>, vector<1x2000xf32> -> vector<1x2000xf32>
    %c0_162 = arith.constant 0 : index
    %c0_163 = arith.constant 0 : index
    %379 = vector.load %arg21[%c0_162, %c0_163] : memref<1x2000xf32, #tpu.memory_space<vmem>>, vector<1x2000xf32>
    %380 = arith.addf %378, %379 : vector<1x2000xf32>
    %381 = arith.truncf %380 : vector<1x2000xf32> to vector<1x2000xbf16>
    %c0_164 = arith.constant 0 : index
    %c0_165 = arith.constant 0 : index
    %382 = vector.load %arg22[%c0_164, %c0_165] : memref<2000x256xbf16, #tpu.memory_space<vmem>>, vector<2000x256xbf16>
    %cst_166 = arith.constant dense<0.000000e+00> : vector<1x256xf32>
    %383 = tpu.matmul %381, %382, %cst_166 {dimension_numbers = #tpu.dot_dimension_numbers<[1], [0], [0], [1], [0, 0, 1, 1], [], []>} : vector<1x2000xbf16>, vector<2000x256xbf16>, vector<1x256xf32> -> vector<1x256xf32>
    %c0_167 = arith.constant 0 : index
    %c0_168 = arith.constant 0 : index
    %384 = vector.load %arg23[%c0_167, %c0_168] : memref<1x256xf32, #tpu.memory_space<vmem>>, vector<1x256xf32>
    %385 = arith.addf %383, %384 : vector<1x256xf32>
    %c0_169 = arith.constant 0 : index
    %c0_170 = arith.constant 0 : index
    %c0_171 = arith.constant 0 : index
    %386 = vector.load %arg24[%c0_169, %c0_170, %c0_171] : memref<1x1x256xf32, #tpu.memory_space<vmem>>, vector<1x1x256xf32>
    %387 = vector.shape_cast %386 : vector<1x1x256xf32> to vector<1x256xf32>
    %388 = vector.shape_cast %385 : vector<1x256xf32> to vector<1x1x256xf32>
    tpu.vector_store %arg24[%c0_169, %c0_170, %c0_171], %388 {strides = array<i32>} : memref<1x1x256xf32, #tpu.memory_space<vmem>>, vector<1x1x256xf32>,
    return
  }
  func.func @transform_0(%arg0: i32) -> (i32, i32, i32) {
    %c0_i32 = arith.constant 0 : i32
    %c0_i32_0 = arith.constant 0 : i32
    %c0_i32_1 = arith.constant 0 : i32
    return %arg0, %c0_i32, %c0_i32_0 : i32, i32, i32
  }
  func.func @transform_1(%arg0: i32) -> (i32, i32) {
    %c0_i32 = arith.constant 0 : i32
    %c0_i32_0 = arith.constant 0 : i32
    %c0_i32_1 = arith.constant 0 : i32
    return %c0_i32, %c0_i32_0 : i32, i32
  }
  func.func @transform_2(%arg0: i32) -> (i32, i32) {
    %c0_i32 = arith.constant 0 : i32
    %c0_i32_0 = arith.constant 0 : i32
    %c0_i32_1 = arith.constant 0 : i32
    return %c0_i32, %c0_i32_0 : i32, i32
  }
  func.func @transform_3(%arg0: i32) -> (i32, i32) {
    %c0_i32 = arith.constant 0 : i32
    %c0_i32_0 = arith.constant 0 : i32
    %c0_i32_1 = arith.constant 0 : i32
    return %c0_i32, %c0_i32_0 : i32, i32
  }
  func.func @transform_4(%arg0: i32) -> (i32, i32) {
    %c0_i32 = arith.constant 0 : i32
    %c0_i32_0 = arith.constant 0 : i32
    %c0_i32_1 = arith.constant 0 : i32
    return %c0_i32, %c0_i32_0 : i32, i32
  }
  func.func @transform_5(%arg0: i32) -> (i32, i32) {
    %c0_i32 = arith.constant 0 : i32
    %c0_i32_0 = arith.constant 0 : i32
    %c0_i32_1 = arith.constant 0 : i32
    return %c0_i32, %c0_i32_0 : i32, i32
  }
  func.func @transform_6(%arg0: i32) -> (i32, i32) {
    %c0_i32 = arith.constant 0 : i32
    %c0_i32_0 = arith.constant 0 : i32
    %c0_i32_1 = arith.constant 0 : i32
    return %c0_i32, %c0_i32_0 : i32, i32
  }
  func.func @transform_7(%arg0: i32) -> (i32, i32) {
    %c0_i32 = arith.constant 0 : i32
    %c0_i32_0 = arith.constant 0 : i32
    %c0_i32_1 = arith.constant 0 : i32
    return %c0_i32, %c0_i32_0 : i32, i32
  }
  func.func @transform_8(%arg0: i32) -> (i32, i32) {
    %c0_i32 = arith.constant 0 : i32
    %c0_i32_0 = arith.constant 0 : i32
    %c0_i32_1 = arith.constant 0 : i32
    return %c0_i32, %c0_i32_0 : i32, i32
  }
  func.func @transform_9(%arg0: i32) -> (i32, i32) {
    %c0_i32 = arith.constant 0 : i32
    %c0_i32_0 = arith.constant 0 : i32
    %c0_i32_1 = arith.constant 0 : i32
    return %c0_i32, %c0_i32_0 : i32, i32
  }
  func.func @transform_10(%arg0: i32) -> (i32, i32) {
    %c0_i32 = arith.constant 0 : i32
    %c0_i32_0 = arith.constant 0 : i32
    %c0_i32_1 = arith.constant 0 : i32
    return %c0_i32, %c0_i32_0 : i32, i32
  }
  func.func @transform_11(%arg0: i32) -> (i32, i32) {
    %c0_i32 = arith.constant 0 : i32
    %c0_i32_0 = arith.constant 0 : i32
    %c0_i32_1 = arith.constant 0 : i32
    return %c0_i32, %c0_i32_0 : i32, i32
  }
  func.func @transform_12(%arg0: i32) -> (i32, i32) {
    %c0_i32 = arith.constant 0 : i32
    %c0_i32_0 = arith.constant 0 : i32
    %c0_i32_1 = arith.constant 0 : i32
    return %c0_i32, %c0_i32_0 : i32, i32
  }
  func.func @transform_13(%arg0: i32) -> (i32, i32) {
    %c0_i32 = arith.constant 0 : i32
    %c0_i32_0 = arith.constant 0 : i32
    %c0_i32_1 = arith.constant 0 : i32
    return %c0_i32, %c0_i32_0 : i32, i32
  }
  func.func @transform_14(%arg0: i32) -> (i32, i32) {
    %c0_i32 = arith.constant 0 : i32
    %c0_i32_0 = arith.constant 0 : i32
    %c0_i32_1 = arith.constant 0 : i32
    return %c0_i32, %c0_i32_0 : i32, i32
  }
  func.func @transform_15(%arg0: i32) -> (i32, i32) {
    %c0_i32 = arith.constant 0 : i32
    %c0_i32_0 = arith.constant 0 : i32
    %c0_i32_1 = arith.constant 0 : i32
    return %c0_i32, %c0_i32_0 : i32, i32
  }
  func.func @transform_16(%arg0: i32) -> (i32, i32) {
    %c0_i32 = arith.constant 0 : i32
    %c0_i32_0 = arith.constant 0 : i32
    %c0_i32_1 = arith.constant 0 : i32
    return %c0_i32, %c0_i32_0 : i32, i32
  }
  func.func @transform_17(%arg0: i32) -> (i32, i32) {
    %c0_i32 = arith.constant 0 : i32
    %c0_i32_0 = arith.constant 0 : i32
    %c0_i32_1 = arith.constant 0 : i32
    return %c0_i32, %c0_i32_0 : i32, i32
  }
  func.func @transform_18(%arg0: i32) -> (i32, i32) {
    %c0_i32 = arith.constant 0 : i32
    %c0_i32_0 = arith.constant 0 : i32
    %c0_i32_1 = arith.constant 0 : i32
    return %c0_i32, %c0_i32_0 : i32, i32
  }
  func.func @transform_19(%arg0: i32) -> (i32, i32) {
    %c0_i32 = arith.constant 0 : i32
    %c0_i32_0 = arith.constant 0 : i32
    %c0_i32_1 = arith.constant 0 : i32
    return %c0_i32, %c0_i32_0 : i32, i32
  }
  func.func @transform_20(%arg0: i32) -> (i32, i32) {
    %c0_i32 = arith.constant 0 : i32
    %c0_i32_0 = arith.constant 0 : i32
    %c0_i32_1 = arith.constant 0 : i32
    return %c0_i32, %c0_i32_0 : i32, i32
  }
  func.func @transform_21(%arg0: i32) -> (i32, i32) {
    %c0_i32 = arith.constant 0 : i32
    %c0_i32_0 = arith.constant 0 : i32
    %c0_i32_1 = arith.constant 0 : i32
    return %c0_i32, %c0_i32_0 : i32, i32
  }
  func.func @transform_22(%arg0: i32) -> (i32, i32) {
    %c0_i32 = arith.constant 0 : i32
    %c0_i32_0 = arith.constant 0 : i32
    %c0_i32_1 = arith.constant 0 : i32
    return %c0_i32, %c0_i32_0 : i32, i32
  }
  func.func @transform_23(%arg0: i32) -> (i32, i32, i32) {
    %c0_i32 = arith.constant 0 : i32
    %c0_i32_0 = arith.constant 0 : i32
    %c0_i32_1 = arith.constant 0 : i32
    return %arg0, %c0_i32, %c0_i32_0 : i32, i32, i32
  }
}

</mosaic_0001>

<bundles_post_ra>
// kernel: rmm_nn_forward.1
= control target key start
LH: loop header
LB: loop body
LE: loop exit
PB: predicated region body
PF: predicated region fallthrough
CT: control target
= control target key end

     0   :  { %s9410_s0 = inlined_call_operand.vmem [shape: f32[2,8,256], index: 0, kind: input, shape index: {}]   ;;  %s9411_s1 = inlined_call_operand.vmem [shape: bf16[16,72], index: 1, kind: input, shape index: {}]   ;;  %s9412_s2 = inlined_call_operand.vmem [shape: bf16[16,144], index: 2, kind: input, shape index: {}]   ;;  %s9413_s3 = inlined_call_operand.vmem [shape: bf16[16,144], index: 3, kind: input, shape index: {}]   ;;  %s9414_s4 = inlined_call_operand.vmem [shape: bf16[16,144], index: 4, kind: input, shape index: {}]   ;;  %s9415_s5 = inlined_call_operand.vmem [shape: bf16[16,144], index: 5, kind: input, shape index: {}]   ;;  %s9416_s6 = inlined_call_operand.vmem [shape: bf16[16,144], index: 6, kind: input, shape index: {}]   ;;  %s9417_s7 = inlined_call_operand.vmem [shape: f32[16,1], index: 7, kind: input, shape index: {}]   ;;  %s9418_s8 = inlined_call_operand.vmem [shape: f32[16,1], index: 8, kind: input, shape index: {}]   ;;  %s9419_s9 = inlined_call_operand.vmem [shape: f32[16,1], index: 9, kind: input, shape index: {}]   ;;  %s9420_s10 = inlined_call_operand.vmem [shape: f32[16,1], index: 10, kind: input, shape index: {}]   ;;  %s9421_s11 = inlined_call_operand.vmem [shape: f32[16,1], index: 11, kind: input, shape index: {}]   ;;  %s9422_s12 = inlined_call_operand.vmem [shape: f32[16,1], index: 12, kind: input, shape index: {}]   ;;  %s9423_s13 = inlined_call_operand.vmem [shape: f32[9,256], index: 13, kind: input, shape index: {}]   ;;  %s9424_s14 = inlined_call_operand.vmem [shape: f32[9,64], index: 14, kind: input, shape index: {}]   ;;  %s9425_s15 = inlined_call_operand.vmem [shape: f32[9,16], index: 15, kind: input, shape index: {}]   ;;  %s9426_s16 = inlined_call_operand.vmem [shape: f32[16,8], index: 16, kind: input, shape index: {}]   ;;  %s9427_s17 = inlined_call_operand.vmem [shape: f32[8,4], index: 17, kind: input, shape index: {}]   ;;  %s9428_s18 = inlined_call_operand.vmem [shape: f32[4,2], index: 18, kind: input, shape index: {}]   ;;  %s9429_s19 = inlined_call_operand.vmem [shape: bf16[64,2000], index: 19, kind: input, shape index: {}]   ;;  %s9430_s20 = inlined_call_operand.vmem [shape: f32[1,2000], index: 20, kind: input, shape index: {}]   ;;  %s9431_s21 = inlined_call_operand.vmem [shape: bf16[2000,256], index: 21, kind: input, shape index: {}]   ;;  %s9432_s22 = inlined_call_operand.vmem [shape: f32[1,256], index: 22, kind: input, shape index: {}]   ;;  %s9433_s23 = inlined_call_operand.vmem [shape: f32[2,1,256], index: 23, kind: output, shape index: {}]  }
   0x1   :  { %9488 = sst [smem:[#allocation4_spill]] %s9410_s0 }
   0x2   :  { %9489 = sst [smem:[#allocation5_spill]] %s9411_s1 }
   0x3   :  { %9490 = sst [smem:[#allocation6_spill]] %s9412_s2 }
   0x4   :  { %9491 = sst [smem:[#allocation7_spill]] %s9413_s3 }
   0x5   :  { %9492 = sst [smem:[#allocation8_spill]] %s9414_s4  ;;  %s7327_s4 = smov 0  }
   0x6   :  { %9493 = sst [smem:[#allocation9_spill]] %s9415_s5 }
   0x7   :  { %9494 = sst [smem:[#allocation10_spill]] %s9416_s6 }
   0x8   :  { %9495 = sst [smem:[#allocation11_spill]] %s9417_s7 }
   0x9   :  { %9496 = sst [smem:[#allocation12_spill]] %s9418_s8 }
   0xa   :  { %9497 = sst [smem:[#allocation13_spill]] %s9419_s9 }
   0xb   :  { %9498 = sst [smem:[#allocation14_spill]] %s9423_s13 }
   0xc   :  { %9499 = sst [smem:[#allocation15_spill]] %s9424_s14 }
   0xd   :  { %9500 = sst [smem:[#allocation16_spill]] %s9426_s16 }
   0xe   :  { %9501 = sst [smem:[#allocation17_spill]] %s9433_s23 }
   0xf LB: > { %9502 = sst [smem:[#allocation2_spill]] %s7161_s4  ;;  %s5871_s30 = sadd.s32 4294967295, %s7161_s4   ;;  %s7161_s4 = sphi %s7327_s4, %s33_s4  }
  0x10   : > { %p5875_p0 = scmp.ge.s32.totalorder %s7161_s4, 1  ;;  %p637_p1 = scmp.lt.s32.totalorder %s7161_s4, 3 }
  0x12   : > { %p638_p2 = pnand %p5875_p0, %p637_p1 }
  0x14   : > { %641 = sbr.rel (%p638_p2) target bundleno = 5559 (0x15b7), region = 112 }
  0x1b   : > { %p700_p3 = scmp.lt.s32.totalorder %s5871_s30, 1  ;;  %v727_v0 = vlaneseq  ;;  %s9504_s13 = sld [smem:[#allocation14_spill]]  ;;  %vm718_vm0 = vcmask 138240   ;;  %vm754_vm1 = vcmask 7168   ;;  %vm9455_vm2 = vcmask 15360  }
  0x1c   : > { %s9505_s2 = sld [smem:[#allocation4_spill]]  ;;  %s9459_s27 = smov 17   ;;  %vm800_vm3 = vcmask 130048   ;;  %vm845_vm4 = vcmask 146432   ;;  %vm868_vm5 = vcmask 261120   ;;  %vm891_vm6 = vcmask 269312  }
  0x1d   : > { %s9550_s30 = smov (!%p700_p3, %s5871_s30), 1  ;;  %v7338_v1 = vshrl.u32 %v727_v0, 7  ;;  %s9441_s7 = smov 1   ;;  %vm914_vm7 = vcmask 277504   ;;  %vm931_vm8 = vcmask 1039360   ;;  %vm945_vm9 = vcmask 1031168  }
  0x1e   : > { %9503 = sst [smem:[#allocation3_spill]] %s9550_s30  ;;  %s6277_s5 = sshll.u32 %s9550_s30, 4  ;;  %vm959_vm10 = vcmask 916480   ;;  %vm973_vm11 = vcmask 908288   ;;  %vm987_vm12 = vcmask 900096   ;;  %vm1001_vm13 = vcmask 785408  }
  0x1f   : > { %v7345_v3 = vsub.s32 0, %v7338_v1  ;;  %v7348_v4 = vsub.s32 1, %v7338_v1  ;;  %s9440_s0 = smov 18   ;;  %s9447_s1 = smov 32   ;;  %vm1015_vm14 = vcmask 777216   ;;  %vm1029_vm15 = vcmask 769024  }
  0x20   : > { %s7169_s26 = smov 33   ;;  %s9468_s28 = smov 127  }
  0x21   : > { %v5879_v2 = vld [vmem:[%s9504_s13 + $0x1] ss:$8 sm:$0x3]  ;;  %v5880_v9 = vld [vmem:[%s9504_s13 + $0x2] ss:$8 sm:$0x3] }
  0x22   : > { %s704_s6 = scalar_lea.vmem %s9505_s2, %s6277_s5  ;;  %v745_v6 = vrot.slane %v5879_v2, %v7345_v3  ;;  %v749_v7 = vrot.slane %v5879_v2, %v7348_v4  ;;  %v5881_v10 = vld [vmem:[%s9504_s13 + $0x3] ss:$8 sm:$0x3]  ;;  %v768_v11 = vrot.slane %v5880_v9, %v7345_v3  ;;  %v772_v12 = vrot.slane %v5880_v9, %v7348_v4  ;;  %v5882_v13 = vld [vmem:[%s9504_s13 + $0x4] ss:$8 sm:$0x3] }
  0x23   : > { %v710_v5 = vld [vmem:[%s704_s6] sm:$0xff]  ;;  %v711_v8 = vld [vmem:[%s704_s6 + $0x8] sm:$0xff]  ;;  %s9443_s5 = smov 2   ;;  %v791_v14 = vrot.slane %v5881_v10, %v7345_v3  ;;  %v795_v15 = vrot.slane %v5881_v10, %v7348_v4  ;;  %s9445_s2 = smov 16   ;;  %v814_v17 = vrot.slane %v5882_v13, %v7345_v3  ;;  %v818_v18 = vrot.slane %v5882_v13, %v7348_v4 }
  0x24   : > { %714 = vrot.lane.b32.xlu0 %v710_v5, %s9459_s27  ;;  %750 = vrot.lane.b32.xlu1 %v745_v6, %s9441_s7  ;;  %v5883_v16 = vld [vmem:[%s9504_s13 + $0x5] ss:$8 sm:$0x3]  ;;  %v5884_v19 = vld [vmem:[%s9504_s13 + $0x6] ss:$8 sm:$0x3] }
  0x25   : > { %v836_v20 = vrot.slane %v5883_v16, %v7345_v3  ;;  %v840_v21 = vrot.slane %v5883_v16, %v7348_v4  ;;  %v5885_v22 = vld [vmem:[%s9504_s13 + $0x7] ss:$8 sm:$0x3]  ;;  %v859_v23 = vrot.slane %v5884_v19, %v7345_v3  ;;  %v863_v24 = vrot.slane %v5884_v19, %v7348_v4  ;;  %v5886_v25 = vld [vmem:[%s9504_s13 + $0x10] ss:$8 sm:$0x3] }
  0x26   : > { %v882_v26 = vrot.slane %v5885_v22, %v7345_v3  ;;  %v886_v27 = vrot.slane %v5885_v22, %v7348_v4  ;;  %v905_v28 = vrot.slane %v5886_v25, %v7345_v3  ;;  %v909_v29 = vrot.slane %v5886_v25, %v7348_v4  ;;  %s7170_s6 = smov 34   ;;  %s9457_s29 = smov 126  }
  0x27   : > { %s9466_s3 = smov 112   ;;  %s9464_s24 = smov 111  }
  0x28   : > { %716 = vrot.lane.b32.xlu0 %v711_v8, %s9459_s27  ;;  %752 = vrot.lane.b32.xlu1 %v749_v7, %s9441_s7  ;;  %s9453_s25 = smov 110   ;;  %s9512_s8 = sld [smem:[#allocation12_spill]] }
  0x29   : > { %s9513_s16 = sld [smem:[#allocation16_spill]]  ;;  %s9460_s7 = smov 24  }
  0x2a   : > { %s9516_s14 = sld [smem:[#allocation15_spill]]  ;;  %s9520_s4 = smov 18  }
  0x2b   : > { %s9526_s9 = sld [smem:[#allocation13_spill]]  ;;  %s9527_s23 = sld [smem:[#allocation7_spill]] }
  0x2c   : > { %773 = vrot.lane.b32.xlu0 %v768_v11, %s9443_s5  ;;  %775 = vrot.lane.b32.xlu1 %v772_v12, %s9443_s5  ;;  %s9463_s5 = smov 40   ;;  %s9531_s30 = sld [smem:[#allocation8_spill]] }
  0x30   : > { %796 = vrot.lane.b32.xlu0 %v791_v14, %s9445_s2  ;;  %798 = vrot.lane.b32.xlu1 %v795_v15, %s9445_s2  ;;  %s9506_s2 = sld [smem:[#allocation11_spill]] }
  0x34   : > { %819 = vrot.lane.b32.xlu0 %v814_v17, %s9459_s27  ;;  %821 = vrot.lane.b32.xlu1 %v818_v18, %s9459_s27 }
  0x38   : > { %841 = vrot.lane.b32.xlu0 %v836_v20, %s9440_s0  ;;  %843 = vrot.lane.b32.xlu1 %v840_v21, %s9440_s0  ;;  %s7179_s0 = smov 94  }
  0x3c   : > { %864 = vrot.lane.b32.xlu0 %v859_v23, %s9447_s1  ;;  %866 = vrot.lane.b32.xlu1 %v863_v24, %s9447_s1  ;;  %s9507_s1 = sld [smem:[#allocation5_spill]] }
  0x40   : > { %887 = vrot.lane.b32.xlu0 %v882_v26, %s7169_s26  ;;  %889 = vrot.lane.b32.xlu1 %v886_v27, %s7169_s26  ;;  %s9449_s26 = smov 96  }
  0x44   : > { %910 = vrot.lane.b32.xlu0 %v905_v28, %s7170_s6  ;;  %912 = vrot.lane.b32.xlu1 %v909_v29, %s7170_s6  ;;  %s9451_s6 = smov 95   ;;  %v7178_v28 = vmov 0  }
  0x45   : > { %1106 = vmatprep.mubr.bf16.mxu0 %v7178_v28  ;;  %6482 = vset.pattern.permute.xlu0 %v7178_v28 }
  0x46   : > { %6483 = vset.pattern.permute.xlu1 %v7178_v28 }
  0x96   : > { %v715_v30 = vpop.permute.xlu0 %714  ;;  %v7407_v32 = vpop.permute.xlu1 %750 }
  0x97   : > { %v7405_v31 = vsel %vm718_vm0, 0.0, %v715_v30 }
  0x98   : > { %v759_v33 = vmul.f32 %v7407_v32, %v7405_v31 }
  0x9a   : > { %925 = vrot.lane.b32.xlu1 %v759_v33, %s9468_s28  ;;  %v717_v34 = vpop.permute.xlu0 %716  ;;  %v7412_v35 = vpop.permute.xlu1 %752 }
  0x9b   : > { %v7438_v46 = vsel %vm718_vm0, %v715_v30, %v717_v34  ;;  %v7441_v47 = vsel %vm718_vm0, %v717_v34, 0.0  ;;  %v7449_v50 = vsel %vm754_vm1, %v7407_v32, %v7412_v35  ;;  %v1046_v34 = vld [vmem:[%s9506_s2] sm:$0xff]  ;;  %vm9456_vm1 = vcmask 1043456  }
  0x9c   : > { %v760_v52 = vmul.f32 %v7449_v50, %v7438_v46  ;;  %v761_v53 = vmul.f32 %v7412_v35, %v7441_v47 }
  0x9e   : > { %v7414_v36 = vpop.permute.xlu0 %773  ;;  %v7416_v37 = vpop.permute.xlu1 %775  ;;  %v6442_v59 = vpack.i.bf16 %v761_v53, %v760_v52  ;;  %v725_v52 = vld [vmem:[%s9504_s13] ss:$8 sm:$0x3]  ;;  %s9482_s13 = smov 118  }
  0x9f   : > { %v782_v38 = vmul.f32 %v7414_v36, %v7405_v31  ;;  %v7465_v56 = vsel %vm9455_vm2, %v7414_v36, %v7416_v37  ;;  %v784_v61 = vmul.f32 %v7416_v37, %v7441_v47 }
  0xa0   : > { %v783_v60 = vmul.f32 %v7465_v56, %v7438_v46 }
  0xa1   : > { %939 = vrot.lane.b32.xlu0 %v782_v38, %s9457_s29  ;;  %v1047_v38 = vld [vmem:[%s9506_s2 + $0x8] sm:$0xff]  ;;  %s9477_s2 = smov 10  }
  0xa2   : > { %v7421_v39 = vpop.permute.xlu0 %796  ;;  %v7423_v40 = vpop.permute.xlu1 %798  ;;  %v6447_v12 = vpack.i.bf16 %v784_v61, %v783_v60  ;;  %v7561_v60 = vrot.slane %v725_v52, %v7345_v3 }
  0xa3   : > { %v805_v41 = vmul.f32 %v7421_v39, %v7405_v31  ;;  %v7470_v57 = vsel %vm800_vm3, %v7421_v39, %v7423_v40  ;;  %v807_v62 = vmul.f32 %v7423_v40, %v7441_v47 }
  0xa4   : > { %v806_v5 = vmul.f32 %v7470_v57, %v7438_v46 }
  0xa5   : > { %953 = vrot.lane.b32.xlu1 %v805_v41, %s9466_s3 }
  0xa6   : > { %v7428_v42 = vpop.permute.xlu0 %819  ;;  %v7430_v43 = vpop.permute.xlu1 %821  ;;  %v6452_v13 = vpack.i.bf16 %v807_v62, %v806_v5 }
  0xa7   : > { %v827_v44 = vmul.f32 %v7428_v42, %v7405_v31  ;;  %v7490_v6 = vsel %vm718_vm0, %v7428_v42, %v7430_v43  ;;  %v829_v9 = vmul.f32 %v7430_v43, %v7441_v47 }
  0xa8   : > { %v828_v8 = vmul.f32 %v7490_v6, %v7438_v46 }
  0xa9   : > { %967 = vrot.lane.b32.xlu0 %v827_v44, %s9464_s24 }
  0xaa   : > { %v7435_v45 = vpop.permute.xlu0 %841  ;;  %v7443_v48 = vpop.permute.xlu1 %843  ;;  %v6457_v18 = vpack.i.bf16 %v829_v9, %v828_v8  ;;  %v737_v9 = vmul.f32 %v7561_v60, %v7405_v31 }
  0xab   : > { %v850_v49 = vmul.f32 %v7435_v45, %v7405_v31  ;;  %v7494_v7 = vsel %vm845_vm4, %v7435_v45, %v7443_v48  ;;  %v852_v11 = vmul.f32 %v7443_v48, %v7441_v47  ;;  %vm1063_vm4 = vcmask 588800  }
  0xac   : > { %v851_v10 = vmul.f32 %v7494_v7, %v7438_v46 }
  0xad   : > { %981 = vrot.lane.b32.xlu1 %v850_v49, %s9453_s25 }
  0xae   : > { %v7452_v51 = vpop.permute.xlu0 %864  ;;  %v7458_v54 = vpop.permute.xlu1 %866  ;;  %v6462_v19 = vpack.i.bf16 %v852_v11, %v851_v10 }
  0xaf   : > { %v873_v55 = vmul.f32 %v7452_v51, %v7405_v31  ;;  %v7509_v14 = vsel %vm868_vm5, %v7452_v51, %v7458_v54  ;;  %v875_v21 = vmul.f32 %v7458_v54, %v7441_v47 }
  0xb0   : > { %v874_v20 = vmul.f32 %v7509_v14, %v7438_v46 }
  0xb1   : > { %995 = vrot.lane.b32.xlu0 %v873_v55, %s9449_s26 }
  0xb2   : > { %v7473_v58 = vpop.permute.xlu0 %887  ;;  %v7481_v63 = vpop.permute.xlu1 %889  ;;  %v6467_v25 = vpack.i.bf16 %v875_v21, %v874_v20 }
  0xb3   : > { %v896_v2 = vmul.f32 %v7473_v58, %v7405_v31  ;;  %v7513_v15 = vsel %vm891_vm6, %v7473_v58, %v7481_v63  ;;  %v898_v23 = vmul.f32 %v7481_v63, %v7441_v47 }
  0xb4   : > { %v897_v22 = vmul.f32 %v7513_v15, %v7438_v46 }
  0xb5   : > { %6443 = vrot.lane.b32.xlu0 %v6442_v59, %s9468_s28  ;;  %1009 = vrot.lane.b32.xlu1 %v896_v2, %s9451_s6  ;;  %v7558_v59 = vrot.slane %v725_v52, %v7348_v4 }
  0xb6   : > { %v7515_v16 = vpop.permute.xlu0 %910  ;;  %v7517_v17 = vpop.permute.xlu1 %912  ;;  %v6472_v26 = vpack.i.bf16 %v898_v23, %v897_v22 }
  0xb7   : > { %v7531_v24 = vsel %vm914_vm7, %v7515_v16, %v7517_v17  ;;  %v919_v29 = vmul.f32 %v7515_v16, %v7405_v31  ;;  %v921_v30 = vmul.f32 %v7517_v17, %v7441_v47  ;;  %v738_v8 = vmul.f32 %v7558_v59, %v7438_v46 }
  0xb8   : > { %v920_v27 = vmul.f32 %v7531_v24, %v7438_v46 }
  0xb9   : > { %6448 = vrot.lane.b32.xlu0 %v6447_v12, %s9457_s29  ;;  %6453 = vrot.lane.b32.xlu1 %v6452_v13, %s9466_s3 }
  0xba   : > { %v6477_v33 = vpack.i.bf16 %v920_v27, %v919_v29 }
  0xbd   : > { %6458 = vrot.lane.b32.xlu0 %v6457_v18, %s9464_s24  ;;  %6463 = vrot.lane.b32.xlu1 %v6462_v19, %s9453_s25  ;;  %s9508_s25 = smov 110  }
  0xc1   : > { %6468 = vrot.lane.b32.xlu0 %v6467_v25, %s9449_s26  ;;  %6473 = vrot.lane.b32.xlu1 %v6472_v26, %s9451_s6  ;;  %s9509_s26 = smov 96   ;;  %s9510_s6 = smov 95  }
  0xc5   : > { %1027 = vrot.lane.b32.xlu1 %v921_v30, %s7179_s0  ;;  %6478 = vrot.lane.b32.xlu0 %v6477_v33, %s7179_s0 }
  0xc9   : > { %1050 = vperm.xlu0 %6482, %v1046_v34   ;;  %1055 = vperm.xlu1 %6483, %v1047_v38  }
 0x10c   : > { %v926_v41 = vpop.permute.xlu1 %925 }
 0x113   : > { %v940_v44 = vpop.permute.xlu0 %939 }
 0x117   : > { %v954_v49 = vpop.permute.xlu1 %953 }
 0x11b   : > { %v968_v47 = vpop.permute.xlu0 %967 }
 0x11f   : > { %v982_v53 = vpop.permute.xlu1 %981 }
 0x123   : > { %v996_v55 = vpop.permute.xlu0 %995 }
 0x127   : > { %v1010_v61 = vpop.permute.xlu1 %1009  ;;  %v6444_v62 = vpop.permute.xlu0 %6443 }
 0x128   : > { %v6446_v2 = vunpack.i.h.bf16 %v6444_v62  ;;  %v6445_v5 = vunpack.i.l.bf16 %v6444_v62 }
 0x12a   : > { %v933_v10 = vsel %vm931_vm8, %v6445_v5, %v6446_v2  ;;  %v932_v11 = vsel %vm931_vm8, %v926_v41, %v6445_v5 }
 0x12b   : > { %v6454_v12 = vpop.permute.xlu1 %6453  ;;  %v6449_v13 = vpop.permute.xlu0 %6448  ;;  %v1035_v18 = vpack.c.bf16 %v933_v10, %v738_v8  ;;  %v1034_v19 = vpack.c.bf16 %v932_v11, %v737_v9 }
 0x12c   : > { %v6456_v20 = vunpack.i.h.bf16 %v6454_v12  ;;  %v6455_v21 = vunpack.i.l.bf16 %v6454_v12  ;;  %v6451_v22 = vunpack.i.h.bf16 %v6449_v13  ;;  %v6450_v23 = vunpack.i.l.bf16 %v6449_v13 }
 0x12d   : > { %1074 = vmatprep.subr.bf16.mxu0 %v1035_v18 }
 0x12e   : > { %1075 = vmatpush1.bf16.msra.mxu0 %v1034_v19  ;;  %v947_v46 = vsel %vm945_vm9, %v6450_v23, %v6451_v22  ;;  %v961_v31 = vsel %vm959_vm10, %v6455_v21, %v6456_v20  ;;  %v946_v25 = vsel %vm945_vm9, %v940_v44, %v6450_v23  ;;  %v960_v26 = vsel %vm959_vm10, %v954_v49, %v6455_v21 }
 0x12f   : > { %v6464_v27 = vpop.permute.xlu1 %6463  ;;  %v6459_v29 = vpop.permute.xlu0 %6458  ;;  %v1037_v30 = vpack.c.bf16 %v961_v31, %v947_v46  ;;  %v1036_v33 = vpack.c.bf16 %v960_v26, %v946_v25 }
 0x130   : > { %v6466_v34 = vunpack.i.h.bf16 %v6464_v27  ;;  %v6465_v38 = vunpack.i.l.bf16 %v6464_v27  ;;  %v6461_v41 = vunpack.i.h.bf16 %v6459_v29  ;;  %v6460_v52 = vunpack.i.l.bf16 %v6459_v29 }
 0x131   : > { %1076 = vmatprep.subr.bf16.mxu0 %v1037_v30 }
 0x132   : > { %1077 = vmatpush1.bf16.msra.mxu0 %v1036_v33  ;;  %v975_v62 = vsel %vm973_vm11, %v6460_v52, %v6461_v41  ;;  %v989_v2 = vsel %vm987_vm12, %v6465_v38, %v6466_v34  ;;  %v974_v44 = vsel %vm973_vm11, %v968_v47, %v6460_v52  ;;  %v988_v49 = vsel %vm987_vm12, %v982_v53, %v6465_v38 }
 0x133   : > { %v6474_v5 = vpop.permute.xlu1 %6473  ;;  %v6469_v8 = vpop.permute.xlu0 %6468  ;;  %v1039_v9 = vpack.c.bf16 %v989_v2, %v975_v62  ;;  %v1038_v10 = vpack.c.bf16 %v988_v49, %v974_v44 }
 0x134   : > { %v6476_v11 = vunpack.i.h.bf16 %v6474_v5  ;;  %v6475_v12 = vunpack.i.l.bf16 %v6474_v5  ;;  %v6471_v13 = vunpack.i.h.bf16 %v6469_v8  ;;  %v6470_v18 = vunpack.i.l.bf16 %v6469_v8 }
 0x135   : > { %1078 = vmatprep.subr.bf16.mxu0 %v1039_v9 }
 0x136   : > { %1079 = vmatpush1.bf16.msra.mxu0 %v1038_v10  ;;  %v1003_v19 = vsel %vm1001_vm13, %v6470_v18, %v6471_v13  ;;  %v1017_v20 = vsel %vm1015_vm14, %v6475_v12, %v6476_v11  ;;  %v1002_v47 = vsel %vm1001_vm13, %v996_v55, %v6470_v18  ;;  %v1016_v53 = vsel %vm1015_vm14, %v1010_v61, %v6475_v12  ;;  %v6764_v61 = vld [vmem:[%s9507_s1] sm:$0xff]   ;;  %s9511_s1 = sld [smem:[#allocation6_spill]] }
 0x137   : > { %v6479_v21 = vpop.permute.xlu0 %6478  ;;  %v1041_v22 = vpack.c.bf16 %v1017_v20, %v1003_v19  ;;  %v1040_v23 = vpack.c.bf16 %v1016_v53, %v1002_v47  ;;  %v1028_v25 = vpop.permute.xlu1 %1027 }
 0x138   : > { %v6481_v46 = vunpack.i.h.bf16 %v6479_v21  ;;  %v6480_v31 = vunpack.i.l.bf16 %v6479_v21 }
 0x139   : > { %1080 = vmatprep.subr.bf16.mxu0 %v1041_v22 }
 0x13a   : > { %1081 = vmatpush1.bf16.msra.mxu0 %v1040_v23  ;;  %v1031_v26 = vsel %vm1029_vm15, %v6481_v46, %v1028_v25  ;;  %v1030_v27 = vsel %vm1029_vm15, %v6480_v31, %v6481_v46 }
 0x13b   : > { %v1043_v29 = vpack.c.bf16 %v1031_v26, %v1031_v26  ;;  %v1042_v30 = vpack.c.bf16 %v1030_v27, %v1030_v27 }
 0x13d   : > { %5888 = vmatprep.subr.msk.bf16.mxu0 %vm9456_vm1, %v1043_v29  ;;  %v1069_v55 = vsel %vm9456_vm1, %v1042_v30, 0 }
 0x13e   : > { %1083 = vmatpush1.bf16.msra.mxu0 %v1069_v55 }
 0x141   : > { %5889 = vmatmul.mubr.msk.bf16.vlgmr.msra.gmra.mrb[0].mxu0 %vm1063_vm4, %v6764_v61  ;;  %vm2482_vm4 = vcmask 97280  }
 0x148   : > { %v1051_v33 = vpop.permute.xlu0 %1050  ;;  %v1056_v38 = vpop.permute.xlu1 %1055 }
 0x214   : > { %v1108_v34 = vpop.f32.mrb[0].mxu0 }
 0x215   : > { %v1109_v41 = vadd.f32 %v1108_v34, %v1051_v33  ;;  %v1110_v52 = vpop.f32.mrb[1].mxu0 }
 0x216   : > { %v1111_v62 = vadd.f32 %v1110_v52, %v1051_v33  ;;  %v1112_v2 = vpop.f32.mrb[2].mxu0 }
 0x217   : > { %vm1117_vm6 = vcmp.ge.f32.partialorder %v1109_v41, 0.0  ;;  %v1121_v44 = vmul.f32 0.01, %v1109_v41  ;;  %v1113_v49 = vadd.f32 %v1112_v2, %v1056_v38  ;;  %v1114_v5 = vpop.f32.mrb[3].mxu0 }
 0x218   : > { %vm1118_vm7 = vcmp.ge.f32.partialorder %v1111_v62, 0.0  ;;  %v1122_v8 = vmul.f32 0.01, %v1111_v62  ;;  %v1115_v9 = vadd.f32 %v1114_v5, %v1056_v38 }
 0x219   : > { %vm1119_vm2 = vcmp.ge.f32.partialorder %v1113_v49, 0.0  ;;  %v1123_v10 = vmul.f32 0.01, %v1113_v49  ;;  %v1125_v11 = vsel %vm1117_vm6, %v1109_v41, %v1121_v44  ;;  %vm2493_vm6 = vcmask 39936  }
 0x21a   : > { %vm1120_vm1 = vcmp.ge.f32.partialorder %v1115_v9, 0.0  ;;  %v1124_v12 = vmul.f32 0.01, %v1115_v9  ;;  %v1129_v13 = vmax.f32 %v1125_v11, 0.0  ;;  %v1126_v18 = vsel %vm1118_vm7, %v1111_v62, %v1122_v8 }
 0x21b   : > { %v1130_v19 = vmax.f32 %v1126_v18, 0.0  ;;  %v1127_v20 = vsel %vm1119_vm2, %v1113_v49, %v1123_v10  ;;  %vm1847_vm2 = vcmask 195584   ;;  %vm2496_vm7 = vcmask 171008  }
 0x21c   : > { %1137 = vrot.lane.b32.xlu1 %v1129_v13, %s9459_s27  ;;  %v1128_v47 = vsel %vm1120_vm1, %v1115_v9, %v1124_v12  ;;  %v1131_v53 = vmax.f32 %v1127_v20, 0.0  ;;  %vm2477_vm1 = vcmask 31744  }
 0x21d   : > { %1139 = vrot.lane.b32.xlu0 %v1130_v19, %s9459_s27  ;;  %v1132_v21 = vmax.f32 %v1128_v47, 0.0 }
 0x220   : > { %1141 = vrot.lane.b32.xlu1 %v1131_v53, %s9459_s27 }
 0x221   : > { %1143 = vrot.lane.b32.xlu0 %v1132_v21, %s9459_s27  ;;  %s7181_s27 = smov 64  }
 0x28e   : > { %v1138_v22 = vpop.permute.xlu1 %1137 }
 0x28f   : > { %v1140_v23 = vpop.permute.xlu0 %1139  ;;  %v7607_v30 = vsel %vm718_vm0, 0.0, %v1138_v22 }
 0x290   : > { %v7593_v46 = vsel %vm718_vm0, %v1138_v22, %v1140_v23  ;;  %v7596_v31 = vsel %vm718_vm0, %v1140_v23, 0.0  ;;  %v1157_v10 = vmul.f32 %v7607_v30, %v7561_v60  ;;  %v1167_v20 = vmul.f32 %v7607_v30, %v7414_v36 }
 0x291   : > { %v1168_v25 = vmul.f32 %v7593_v46, %v7465_v56  ;;  %v1169_v26 = vmul.f32 %v7596_v31, %v7416_v37  ;;  %v1162_v27 = vmul.f32 %v7593_v46, %v7449_v50  ;;  %v1163_v29 = vmul.f32 %v7596_v31, %v7412_v35 }
 0x292   : > { %v1142_v55 = vpop.permute.xlu1 %1141  ;;  %v1180_v61 = vmul.f32 %v7593_v46, %v7490_v6  ;;  %v1181_v33 = vmul.f32 %v7596_v31, %v7430_v43  ;;  %v1174_v34 = vmul.f32 %v7593_v46, %v7470_v57  ;;  %v1175_v2 = vmul.f32 %v7596_v31, %v7423_v40 }
 0x293   : > { %v7616_v38 = vsel %vm718_vm0, 0.0, %v1142_v55  ;;  %v1144_v41 = vpop.permute.xlu0 %1143  ;;  %v6489_v52 = vpack.i.bf16 %v1169_v26, %v1168_v25  ;;  %v6484_v62 = vpack.i.bf16 %v1163_v29, %v1162_v27  ;;  %v1158_v49 = vmul.f32 %v7593_v46, %v7558_v59 }
 0x294   : > { %v7621_v44 = vsel %vm718_vm0, %v1142_v55, %v1144_v41  ;;  %v1159_v8 = vmul.f32 %v7616_v38, %v7561_v60  ;;  %v6499_v9 = vpack.i.bf16 %v1181_v33, %v1180_v61  ;;  %v6494_v11 = vpack.i.bf16 %v1175_v2, %v1174_v34 }
 0x295   : > { %6490 = vrot.lane.b32.xlu0 %v6489_v52, %s9457_s29  ;;  %6485 = vrot.lane.b32.xlu1 %v6484_v62, %s9468_s28  ;;  %v1160_v5 = vmul.f32 %v7621_v44, %v7558_v59  ;;  %v1170_v13 = vmul.f32 %v7616_v38, %v7414_v36  ;;  %v1164_v18 = vmul.f32 %v7616_v38, %v7407_v32  ;;  %v7638_v19 = vsel %vm718_vm0, %v1144_v41, 0.0 }
 0x296   : > { %v1417_v59 = vpack.c.bf16 %v1159_v8, %v1157_v10  ;;  %v1161_v60 = vmul.f32 %v7607_v30, %v7407_v32  ;;  %v1176_v47 = vmul.f32 %v7616_v38, %v7421_v39  ;;  %v1165_v22 = vmul.f32 %v7621_v44, %v7449_v50 }
 0x297   : > { %v1418_v12 = vpack.c.bf16 %v1160_v5, %v1158_v49  ;;  %v6509_v53 = vpack.i.bf16 %v1170_v13, %v1167_v20  ;;  %v1166_v23 = vmul.f32 %v7638_v19, %v7412_v35  ;;  %v1173_v25 = vmul.f32 %v7607_v30, %v7421_v39 }
 0x298   : > { %v6504_v21 = vpack.i.bf16 %v1164_v18, %v1161_v60  ;;  %v1186_v26 = vmul.f32 %v7593_v46, %v7494_v7  ;;  %v1187_v27 = vmul.f32 %v7596_v31, %v7443_v48  ;;  %v1182_v50 = vmul.f32 %v7616_v38, %v7428_v42 }
 0x299   : > { %6500 = vrot.lane.b32.xlu0 %v6499_v9, %s9464_s24  ;;  %6495 = vrot.lane.b32.xlu1 %v6494_v11, %s9466_s3  ;;  %v6514_v32 = vpack.i.bf16 %v1176_v47, %v1173_v25  ;;  %v6519_v36 = vpack.i.bf16 %v1166_v23, %v1165_v22  ;;  %v1179_v35 = vmul.f32 %v7607_v30, %v7428_v42  ;;  %v6767_v47 = vld [vmem:[%s9511_s1 + $0x4] ss:$8 sps:$4 sm:$0xff]   ;;  %vm1842_vm0 = vcmask 64512  }
 0x29a   : > { %1461 = vmatprep.subr.bf16.mxu1 %v1418_v12  ;;  %v1171_v39 = vmul.f32 %v7621_v44, %v7465_v56  ;;  %v1172_v29 = vmul.f32 %v7638_v19, %v7416_v37  ;;  %v6529_v55 = vpack.i.bf16 %v1187_v27, %v1186_v26  ;;  %v1177_v33 = vmul.f32 %v7621_v44, %v7470_v57 }
 0x29b   : > { %1462 = vmatpush1.bf16.msra.mxu1 %v1417_v59  ;;  %v6524_v61 = vpack.i.bf16 %v1182_v50, %v1179_v35  ;;  %v1178_v34 = vmul.f32 %v7638_v19, %v7423_v40  ;;  %v1188_v56 = vmul.f32 %v7616_v38, %v7435_v45  ;;  %v1192_v37 = vmul.f32 %v7593_v46, %v7509_v14 }
 0x29c   : > { %v6534_v41 = vpack.i.bf16 %v1172_v29, %v1171_v39  ;;  %v1193_v52 = vmul.f32 %v7596_v31, %v7458_v54  ;;  %v1185_v40 = vmul.f32 %v7607_v30, %v7435_v45  ;;  %v1183_v57 = vmul.f32 %v7621_v44, %v7490_v6  ;;  %5892 = vmatprep.mubr.msk.bf16.mxu1 %vm800_vm3, %v6767_v47 }
 0x29d   : > { %6510 = vrot.lane.b32.xlu0 %v6509_v53, %s9457_s29  ;;  %6505 = vrot.lane.b32.xlu1 %v6504_v21, %s9468_s28  ;;  %v6544_v42 = vpack.i.bf16 %v1178_v34, %v1177_v33  ;;  %v1184_v62 = vmul.f32 %v7638_v19, %v7430_v43  ;;  %v1189_v5 = vmul.f32 %v7621_v44, %v7494_v7 }
 0x29e   : > { %v6539_v2 = vpack.i.bf16 %v1188_v56, %v1185_v40  ;;  %v6549_v49 = vpack.i.bf16 %v1193_v52, %v1192_v37  ;;  %v1190_v8 = vmul.f32 %v7638_v19, %v7443_v48  ;;  %v1198_v6 = vmul.f32 %v7593_v46, %v7513_v15 }
 0x29f   : > { %v6554_v9 = vpack.i.bf16 %v1184_v62, %v1183_v57  ;;  %v1199_v43 = vmul.f32 %v7596_v31, %v7481_v63  ;;  %v1194_v10 = vmul.f32 %v7616_v38, %v7452_v51  ;;  %v1191_v48 = vmul.f32 %v7607_v30, %v7452_v51 }
 0x2a0   : > { %v6559_v45 = vpack.i.bf16 %v1190_v8, %v1189_v5  ;;  %v1195_v7 = vmul.f32 %v7621_v44, %v7509_v14  ;;  %v1196_v11 = vmul.f32 %v7638_v19, %v7458_v54  ;;  %v1201_v18 = vmul.f32 %v7621_v44, %v7513_v15 }
 0x2a1   : > { %6515 = vrot.lane.b32.xlu1 %v6514_v32, %s9466_s3  ;;  %6520 = vrot.lane.b32.xlu0 %v6519_v36, %s9468_s28  ;;  %v6569_v12 = vpack.i.bf16 %v1199_v43, %v1198_v6  ;;  %v6564_v13 = vpack.i.bf16 %v1194_v10, %v1191_v48  ;;  %v1202_v59 = vmul.f32 %v7638_v19, %v7481_v63 }
 0x2a2   : > { %v6574_v20 = vpack.i.bf16 %v1196_v11, %v1195_v7  ;;  %v1200_v14 = vmul.f32 %v7616_v38, %v7473_v58  ;;  %v1204_v54 = vmul.f32 %v7593_v46, %v7531_v24  ;;  %v1205_v60 = vmul.f32 %v7596_v31, %v7517_v17 }
 0x2a3   : > { %v6584_v51 = vpack.i.bf16 %v1202_v59, %v1201_v18  ;;  %v1197_v63 = vmul.f32 %v7607_v30, %v7473_v58  ;;  %v1207_v15 = vmul.f32 %v7621_v44, %v7531_v24  ;;  %v1208_v46 = vmul.f32 %v7638_v19, %v7517_v17  ;;  %v1437_v17 = vld [vmem:[%s9512_s8] sm:$0xff] }
 0x2a4   : > { %v6589_v21 = vpack.i.bf16 %v1205_v60, %v1204_v54  ;;  %v1206_v31 = vmul.f32 %v7616_v38, %v7515_v16  ;;  %v1203_v58 = vmul.f32 %v7607_v30, %v7515_v16  ;;  %v1438_v38 = vld [vmem:[%s9512_s8 + $0x8] sm:$0xff]  ;;  %s9524_s8 = smov 112  }
 0x2a5   : > { %6530 = vrot.lane.b32.xlu1 %v6529_v55, %s9508_s25  ;;  %6525 = vrot.lane.b32.xlu0 %v6524_v61, %s9464_s24  ;;  %v6579_v53 = vpack.i.bf16 %v1200_v14, %v1197_v63  ;;  %v6594_v24 = vpack.i.bf16 %v1208_v46, %v1207_v15 }
 0x2a6   : > { %v6599_v44 = vpack.i.bf16 %v1206_v31, %v1203_v58 }
 0x2a9   : > { %6535 = vrot.lane.b32.xlu1 %v6534_v41, %s9457_s29  ;;  %6545 = vrot.lane.b32.xlu0 %v6544_v42, %s9466_s3  ;;  %s9470_s29 = smov 8  }
 0x2ad   : > { %6540 = vrot.lane.b32.xlu1 %v6539_v2, %s9508_s25  ;;  %6550 = vrot.lane.b32.xlu0 %v6549_v49, %s9509_s26 }
 0x2b1   : > { %6555 = vrot.lane.b32.xlu1 %v6554_v9, %s9464_s24  ;;  %6560 = vrot.lane.b32.xlu0 %v6559_v45, %s9508_s25 }
 0x2b5   : > { %6570 = vrot.lane.b32.xlu1 %v6569_v12, %s9510_s6  ;;  %6565 = vrot.lane.b32.xlu0 %v6564_v13, %s9509_s26 }
 0x2b9   : > { %6575 = vrot.lane.b32.xlu1 %v6574_v20, %s9509_s26  ;;  %6585 = vrot.lane.b32.xlu0 %v6584_v51, %s9510_s6 }
 0x2bd   : > { %6580 = vrot.lane.b32.xlu1 %v6579_v53, %s9510_s6  ;;  %6590 = vrot.lane.b32.xlu0 %v6589_v21, %s7179_s0  ;;  %s9515_s6 = smov 16  }
 0x2c1   : > { %6595 = vrot.lane.b32.xlu1 %v6594_v24, %s7179_s0  ;;  %6600 = vrot.lane.b32.xlu0 %v6599_v44, %s7179_s0  ;;  %s9514_s0 = smov 32  }
 0x2c5   : > { %1441 = vperm.xlu1 %6483, %v1437_v17   ;;  %1446 = vperm.xlu0 %6482, %v1438_v38  }
 0x307   : > { %v6491_v19 = vpop.permute.xlu0 %6490  ;;  %v6486_v22 = vpop.permute.xlu1 %6485 }
 0x308   : > { %v6488_v32 = vunpack.i.h.bf16 %v6486_v22  ;;  %v6487_v36 = vunpack.i.l.bf16 %v6486_v22  ;;  %v6493_v52 = vunpack.i.h.bf16 %v6491_v19  ;;  %v6492_v40 = vunpack.i.l.bf16 %v6491_v19 }
 0x30a   : > { %v1228_v55 = vsel %vm931_vm8, %v6487_v36, %v6488_v32  ;;  %v1254_v48 = vsel %vm945_vm9, %v6492_v40, %v6493_v52 }
 0x30b   : > { %v7748_v23 = vpop.permute.xlu0 %6500  ;;  %v6496_v16 = vpop.permute.xlu1 %6495 }
 0x30c   : > { %v6498_v62 = vunpack.i.h.bf16 %v6496_v16  ;;  %v6497_v2 = vunpack.i.l.bf16 %v6496_v16  ;;  %v6503_v63 = vunpack.i.h.bf16 %v7748_v23  ;;  %v6502_v15 = vunpack.i.l.bf16 %v7748_v23 }
 0x30e   : > { %v1280_v54 = vsel %vm959_vm10, %v6497_v2, %v6498_v62 }
 0x30f   : > { %v6511_v30 = vpop.permute.xlu0 %6510  ;;  %v6506_v25 = vpop.permute.xlu1 %6505 }
 0x310   : > { %v6507_v26 = vunpack.i.l.bf16 %v6506_v25  ;;  %v6508_v35 = vunpack.i.h.bf16 %v6506_v25  ;;  %v6512_v57 = vunpack.i.l.bf16 %v6511_v30  ;;  %v6513_v49 = vunpack.i.h.bf16 %v6511_v30 }
 0x311   : > { %v1306_v30 = vsel %vm973_vm11, %v6502_v15, %v6503_v63 }
 0x312   : > { %v1227_v33 = vsel %vm931_vm8, %v6507_v26, %v6487_v36  ;;  %v1253_v7 = vsel %vm945_vm9, %v6512_v57, %v6492_v40 }
 0x313   : > { %v6521_v27 = vpop.permute.xlu0 %6520  ;;  %v6516_v50 = vpop.permute.xlu1 %6515 }
 0x314   : > { %v6523_v39 = vunpack.i.h.bf16 %v6521_v27  ;;  %v6522_v29 = vunpack.i.l.bf16 %v6521_v27  ;;  %v6518_v10 = vunpack.i.h.bf16 %v6516_v50  ;;  %v6517_v11 = vunpack.i.l.bf16 %v6516_v50 }
 0x316   : > { %v1230_v61 = vsel %vm931_vm8, %v6522_v29, %v6523_v39  ;;  %v1229_v34 = vsel %vm931_vm8, %v6508_v35, %v6522_v29  ;;  %v1279_v21 = vsel %vm959_vm10, %v6517_v11, %v6497_v2 }
 0x317   : > { %v6526_v41 = vpop.permute.xlu0 %6525  ;;  %v7754_v42 = vpop.permute.xlu1 %6530  ;;  %v1420_v56 = vpack.c.bf16 %v1230_v61, %v1228_v55  ;;  %v1419_v37 = vpack.c.bf16 %v1229_v34, %v1227_v33 }
 0x318   : > { %v6527_v47 = vunpack.i.l.bf16 %v6526_v41  ;;  %v6528_v46 = vunpack.i.h.bf16 %v6526_v41  ;;  %v6533_v31 = vunpack.i.h.bf16 %v7754_v42  ;;  %v6532_v58 = vunpack.i.l.bf16 %v7754_v42 }
 0x319   : > { %1463 = vmatprep.subr.bf16.mxu1 %v1420_v56 }
 0x31a   : > { %1464 = vmatpush1.bf16.msra.mxu1 %v1419_v37  ;;  %v1305_v25 = vsel %vm973_vm11, %v6527_v47, %v6502_v15  ;;  %v1332_v55 = vsel %vm987_vm12, %v6532_v58, %v6533_v31 }
 0x31b   : > { %v6546_v5 = vpop.permute.xlu0 %6545  ;;  %v6536_v8 = vpop.permute.xlu1 %6535 }
 0x31c   : > { %v6548_v9 = vunpack.i.h.bf16 %v6546_v5  ;;  %v6547_v45 = vunpack.i.l.bf16 %v6546_v5  ;;  %v6538_v6 = vunpack.i.h.bf16 %v6536_v8  ;;  %v6537_v43 = vunpack.i.l.bf16 %v6536_v8 }
 0x31e   : > { %v1256_v12 = vsel %vm945_vm9, %v6537_v43, %v6538_v6  ;;  %v1255_v13 = vsel %vm945_vm9, %v6513_v49, %v6537_v43  ;;  %v1282_v18 = vsel %vm959_vm10, %v6547_v45, %v6548_v9  ;;  %v1281_v60 = vsel %vm959_vm10, %v6518_v10, %v6547_v45 }
 0x31f   : > { %v6551_v59 = vpop.permute.xlu0 %6550  ;;  %v6541_v20 = vpop.permute.xlu1 %6540  ;;  %v1422_v51 = vpack.c.bf16 %v1256_v12, %v1254_v48  ;;  %v1421_v14 = vpack.c.bf16 %v1255_v13, %v1253_v7  ;;  %v1424_v53 = vpack.c.bf16 %v1282_v18, %v1280_v54  ;;  %v1423_v17 = vpack.c.bf16 %v1281_v60, %v1279_v21 }
 0x320   : > { %v6543_v23 = vunpack.i.h.bf16 %v6541_v20  ;;  %v6542_v32 = vunpack.i.l.bf16 %v6541_v20  ;;  %v6553_v33 = vunpack.i.h.bf16 %v6551_v59  ;;  %v6552_v34 = vunpack.i.l.bf16 %v6551_v59 }
 0x321   : > { %1465 = vmatprep.subr.bf16.mxu1 %v1422_v51  ;;  %vm1855_vm9 = vcmask 392192  }
 0x322   : > { %1466 = vmatpush1.bf16.msra.mxu1 %v1421_v14  ;;  %v1331_v56 = vsel %vm987_vm12, %v6542_v32, %v6532_v58  ;;  %v1358_v45 = vsel %vm1001_vm13, %v6552_v34, %v6553_v33 }
 0x323   : > { %v6561_v24 = vpop.permute.xlu0 %6560  ;;  %v6556_v44 = vpop.permute.xlu1 %6555  ;;  %1467 = vmatprep.subr.bf16.mxu1 %v1424_v53 }
 0x324   : > { %v6563_v38 = vunpack.i.h.bf16 %v6561_v24  ;;  %v6562_v19 = vunpack.i.l.bf16 %v6561_v24  ;;  %v6558_v22 = vunpack.i.h.bf16 %v6556_v44  ;;  %v6557_v16 = vunpack.i.l.bf16 %v6556_v44 }
 0x326   : > { %1468 = vmatpush1.bf16.msra.mxu1 %v1423_v17  ;;  %v1308_v36 = vsel %vm973_vm11, %v6557_v16, %v6558_v22  ;;  %v1307_v26 = vsel %vm973_vm11, %v6528_v46, %v6557_v16  ;;  %v1334_v27 = vsel %vm987_vm12, %v6562_v19, %v6563_v38  ;;  %v1333_v61 = vsel %vm987_vm12, %v6543_v23, %v6562_v19  ;;  %v6765_v16 = vld [vmem:[%s9511_s1] ss:$8 sps:$4 sm:$0xff]   ;;  %s9478_s1 = smov 120  }
 0x327   : > { %v6566_v50 = vpop.permute.xlu0 %6565  ;;  %v6571_v35 = vpop.permute.xlu1 %6570  ;;  %v1426_v39 = vpack.c.bf16 %v1308_v36, %v1306_v30  ;;  %v1425_v29 = vpack.c.bf16 %v1307_v26, %v1305_v25  ;;  %v1428_v41 = vpack.c.bf16 %v1334_v27, %v1332_v55  ;;  %v1427_v2 = vpack.c.bf16 %v1333_v61, %v1331_v56  ;;  %v1607_v55 = vld [vmem:[%s9513_s16] sm:$0xff]  ;;  %v1608_v61 = vld [vmem:[%s9513_s16 + $0x8] sm:$0xff]  ;;  %s9521_s16 = smov 17  }
 0x328   : > { %v6567_v42 = vunpack.i.l.bf16 %v6566_v50  ;;  %v6568_v37 = vunpack.i.h.bf16 %v6566_v50  ;;  %v6573_v52 = vunpack.i.h.bf16 %v6571_v35  ;;  %v6572_v40 = vunpack.i.l.bf16 %v6571_v35 }
 0x329   : > { %1469 = vmatprep.subr.bf16.mxu1 %v1426_v39  ;;  %v7180_v56 = vmov 0.0   ;;  %vm1872_vm12 = vcmask 596992  }
 0x32a   : > { %1470 = vmatpush1.bf16.msra.mxu1 %v1425_v29  ;;  %v1357_v43 = vsel %vm1001_vm13, %v6567_v42, %v6552_v34  ;;  %v1384_v20 = vsel %vm1015_vm14, %v6572_v40, %v6573_v52  ;;  %v6360_v34 = vpack.c.bf16 %v1608_v61, %v1607_v55 }
 0x32b   : > { %v6586_v57 = vpop.permute.xlu0 %6585  ;;  %v6576_v62 = vpop.permute.xlu1 %6575  ;;  %1471 = vmatprep.subr.bf16.mxu1 %v1428_v41 }
 0x32c   : > { %v6588_v49 = vunpack.i.h.bf16 %v6586_v57  ;;  %v6587_v5 = vunpack.i.l.bf16 %v6586_v57  ;;  %v6578_v8 = vunpack.i.h.bf16 %v6576_v62  ;;  %v6577_v9 = vunpack.i.l.bf16 %v6576_v62  ;;  %6361 = vmatprep.subr.bf16.mxu0 %v6360_v34 }
 0x32d   : > { %6363 = vmatpush3.bf16.msra.mxu0 %v6360_v34 }
 0x32e   : > { %1472 = vmatpush1.bf16.msra.mxu1 %v1427_v2  ;;  %v1360_v6 = vsel %vm1001_vm13, %v6577_v9, %v6578_v8  ;;  %v1359_v10 = vsel %vm1001_vm13, %v6568_v37, %v6577_v9  ;;  %v1386_v48 = vsel %vm1015_vm14, %v6587_v5, %v6588_v49  ;;  %2069 = vmatprep.subr.bf16.mxu0 %v7178_v28 }
 0x32f   : > { %v6591_v7 = vpop.permute.xlu0 %6590  ;;  %v6581_v11 = vpop.permute.xlu1 %6580  ;;  %v1430_v12 = vpack.c.bf16 %v1360_v6, %v1358_v45  ;;  %v1429_v13 = vpack.c.bf16 %v1359_v10, %v1357_v43  ;;  %v1432_v51 = vpack.c.bf16 %v1386_v48, %v1384_v20 }
 0x330   : > { %v6583_v18 = vunpack.i.h.bf16 %v6581_v11  ;;  %v6582_v59 = vunpack.i.l.bf16 %v6581_v11  ;;  %v6593_v14 = vunpack.i.h.bf16 %v6591_v7  ;;  %v6592_v54 = vunpack.i.l.bf16 %v6591_v7 }
 0x331   : > { %1473 = vmatprep.subr.bf16.mxu1 %v1430_v12 }
 0x332   : > { %1474 = vmatpush1.bf16.msra.mxu1 %v1429_v13  ;;  %v1383_v60 = vsel %vm1015_vm14, %v6582_v59, %v6572_v40  ;;  %v1385_v63 = vsel %vm1015_vm14, %v6583_v18, %v6587_v5  ;;  %v1410_v24 = vsel %vm1029_vm15, %v6592_v54, %v6593_v14 }
 0x333   : > { %v6601_v15 = vpop.permute.xlu0 %6600  ;;  %v6596_v47 = vpop.permute.xlu1 %6595  ;;  %1475 = vmatprep.subr.bf16.mxu1 %v1432_v51  ;;  %v1431_v53 = vpack.c.bf16 %v1385_v63, %v1383_v60 }
 0x334   : > { %v6603_v21 = vunpack.i.h.bf16 %v6601_v15  ;;  %v6602_v46 = vunpack.i.l.bf16 %v6601_v15  ;;  %v6598_v31 = vunpack.i.h.bf16 %v6596_v47  ;;  %v6597_v58 = vunpack.i.l.bf16 %v6596_v47 }
 0x336   : > { %1476 = vmatpush1.bf16.msra.mxu1 %v1431_v53  ;;  %v1412_v44 = vsel %vm1029_vm15, %v6597_v58, %v6598_v31  ;;  %v1409_v17 = vsel %vm1029_vm15, %v6602_v46, %v6592_v54  ;;  %v1411_v38 = vsel %vm1029_vm15, %v6603_v21, %v6597_v58  ;;  %vm2288_vm15 = vcmask 523264  }
 0x337   : > { %v1434_v19 = vpack.c.bf16 %v1412_v44, %v1410_v24  ;;  %v1433_v22 = vpack.c.bf16 %v1411_v38, %v1409_v17 }
 0x339   : > { %1477 = vmatprep.subr.bf16.mxu1 %v1434_v19 }
 0x33a   : > { %1478 = vmatpush1.bf16.msra.mxu1 %v1433_v22 }
 0x33b   : > { %2245 = vmatprep.subr.bf16.mxu1 %v7178_v28 }
 0x33d   : > { %1494 = vmatmul.mubr.bf16.vlgmr.msra.gmra.mrb[0].mxu1 %v6765_v16 }
 0x344   : > { %v1442_v23 = vpop.permute.xlu1 %1441  ;;  %v1447_v39 = vpop.permute.xlu0 %1446 }
 0x410   : > { %v1495_v30 = vpop.f32.mrb[0].mxu1 }
 0x411   : > { %v1496_v25 = vadd.f32 %v1495_v30, %v1442_v23  ;;  %v1497_v32 = vpop.f32.mrb[1].mxu1 }
 0x412   : > { %v1498_v36 = vadd.f32 %v1497_v32, %v1442_v23  ;;  %v1499_v26 = vpop.f32.mrb[2].mxu1 }
 0x413   : > { %v1504_v27 = vmax.f32 %v1496_v25, 0.0  ;;  %v1501_v50 = vpop.f32.mrb[3].mxu1  ;;  %v1500_v29 = vadd.f32 %v1499_v26, %v1447_v39 }
 0x414   : > { %v7792_v35 = vmax.f32 %v1498_v36, 0.0  ;;  %v1502_v33 = vadd.f32 %v1501_v50, %v1447_v39 }
 0x415   : > { %1513 = vrot.lane.b32.xlu1 %v1504_v27, %s9468_s28  ;;  %v1506_v41 = vmax.f32 %v1500_v29, 0.0 }
 0x416   : > { %1515 = vrot.lane.b32.xlu0 %v7792_v35, %s9468_s28  ;;  %v1507_v42 = vmax.f32 %v1502_v33, 0.0 }
 0x419   : > { %1535 = vrot.lane.b32.xlu1 %v1504_v27, %s9466_s3 }
 0x41a   : > { %1537 = vrot.lane.b32.xlu0 %v7792_v35, %s9466_s3 }
 0x41d   : > { %1557 = vrot.lane.b32.xlu1 %v1504_v27, %s9464_s24 }
 0x41e   : > { %1559 = vrot.lane.b32.xlu0 %v7792_v35, %s9464_s24 }
 0x421   : > { %1519 = vrot.lane.b32.xlu1 %v1506_v41, %s9468_s28 }
 0x422   : > { %1521 = vrot.lane.b32.xlu0 %v1507_v42, %s9468_s28 }
 0x425   : > { %1541 = vrot.lane.b32.xlu1 %v1506_v41, %s9466_s3 }
 0x426   : > { %1543 = vrot.lane.b32.xlu0 %v1507_v42, %s9466_s3 }
 0x429   : > { %1563 = vrot.lane.b32.xlu1 %v1506_v41, %s9464_s24 }
 0x42a   : > { %1565 = vrot.lane.b32.xlu0 %v1507_v42, %s9464_s24 }
 0x42d   : > { %1517 = vrot.lane.b32.xlu1 %v7180_v56, %s9468_s28  ;;  %s9517_s28 = smov 2  }
 0x42e   : > { %1539 = vrot.lane.b32.xlu0 %v7180_v56, %s9466_s3  ;;  %s7195_s3 = smov 5  }
 0x431   : > { %1561 = vrot.lane.b32.xlu1 %v7180_v56, %s9464_s24  ;;  %s9480_s24 = smov 119  }
 0x487   : > { %v1514_v37 = vpop.permute.xlu1 %1513 }
 0x488   : > { %v1516_v52 = vpop.permute.xlu0 %1515 }
 0x489   : > { %v1523_v40 = vsel %vm931_vm8, %v1514_v37, %v1516_v52 }
 0x48a   : > { %v1531_v49 = vmax.f32 %v1504_v27, %v1523_v40 }
 0x48b   : > { %v1536_v57 = vpop.permute.xlu1 %1535 }
 0x48c   : > { %v1538_v62 = vpop.permute.xlu0 %1537 }
 0x48d   : > { %v1545_v2 = vsel %vm959_vm10, %v1536_v57, %v1538_v62 }
 0x48e   : > { %v1553_v8 = vmax.f32 %v1531_v49, %v1545_v2 }
 0x48f   : > { %v1558_v5 = vpop.permute.xlu1 %1557 }
 0x490   : > { %v1560_v9 = vpop.permute.xlu0 %1559 }
 0x491   : > { %v1567_v45 = vsel %vm973_vm11, %v1558_v5, %v1560_v9 }
 0x492   : > { %v1575_v6 = vmax.f32 %v1553_v8, %v1567_v45 }
 0x493   : > { %v1520_v43 = vpop.permute.xlu1 %1519 }
 0x494   : > { %v1522_v10 = vpop.permute.xlu0 %1521  ;;  %1581 = vrot.lane.b32.xlu0 %v1575_v6, %s9509_s26  ;;  %6314 = vmatprep.mubr.msk.f32.mxu0 %vm800_vm3, %v1575_v6 }
 0x495   : > { %v1525_v48 = vsel %vm931_vm8, %v1520_v43, %v1522_v10 }
 0x496   : > { %v1533_v13 = vmax.f32 %v1506_v41, %v1525_v48 }
 0x497   : > { %v1542_v7 = vpop.permute.xlu1 %1541 }
 0x498   : > { %v1544_v11 = vpop.permute.xlu0 %1543  ;;  %1585 = vrot.lane.b32.xlu0 %v1575_v6, %s7181_s27 }
 0x499   : > { %v1547_v12 = vsel %vm959_vm10, %v1542_v7, %v1544_v11 }
 0x49a   : > { %v1555_v59 = vmax.f32 %v1533_v13, %v1547_v12 }
 0x49b   : > { %v1564_v18 = vpop.permute.xlu1 %1563 }
 0x49c   : > { %v1566_v20 = vpop.permute.xlu0 %1565  ;;  %1589 = vrot.lane.b32.xlu0 %v1575_v6, %s9514_s0 }
 0x49d   : > { %v1569_v51 = vsel %vm973_vm11, %v1564_v18, %v1566_v20 }
 0x49e   : > { %v1577_v14 = vmax.f32 %v1555_v59, %v1569_v51 }
 0x49f   : > { %v1518_v54 = vpop.permute.xlu1 %1517 }
 0x4a0   : > { %v1524_v60 = vsel %vm931_vm8, %v1516_v52, %v1518_v54  ;;  %v1526_v63 = vsel %vm931_vm8, %v1522_v10, %v1518_v54  ;;  %v1540_v15 = vpop.permute.xlu0 %1539  ;;  %1583 = vrot.lane.b32.xlu1 %v1577_v14, %s9509_s26  ;;  %6315 = vmatmul.mubr.msk.f32.vlgmr.msra.gmra.mrb[4].mxu0 %vm800_vm3, %v1577_v14  ;;  %vm1852_vm8 = vcmask 326656  }
 0x4a1   : > { %v1532_v47 = vmax.f32 %v7792_v35, %v1524_v60  ;;  %v1546_v53 = vsel %vm959_vm10, %v1538_v62, %v1540_v15  ;;  %v1534_v21 = vmax.f32 %v1507_v42, %v1526_v63  ;;  %v1548_v46 = vsel %vm959_vm10, %v1544_v11, %v1540_v15 }
 0x4a2   : > { %vm1858_vm10 = vcmask 457728  }
 0x4a3   : > { %v1554_v31 = vmax.f32 %v1532_v47, %v1546_v53  ;;  %v1562_v58 = vpop.permute.xlu1 %1561  ;;  %v1556_v17 = vmax.f32 %v1534_v21, %v1548_v46 }
 0x4a4   : > { %v1568_v24 = vsel %vm973_vm11, %v1560_v9, %v1562_v58  ;;  %1587 = vrot.lane.b32.xlu1 %v1577_v14, %s7181_s27  ;;  %v1570_v38 = vsel %vm973_vm11, %v1566_v20, %v1562_v58  ;;  %vm1869_vm11 = vcmask 72704  }
 0x4a5   : > { %v1576_v44 = vmax.f32 %v1554_v31, %v1568_v24  ;;  %v1578_v19 = vmax.f32 %v1556_v17, %v1570_v38  ;;  %v5911_v17 = vld [vmem:[%s9516_s14 + $0x2] ss:$0 sm:$0xff]  ;;  %v5910_v38 = vld [vmem:[%s9516_s14 + $0x1] ss:$0 sm:$0xff] }
 0x4a7   : > { %1595 = vrot.lane.b32.xlu0 %v1576_v44, %s9509_s26 }
 0x4a8   : > { %1591 = vrot.lane.b32.xlu1 %v1577_v14, %s9514_s0 }
 0x4ab   : > { %1599 = vrot.lane.b32.xlu0 %v1576_v44, %s7181_s27 }
 0x4ac   : > { %1597 = vrot.lane.b32.xlu1 %v1578_v19, %s9509_s26 }
 0x4af   : > { %1603 = vrot.lane.b32.xlu0 %v1576_v44, %s9514_s0 }
 0x4b0   : > { %1601 = vrot.lane.b32.xlu1 %v1578_v19, %s7181_s27  ;;  %s9462_s27 = smov 48  }
 0x4b4   : > { %1605 = vrot.lane.b32.xlu1 %v1578_v19, %s9514_s0 }
 0x506   : > { %v1582_v22 = vpop.permute.xlu0 %1581 }
 0x507   : > { %6317 = vmatprep.mubr.msk.f32.mxu0 %vm800_vm3, %v1582_v22  ;;  %v5912_v22 = vld [vmem:[%s9516_s14 + $0x3] ss:$0 sm:$0xff] }
 0x50a   : > { %v1586_v16 = vpop.permute.xlu0 %1585 }
 0x50e   : > { %v1590_v25 = vpop.permute.xlu0 %1589 }
 0x512   : > { %v1584_v23 = vpop.permute.xlu1 %1583 }
 0x513   : > { %6318 = vmatmul.mubr.msk.f32.gmra.mrb[6].mxu0 %vm800_vm3, %v1584_v23  ;;  %v5914_v23 = vld [vmem:[%s9516_s14 + $0x5] ss:$0 sm:$0xff] }
 0x514   : > { %6320 = vmatprep.mubr.msk.f32.mxu0 %vm800_vm3, %v1586_v16  ;;  %v5915_v16 = vld [vmem:[%s9516_s14 + $0x6] ss:$0 sm:$0xff] }
 0x516   : > { %v1588_v30 = vpop.permute.xlu1 %1587 }
 0x517   : > { %6321 = vmatmul.mubr.msk.f32.gmra.mrb[8].mxu0 %vm800_vm3, %v1588_v30  ;;  %v5917_v30 = vld [vmem:[%s9516_s14 + $0x8] ss:$0 sm:$0xff] }
 0x518   : > { %6323 = vmatprep.mubr.msk.f32.mxu0 %vm800_vm3, %v1590_v25  ;;  %v5916_v25 = vld [vmem:[%s9516_s14 + $0x7] ss:$0 sm:$0xff] }
 0x519   : > { %v1596_v36 = vpop.permute.xlu0 %1595 }
 0x51a   : > { %v1592_v32 = vpop.permute.xlu1 %1591 }
 0x51b   : > { %6324 = vmatmul.mubr.msk.f32.gmra.mrb[10].mxu0 %vm800_vm3, %v1592_v32 }
 0x51c   : > { %6326 = vmatprep.mubr.msk.f32.mxu0 %vm800_vm3, %v1576_v44 }
 0x51d   : > { %v1600_v27 = vpop.permute.xlu0 %1599 }
 0x51e   : > { %v1598_v26 = vpop.permute.xlu1 %1597 }
 0x51f   : > { %6327 = vmatmul.mubr.msk.f32.gmra.mrb[12].mxu0 %vm800_vm3, %v1578_v19  ;;  %v5913_v19 = vld [vmem:[%s9516_s14 + $0x4] ss:$0 sm:$0xff] }
 0x520   : > { %6329 = vmatprep.mubr.msk.f32.mxu0 %vm800_vm3, %v1596_v36  ;;  %v7925_v36 = vld [vmem:[%s9516_s14] ss:$0 sm:$0xff]  ;;  %s9535_s14 = sld [smem:[#allocation10_spill]] }
 0x521   : > { %v1604_v35 = vpop.permute.xlu0 %1603 }
 0x522   : > { %v1602_v50 = vpop.permute.xlu1 %1601 }
 0x523   : > { %6330 = vmatmul.mubr.msk.f32.gmra.mrb[14].mxu0 %vm800_vm3, %v1598_v26 }
 0x524   : > { %6332 = vmatprep.mubr.msk.f32.mxu0 %vm800_vm3, %v1600_v27 }
 0x526   : > { %v1606_v39 = vpop.permute.xlu1 %1605 }
 0x527   : > { %6333 = vmatmul.mubr.msk.f32.gmra.mrb[16].mxu0 %vm800_vm3, %v1602_v50 }
 0x528   : > { %6335 = vmatprep.mubr.msk.f32.mxu0 %vm800_vm3, %v1604_v35 }
 0x52b   : > { %6336 = vmatmul.mubr.msk.f32.gmra.mrb[18].mxu0 %vm800_vm3, %v1606_v39 }
 0x573   : > { %v6316_v29 = vpop.f32.mrb[4].mxu0 }
 0x574   : > { %v1707_v55 = vpop.f32.mrb[5].mxu0 }
 0x5e6   : > { %v6319_v61 = vpop.f32.mrb[6].mxu0 }
 0x5e7   : > { %1790 = vrot.lane.b32.xlu1 %v6319_v61, %s9470_s29  ;;  %v1717_v33 = vpop.f32.mrb[7].mxu0 }
 0x5e8   : > { %1788 = vrot.lane.b32.xlu0 %v1717_v33, %s9470_s29  ;;  %s9518_s29 = smov 1  }
 0x5ea   : > { %v6322_v34 = vpop.f32.mrb[8].mxu0 }
 0x5eb   : > { %1798 = vrot.lane.b32.xlu1 %v6322_v34, %s9515_s6  ;;  %v1727_v41 = vpop.f32.mrb[9].mxu0 }
 0x5ec   : > { %1796 = vrot.lane.b32.xlu0 %v1727_v41, %s9515_s6 }
 0x5ee   : > { %v6325_v42 = vpop.f32.mrb[10].mxu0 }
 0x5ef   : > { %1806 = vrot.lane.b32.xlu1 %v6325_v42, %s9460_s7  ;;  %v1737_v56 = vpop.f32.mrb[11].mxu0 }
 0x5f0   : > { %1804 = vrot.lane.b32.xlu0 %v1737_v56, %s9460_s7  ;;  %s9461_s7 = smov 56  }
 0x5f2   : > { %v6328_v37 = vpop.f32.mrb[12].mxu0 }
 0x5f3   : > { %1814 = vrot.lane.b32.xlu1 %v6328_v37, %s9514_s0  ;;  %v1747_v52 = vpop.f32.mrb[13].mxu0 }
 0x5f4   : > { %1812 = vrot.lane.b32.xlu0 %v1747_v52, %s9514_s0 }
 0x5f6   : > { %v6331_v40 = vpop.f32.mrb[14].mxu0 }
 0x5f7   : > { %1822 = vrot.lane.b32.xlu1 %v6331_v40, %s9463_s5  ;;  %v1757_v57 = vpop.f32.mrb[15].mxu0 }
 0x5f8   : > { %1820 = vrot.lane.b32.xlu0 %v1757_v57, %s9463_s5  ;;  %s9519_s5 = smov 8  }
 0x5fa   : > { %v6334_v62 = vpop.f32.mrb[16].mxu0 }
 0x5fb   : > { %1830 = vrot.lane.b32.xlu1 %v6334_v62, %s9462_s27  ;;  %v1767_v2 = vpop.f32.mrb[17].mxu0 }
 0x5fc   : > { %1828 = vrot.lane.b32.xlu0 %v1767_v2, %s9462_s27  ;;  %s9530_s27 = smov 120  }
 0x5fe   : > { %v6337_v49 = vpop.f32.mrb[18].mxu0 }
 0x5ff   : > { %1838 = vrot.lane.b32.xlu1 %v6337_v49, %s9461_s7  ;;  %v1777_v5 = vpop.f32.mrb[19].mxu0 }
 0x600   : > { %1836 = vrot.lane.b32.xlu0 %v1777_v5, %s9461_s7  ;;  %s9474_s7 = smov 9  }
 0x659   : > { %v1791_v8 = vpop.permute.xlu1 %1790 }
 0x65a   : > { %v1789_v9 = vpop.permute.xlu0 %1788  ;;  %v1844_v13 = vsel %vm1842_vm0, %v6316_v29, %v1791_v8 }
 0x65b   : > { %v1843_v18 = vsel %vm1842_vm0, %v1707_v55, %v1789_v9 }
 0x65d   : > { %v1799_v45 = vpop.permute.xlu1 %1798 }
 0x65e   : > { %v1797_v6 = vpop.permute.xlu0 %1796  ;;  %v1846_v59 = vsel %vm800_vm3, %v1844_v13, %v1799_v45 }
 0x65f   : > { %v1845_v51 = vsel %vm800_vm3, %v1843_v18, %v1797_v6 }
 0x661   : > { %v1807_v43 = vpop.permute.xlu1 %1806 }
 0x662   : > { %v1805_v10 = vpop.permute.xlu0 %1804  ;;  %v1849_v14 = vsel %vm1847_vm2, %v1846_v59, %v1807_v43 }
 0x663   : > { %v1848_v60 = vsel %vm1847_vm2, %v1845_v51, %v1805_v10 }
 0x665   : > { %v1815_v48 = vpop.permute.xlu1 %1814 }
 0x666   : > { %v1813_v7 = vpop.permute.xlu0 %1812  ;;  %v1851_v63 = vsel %vm868_vm5, %v1849_v14, %v1815_v48 }
 0x667   : > { %v1850_v15 = vsel %vm868_vm5, %v1848_v60, %v1813_v7 }
 0x669   : > { %v1823_v11 = vpop.permute.xlu1 %1822 }
 0x66a   : > { %v1821_v12 = vpop.permute.xlu0 %1820  ;;  %v1854_v47 = vsel %vm1852_vm8, %v1851_v63, %v1823_v11 }
 0x66b   : > { %v1853_v53 = vsel %vm1852_vm8, %v1850_v15, %v1821_v12  ;;  %v2046_v15 = vld [vmem:[%s9526_s9 + $0x8] sm:$0xff] }
 0x66d   : > { %v1831_v20 = vpop.permute.xlu1 %1830 }
 0x66e   : > { %v1829_v54 = vpop.permute.xlu0 %1828  ;;  %v1857_v21 = vsel %vm1855_vm9, %v1854_v47, %v1831_v20  ;;  %v2045_v47 = vld [vmem:[%s9526_s9] sm:$0xff]  ;;  %s7199_s9 = smov 122  }
 0x66f   : > { %v1856_v31 = vsel %vm1855_vm9, %v1853_v53, %v1829_v54  ;;  %v6770_v53 = vld [vmem:[%s9527_s23 + $0x4] ss:$8 sps:$4 sm:$0xff]  }
 0x670   : > { %5920 = vmatprep.mubr.msk.bf16.mxu0 %vm800_vm3, %v6770_v53 }
 0x671   : > { %v1839_v46 = vpop.permute.xlu1 %1838 }
 0x672   : > { %v1860_v58 = vsel %vm1858_vm10, %v1857_v21, %v1839_v46  ;;  %v1837_v24 = vpop.permute.xlu0 %1836 }
 0x673   : > { %v1859_v44 = vsel %vm1858_vm10, %v1856_v31, %v1837_v24  ;;  %1865 = vrot.lane.b32.xlu1 %v1860_v58, %s9474_s7 }
 0x674   : > { %1863 = vrot.lane.b32.xlu0 %v1859_v44, %s9474_s7 }
 0x677   : > { %1899 = vrot.lane.b32.xlu1 %v5911_v17, %s9517_s28 }
 0x678   : > { %1888 = vrot.lane.b32.xlu0 %v5910_v38, %s9518_s29 }
 0x67b   : > { %1921 = vrot.lane.b32.xlu1 %v5913_v19, %s9474_s7  ;;  %s9523_s7 = smov 127  }
 0x67c   : > { %1910 = vrot.lane.b32.xlu0 %v5912_v22, %s9519_s5 }
 0x67f   : > { %1943 = vrot.lane.b32.xlu1 %v5915_v16, %s9515_s6 }
 0x680   : > { %1932 = vrot.lane.b32.xlu0 %v5914_v23, %s9477_s2  ;;  %s9534_s2 = sld [smem:[#allocation9_spill]] }
 0x683   : > { %1965 = vrot.lane.b32.xlu1 %v5917_v30, %s9520_s4  ;;  %s9522_s4 = smov 126  }
 0x684   : > { %1954 = vrot.lane.b32.xlu0 %v5916_v25, %s9521_s16  ;;  %s9525_s16 = smov 111  }
 0x6e5   : > { %v1866_v32 = vpop.permute.xlu1 %1865 }
 0x6e6   : > { %v1871_v26 = vsel %vm1869_vm11, 0.0, %v1866_v32  ;;  %v1864_v27 = vpop.permute.xlu0 %1863 }
 0x6e7   : > { %v1874_v50 = vsel %vm1872_vm12, %v1871_v26, 0.0  ;;  %v1870_v35 = vsel %vm1869_vm11, 0.0, %v1864_v27 }
 0x6e8   : > { %v1873_v39 = vsel %vm1872_vm12, %v1870_v35, 0.0  ;;  %v1881_v29 = vmul.f32 %v7925_v36, %v1874_v50 }
 0x6e9   : > { %v7932_v55 = vpop.permute.xlu1 %1899  ;;  %v1880_v61 = vmul.f32 %v7925_v36, %v1873_v39 }
 0x6ea   : > { %v1902_v33 = vmul.f32 %v7932_v55, %v1873_v39  ;;  %v1903_v34 = vmul.f32 %v7932_v55, %v1874_v50  ;;  %v7937_v41 = vpop.permute.xlu0 %1888 }
 0x6eb   : > { %v1891_v42 = vmul.f32 %v7937_v41, %v1873_v39  ;;  %v1892_v56 = vmul.f32 %v7937_v41, %v1874_v50  ;;  %v2034_v37 = vpack.c.bf16 %v1881_v29, %v1880_v61 }
 0x6ec   : > { %v6609_v52 = vpack.i.bf16 %v1903_v34, %v1902_v33 }
 0x6ed   : > { %2070 = vmatpush1.bf16.msra.mxu0 %v2034_v37  ;;  %v7941_v40 = vpop.permute.xlu1 %1921  ;;  %v6604_v57 = vpack.i.bf16 %v1892_v56, %v1891_v42 }
 0x6ee   : > { %v1924_v62 = vmul.f32 %v7941_v40, %v1873_v39  ;;  %v1925_v2 = vmul.f32 %v7941_v40, %v1874_v50  ;;  %v7945_v49 = vpop.permute.xlu0 %1910  ;;  %6610 = vrot.lane.b32.xlu1 %v6609_v52, %s9522_s4  ;;  %2071 = vmatprep.subr.bf16.mxu0 %v7178_v28 }
 0x6ef   : > { %v1913_v5 = vmul.f32 %v7945_v49, %v1873_v39  ;;  %v1914_v8 = vmul.f32 %v7945_v49, %v1874_v50  ;;  %6605 = vrot.lane.b32.xlu0 %v6604_v57, %s9523_s7 }
 0x6f0   : > { %v6619_v9 = vpack.i.bf16 %v1925_v2, %v1924_v62 }
 0x6f1   : > { %v7952_v45 = vpop.permute.xlu1 %1943  ;;  %v6614_v6 = vpack.i.bf16 %v1914_v8, %v1913_v5  ;;  %v6768_v8 = vld [vmem:[%s9527_s23] ss:$8 sps:$4 sm:$0xff]   ;;  %s9533_s23 = smov 118  }
 0x6f2   : > { %v1946_v43 = vmul.f32 %v7952_v45, %v1873_v39  ;;  %v1947_v10 = vmul.f32 %v7952_v45, %v1874_v50  ;;  %v7956_v48 = vpop.permute.xlu0 %1932  ;;  %6620 = vrot.lane.b32.xlu1 %v6619_v9, %s9480_s24  ;;  %s9528_s24 = smov 9  }
 0x6f3   : > { %v1935_v7 = vmul.f32 %v7956_v48, %v1873_v39  ;;  %v1936_v11 = vmul.f32 %v7956_v48, %v1874_v50  ;;  %6615 = vrot.lane.b32.xlu0 %v6614_v6, %s9478_s1  ;;  %s9529_s1 = smov 119  }
 0x6f4   : > { %v6629_v12 = vpack.i.bf16 %v1947_v10, %v1946_v43 }
 0x6f5   : > { %v7962_v13 = vpop.permute.xlu1 %1965  ;;  %v6624_v18 = vpack.i.bf16 %v1936_v11, %v1935_v7 }
 0x6f6   : > { %v1968_v59 = vmul.f32 %v7962_v13, %v1873_v39  ;;  %v1969_v20 = vmul.f32 %v7962_v13, %v1874_v50  ;;  %v7966_v51 = vpop.permute.xlu0 %1954  ;;  %6630 = vrot.lane.b32.xlu1 %v6629_v12, %s9524_s8 }
 0x6f7   : > { %v1957_v14 = vmul.f32 %v7966_v51, %v1873_v39  ;;  %v1958_v54 = vmul.f32 %v7966_v51, %v1874_v50  ;;  %6625 = vrot.lane.b32.xlu0 %v6624_v18, %s9482_s13 }
 0x6f8   : > { %v6639_v60 = vpack.i.bf16 %v1969_v20, %v1968_v59 }
 0x6f9   : > { %v6634_v63 = vpack.i.bf16 %v1958_v54, %v1957_v14 }
 0x6fa   : > { %6640 = vrot.lane.b32.xlu1 %v6639_v60, %s9508_s25 }
 0x6fb   : > { %6635 = vrot.lane.b32.xlu0 %v6634_v63, %s9525_s16 }
 0x6fe   : > { %2054 = vperm.xlu1 %6483, %v2046_v15  }
 0x6ff   : > { %2049 = vperm.xlu0 %6482, %v2045_v47  }
 0x760   : > { %v6611_v21 = vpop.permute.xlu1 %6610 }
 0x761   : > { %v6606_v46 = vpop.permute.xlu0 %6605  ;;  %v6613_v24 = vunpack.i.h.bf16 %v6611_v21  ;;  %v6612_v44 = vunpack.i.l.bf16 %v6611_v21 }
 0x762   : > { %v6608_v31 = vunpack.i.h.bf16 %v6606_v46  ;;  %v6607_v58 = vunpack.i.l.bf16 %v6606_v46 }
 0x763   : > { %v2036_v19 = vpack.c.bf16 %v6613_v24, %v6612_v44 }
 0x764   : > { %v2035_v17 = vpack.c.bf16 %v6608_v31, %v6607_v58  ;;  %v6621_v23 = vpop.permute.xlu1 %6620 }
 0x765   : > { %v6616_v38 = vpop.permute.xlu0 %6615  ;;  %v6623_v30 = vunpack.i.h.bf16 %v6621_v23  ;;  %v6622_v25 = vunpack.i.l.bf16 %v6621_v23 }
 0x766   : > { %2072 = vmatpush1.bf16.msra.mxu0 %v2035_v17  ;;  %v6618_v22 = vunpack.i.h.bf16 %v6616_v38  ;;  %v6617_v16 = vunpack.i.l.bf16 %v6616_v38 }
 0x767   : > { %2073 = vmatprep.subr.bf16.mxu0 %v7178_v28  ;;  %v2038_v27 = vpack.c.bf16 %v6623_v30, %v6622_v25 }
 0x768   : > { %v2037_v32 = vpack.c.bf16 %v6618_v22, %v6617_v16  ;;  %v6631_v39 = vpop.permute.xlu1 %6630 }
 0x769   : > { %v6626_v26 = vpop.permute.xlu0 %6625  ;;  %v6633_v29 = vunpack.i.h.bf16 %v6631_v39  ;;  %v6632_v61 = vunpack.i.l.bf16 %v6631_v39 }
 0x76a   : > { %2074 = vmatpush1.bf16.msra.mxu0 %v2036_v19  ;;  %v6628_v50 = vunpack.i.h.bf16 %v6626_v26  ;;  %v6627_v35 = vunpack.i.l.bf16 %v6626_v26 }
 0x76b   : > { %2075 = vmatprep.subr.bf16.mxu0 %v7178_v28  ;;  %v2040_v42 = vpack.c.bf16 %v6633_v29, %v6632_v61 }
 0x76c   : > { %v2039_v33 = vpack.c.bf16 %v6628_v50, %v6627_v35  ;;  %v6641_v52 = vpop.permute.xlu1 %6640 }
 0x76d   : > { %v6636_v34 = vpop.permute.xlu0 %6635  ;;  %v6643_v57 = vunpack.i.h.bf16 %v6641_v52  ;;  %v6642_v62 = vunpack.i.l.bf16 %v6641_v52 }
 0x76e   : > { %2076 = vmatpush1.bf16.msra.mxu0 %v2037_v32  ;;  %v6638_v56 = vunpack.i.h.bf16 %v6636_v34  ;;  %v6637_v37 = vunpack.i.l.bf16 %v6636_v34 }
 0x76f   : > { %2077 = vmatprep.subr.bf16.mxu0 %v7178_v28  ;;  %v2042_v5 = vpack.c.bf16 %v6643_v57, %v6642_v62 }
 0x770   : > { %v2041_v2 = vpack.c.bf16 %v6638_v56, %v6637_v37 }
 0x772   : > { %2078 = vmatpush1.bf16.msra.mxu0 %v2038_v27 }
 0x773   : > { %2079 = vmatprep.subr.bf16.mxu0 %v7178_v28 }
 0x776   : > { %2080 = vmatpush1.bf16.msra.mxu0 %v2039_v33 }
 0x777   : > { %2081 = vmatprep.subr.bf16.mxu0 %v7178_v28 }
 0x77a   : > { %2082 = vmatpush1.bf16.msra.mxu0 %v2040_v42 }
 0x77b   : > { %2083 = vmatprep.subr.bf16.mxu0 %v7178_v28 }
 0x77d   : > { %v2055_v7 = vpop.permute.xlu1 %2054 }
 0x77e   : > { %2084 = vmatpush1.bf16.msra.mxu0 %v2041_v2  ;;  %v2050_v9 = vpop.permute.xlu0 %2049 }
 0x77f   : > { %2085 = vmatprep.subr.bf16.mxu0 %v7178_v28 }
 0x782   : > { %2086 = vmatpush1.bf16.msra.mxu0 %v2042_v5 }
 0x785   : > { %2102 = vmatmul.mubr.bf16.vlgmr.msra.gmra.mrb[20].mxu0 %v6768_v8 }
 0x858   : > { %v2103_v6 = vpop.f32.mrb[20].mxu0 }
 0x859   : > { %v2104_v43 = vadd.f32 %v2103_v6, %v2050_v9  ;;  %v2105_v10 = vpop.f32.mrb[21].mxu0 }
 0x85a   : > { %v2106_v11 = vpop.f32.mrb[22].mxu0 }
 0x85b   : > { %vm2110_vm13 = vcmp.ge.f32.partialorder %v2104_v43, 0.0  ;;  %v2112_v12 = vmul.f32 0.01, %v2104_v43  ;;  %v2107_v18 = vadd.f32 %v2106_v11, %v2055_v7  ;;  %v2108_v59 = vpop.f32.mrb[23].mxu0 }
 0x85d   : > { %vm2111_vm14 = vcmp.ge.f32.partialorder %v2107_v18, 0.0  ;;  %v2113_v20 = vmul.f32 0.01, %v2107_v18  ;;  %v2114_v14 = vsel %vm2110_vm13, %v2104_v43, %v2112_v12  ;;  %vm9536_vm13 = vcmask 1043456  }
 0x85e   : > { %2118 = vrot.lane.b32.xlu0 %v2114_v14, %s9528_s24 }
 0x85f   : > { %v2115_v54 = vsel %vm2111_vm14, %v2107_v18, %v2113_v20  ;;  %vm9537_vm14 = vmmov %vm9536_vm13 }
 0x860   : > { %2120 = vrot.lane.b32.xlu1 %v2115_v54, %s9528_s24 }
 0x8d0   : > { %v2119_v60 = vpop.permute.xlu0 %2118 }
 0x8d1   : > { %v2124_v63 = vsel %vm1869_vm11, 0.0, %v2119_v60 }
 0x8d2   : > { %v2126_v15 = vsel %vm1872_vm12, %v2124_v63, 0.0  ;;  %v2121_v47 = vpop.permute.xlu1 %2120 }
 0x8d3   : > { %v2125_v53 = vsel %vm1869_vm11, 0.0, %v2121_v47  ;;  %v2132_v46 = vmul.f32 %v2126_v15, %v7932_v55  ;;  %v2130_v31 = vmul.f32 %v2126_v15, %v7937_v41  ;;  %v2128_v44 = vmul.f32 %v7925_v36, %v2126_v15 }
 0x8d4   : > { %v2127_v21 = vsel %vm1872_vm12, %v2125_v53, 0.0  ;;  %v2136_v30 = vmul.f32 %v2126_v15, %v7941_v40  ;;  %v2140_v26 = vmul.f32 %v2126_v15, %v7952_v45  ;;  %v2138_v27 = vmul.f32 %v2126_v15, %v7956_v48 }
 0x8d5   : > { %v2133_v58 = vmul.f32 %v2127_v21, %v7932_v55  ;;  %v2131_v24 = vmul.f32 %v2127_v21, %v7937_v41  ;;  %v2129_v17 = vmul.f32 %v7925_v36, %v2127_v21  ;;  %v2137_v38 = vmul.f32 %v2127_v21, %v7941_v40 }
 0x8d6   : > { %v2135_v23 = vmul.f32 %v2127_v21, %v7945_v49  ;;  %v2134_v55 = vmul.f32 %v2126_v15, %v7945_v49  ;;  %v2141_v36 = vmul.f32 %v2127_v21, %v7952_v45  ;;  %v2139_v32 = vmul.f32 %v2127_v21, %v7956_v48  ;;  %v2222_v45 = vld [vmem:[%s9420_s10 + $0x8] sm:$0xff]  ;;  %v2221_v48 = vld [vmem:[%s9420_s10] sm:$0xff] }
 0x8d7   : > { %v6649_v19 = vpack.i.bf16 %v2133_v58, %v2132_v46  ;;  %v6644_v22 = vpack.i.bf16 %v2131_v24, %v2130_v31  ;;  %v2210_v16 = vpack.c.bf16 %v2129_v17, %v2128_v44  ;;  %v6659_v41 = vpack.i.bf16 %v2137_v38, %v2136_v30  ;;  %v6773_v24 = vld [vmem:[%s9531_s30] ss:$8 sps:$4 sm:$0xff]  }
 0x8d8   : > { %v6654_v25 = vpack.i.bf16 %v2135_v23, %v2134_v55  ;;  %v6669_v40 = vpack.i.bf16 %v2141_v36, %v2140_v26  ;;  %v6664_v50 = vpack.i.bf16 %v2139_v32, %v2138_v27  ;;  %v2145_v49 = vmul.f32 %v2127_v21, %v7962_v13 }
 0x8d9   : > { %6650 = vrot.lane.b32.xlu1 %v6649_v19, %s9522_s4  ;;  %6645 = vrot.lane.b32.xlu0 %v6644_v22, %s9523_s7  ;;  %v2143_v35 = vmul.f32 %v2127_v21, %v7966_v51  ;;  %v2144_v39 = vmul.f32 %v2126_v15, %v7962_v13  ;;  %v2142_v29 = vmul.f32 %v2126_v15, %v7966_v51  ;;  %v6771_v13 = vld [vmem:[%s9531_s30 + $0x4] ss:$8 sps:$4 sm:$0xff]  }
 0x8da   : > { %2246 = vmatpush1.bf16.msra.mxu1 %v2210_v16  ;;  %5923 = vmatprep.mubr.msk.bf16.mxu1 %vm800_vm3, %v6771_v13 }
 0x8db   : > { %2247 = vmatprep.subr.bf16.mxu1 %v7178_v28  ;;  %v6679_v61 = vpack.i.bf16 %v2145_v49, %v2144_v39  ;;  %v6674_v33 = vpack.i.bf16 %v2143_v35, %v2142_v29 }
 0x8dd   : > { %6660 = vrot.lane.b32.xlu1 %v6659_v41, %s9529_s1  ;;  %6655 = vrot.lane.b32.xlu0 %v6654_v25, %s9530_s27  ;;  %v2331_v41 = vld [vmem:[%s9427_s17] sm:$0xff] }
 0x8de   : > { %6338 = vmatprep.subr.mxu0 %v2331_v41 }
 0x8df   : > { %6339 = vmatpush3.msra.mxu0 %v2331_v41 }
 0x8e0   : > { %2693 = vmatprep.subr.bf16.mxu0 %v7178_v28 }
 0x8e1   : > { %6670 = vrot.lane.b32.xlu1 %v6669_v40, %s9524_s8  ;;  %6665 = vrot.lane.b32.xlu0 %v6664_v50, %s9482_s13 }
 0x8e5   : > { %6680 = vrot.lane.b32.xlu1 %v6679_v61, %s9508_s25  ;;  %6675 = vrot.lane.b32.xlu0 %v6674_v33, %s9525_s16  ;;  %s7192_s16 = smov 80   ;;  %s7205_s25 = smov 60  }
 0x8e9   : > { %2230 = vperm.xlu1 %6483, %v2222_v45   ;;  %2225 = vperm.xlu0 %6482, %v2221_v48  }
 0x94b   : > { %v6651_v51 = vpop.permute.xlu1 %6650  ;;  %v6646_v34 = vpop.permute.xlu0 %6645 }
 0x94c   : > { %v6648_v42 = vunpack.i.h.bf16 %v6646_v34  ;;  %v6647_v56 = vunpack.i.l.bf16 %v6646_v34  ;;  %v6653_v37 = vunpack.i.h.bf16 %v6651_v51  ;;  %v6652_v52 = vunpack.i.l.bf16 %v6651_v51 }
 0x94e   : > { %v2211_v57 = vpack.c.bf16 %v6648_v42, %v6647_v56  ;;  %v2212_v2 = vpack.c.bf16 %v6653_v37, %v6652_v52 }
 0x94f   : > { %v6656_v62 = vpop.permute.xlu0 %6655  ;;  %v6661_v9 = vpop.permute.xlu1 %6660 }
 0x950   : > { %2248 = vmatpush1.bf16.msra.mxu1 %v2211_v57  ;;  %v6658_v5 = vunpack.i.h.bf16 %v6656_v62  ;;  %v6657_v8 = vunpack.i.l.bf16 %v6656_v62  ;;  %v6663_v6 = vunpack.i.h.bf16 %v6661_v9  ;;  %v6662_v43 = vunpack.i.l.bf16 %v6661_v9 }
 0x951   : > { %2249 = vmatprep.subr.bf16.mxu1 %v7178_v28 }
 0x952   : > { %v2213_v10 = vpack.c.bf16 %v6658_v5, %v6657_v8  ;;  %v2214_v11 = vpack.c.bf16 %v6663_v6, %v6662_v43 }
 0x953   : > { %v6666_v7 = vpop.permute.xlu0 %6665  ;;  %v6671_v59 = vpop.permute.xlu1 %6670 }
 0x954   : > { %2250 = vmatpush1.bf16.msra.mxu1 %v2212_v2  ;;  %v6668_v12 = vunpack.i.h.bf16 %v6666_v7  ;;  %v6667_v18 = vunpack.i.l.bf16 %v6666_v7  ;;  %v6673_v20 = vunpack.i.h.bf16 %v6671_v59  ;;  %v6672_v14 = vunpack.i.l.bf16 %v6671_v59 }
 0x955   : > { %2251 = vmatprep.subr.bf16.mxu1 %v7178_v28 }
 0x956   : > { %v2215_v54 = vpack.c.bf16 %v6668_v12, %v6667_v18  ;;  %v2216_v63 = vpack.c.bf16 %v6673_v20, %v6672_v14 }
 0x957   : > { %v6676_v60 = vpop.permute.xlu0 %6675  ;;  %v6681_v53 = vpop.permute.xlu1 %6680 }
 0x958   : > { %2252 = vmatpush1.bf16.msra.mxu1 %v2213_v10  ;;  %v6678_v15 = vunpack.i.h.bf16 %v6676_v60  ;;  %v6677_v47 = vunpack.i.l.bf16 %v6676_v60  ;;  %v6683_v21 = vunpack.i.h.bf16 %v6681_v53  ;;  %v6682_v46 = vunpack.i.l.bf16 %v6681_v53  ;;  %v5936_v53 = vld [vmem:[%s9425_s15 + $0x4] ss:$0 sm:$0xff] }
 0x959   : > { %2253 = vmatprep.subr.bf16.mxu1 %v7178_v28 }
 0x95a   : > { %v2217_v31 = vpack.c.bf16 %v6678_v15, %v6677_v47  ;;  %v2218_v58 = vpack.c.bf16 %v6683_v21, %v6682_v46  ;;  %v5934_v15 = vld [vmem:[%s9425_s15 + $0x2] ss:$0 sm:$0xff]  ;;  %v5933_v47 = vld [vmem:[%s9425_s15 + $0x1] ss:$0 sm:$0xff]  ;;  %v5935_v21 = vld [vmem:[%s9425_s15 + $0x3] ss:$0 sm:$0xff] }
 0x95b   : > { %v5938_v46 = vld [vmem:[%s9425_s15 + $0x6] ss:$0 sm:$0xff] }
 0x95c   : > { %2254 = vmatpush1.bf16.msra.mxu1 %v2214_v11 }
 0x95d   : > { %2255 = vmatprep.subr.bf16.mxu1 %v7178_v28 }
 0x960   : > { %2256 = vmatpush1.bf16.msra.mxu1 %v2215_v54 }
 0x961   : > { %2257 = vmatprep.subr.bf16.mxu1 %v7178_v28 }
 0x964   : > { %2258 = vmatpush1.bf16.msra.mxu1 %v2216_v63 }
 0x965   : > { %2259 = vmatprep.subr.bf16.mxu1 %v7178_v28 }
 0x968   : > { %2260 = vmatpush1.bf16.msra.mxu1 %v2217_v31  ;;  %v2226_v44 = vpop.permute.xlu0 %2225  ;;  %v2231_v22 = vpop.permute.xlu1 %2230  ;;  %v5937_v31 = vld [vmem:[%s9425_s15 + $0x5] ss:$0 sm:$0xff] }
 0x969   : > { %2261 = vmatprep.subr.bf16.mxu1 %v7178_v28 }
 0x96c   : > { %2262 = vmatpush1.bf16.msra.mxu1 %v2218_v58  ;;  %v5940_v58 = vld [vmem:[%s9425_s15 + $0x8] ss:$0 sm:$0xff] }
 0x96d   : > { %2869 = vmatprep.subr.bf16.mxu1 %v7178_v28 }
 0x96f   : > { %2278 = vmatmul.mubr.bf16.vlgmr.msra.gmra.mrb[4].mxu1 %v6773_v24  ;;  %v5939_v24 = vld [vmem:[%s9425_s15 + $0x7] ss:$0 sm:$0xff] }
 0xa42   : > { %v2279_v17 = vpop.f32.mrb[4].mxu1 }
 0xa43   : > { %v2280_v38 = vadd.f32 %v2279_v17, %v2226_v44  ;;  %v2281_v19 = vpop.f32.mrb[5].mxu1  ;;  %v8120_v17 = vld [vmem:[%s9425_s15] ss:$0 sm:$0xff] }
 0xa44   : > { %v2282_v16 = vpop.f32.mrb[6].mxu1 }
 0xa45   : > { %v2286_v23 = vmax.f32 %v2280_v38, 0.0  ;;  %v2283_v30 = vadd.f32 %v2282_v16, %v2231_v22  ;;  %v2284_v55 = vpop.f32.mrb[7].mxu1 }
 0xa47   : > { %v2289_v25 = vsel %vm2288_vm15, %v2286_v23, 0.0  ;;  %v2287_v36 = vmax.f32 %v2283_v30, 0.0 }
 0xa48   : > { %2293 = vrot.lane.b32.xlu0 %v2289_v25, %s9523_s7 }
 0xa49   : > { %v2290_v32 = vsel %vm2288_vm15, %v2287_v36, 0.0 }
 0xa4a   : > { %2295 = vrot.lane.b32.xlu1 %v2290_v32, %s9523_s7 }
 0xa4c   : > { %2301 = vrot.lane.b32.xlu0 %v2289_v25, %s9530_s27 }
 0xa4e   : > { %2303 = vrot.lane.b32.xlu1 %v2290_v32, %s9530_s27 }
 0xa50   : > { %2309 = vrot.lane.b32.xlu0 %v2289_v25, %s9529_s1 }
 0xa52   : > { %2311 = vrot.lane.b32.xlu1 %v2290_v32, %s9529_s1 }
 0xaba   : > { %v2294_v26 = vpop.permute.xlu0 %2293 }
 0xabb   : > { %v2299_v50 = vmax.f32 %v2286_v23, %v2294_v26 }
 0xabc   : > { %v2296_v27 = vpop.permute.xlu1 %2295 }
 0xabd   : > { %v2300_v35 = vmax.f32 %v2287_v36, %v2296_v27 }
 0xabe   : > { %v2302_v40 = vpop.permute.xlu0 %2301 }
 0xabf   : > { %v2307_v39 = vmax.f32 %v2299_v50, %v2302_v40 }
 0xac0   : > { %v2304_v49 = vpop.permute.xlu1 %2303 }
 0xac1   : > { %v2308_v61 = vmax.f32 %v2300_v35, %v2304_v49 }
 0xac2   : > { %v2310_v29 = vpop.permute.xlu0 %2309 }
 0xac3   : > { %v2315_v33 = vmax.f32 %v2307_v39, %v2310_v29 }
 0xac4   : > { %v2312_v45 = vpop.permute.xlu1 %2311 }
 0xac5   : > { %v2316_v48 = vmax.f32 %v2308_v61, %v2312_v45  ;;  %2319 = vrot.lane.b32.xlu0 %v2315_v33, %s9524_s8  ;;  %6340 = vmatprep.mubr.msk.f32.mxu0 %vm1842_vm0, %v2315_v33 }
 0xac7   : > { %2321 = vrot.lane.b32.xlu1 %v2316_v48, %s9524_s8  ;;  %6341 = vmatmul.mubr.msk.f32.vlgmr.msra.gmra.mrb[24].mxu0 %vm1842_vm0, %v2316_v48  ;;  %s9486_s8 = smov 12  }
 0xac9   : > { %2323 = vrot.lane.b32.xlu0 %v2315_v33, %s9509_s26 }
 0xacb   : > { %2325 = vrot.lane.b32.xlu1 %v2316_v48, %s9509_s26  ;;  %s9487_s26 = smov 4  }
 0xacd   : > { %2327 = vrot.lane.b32.xlu0 %v2315_v33, %s7192_s16 }
 0xacf   : > { %2329 = vrot.lane.b32.xlu1 %v2316_v48, %s7192_s16  ;;  %s9542_s16 = smov 12  }
 0xb37   : > { %v2320_v13 = vpop.permute.xlu0 %2319 }
 0xb38   : > { %6343 = vmatprep.mubr.msk.f32.mxu0 %vm1842_vm0, %v2320_v13 }
 0xb39   : > { %v2322_v51 = vpop.permute.xlu1 %2321 }
 0xb3a   : > { %6344 = vmatmul.mubr.msk.f32.gmra.mrb[26].mxu0 %vm1842_vm0, %v2322_v51 }
 0xb3b   : > { %v2324_v34 = vpop.permute.xlu0 %2323 }
 0xb3c   : > { %6346 = vmatprep.mubr.msk.f32.mxu0 %vm1842_vm0, %v2324_v34 }
 0xb3d   : > { %v2326_v42 = vpop.permute.xlu1 %2325 }
 0xb3e   : > { %6347 = vmatmul.mubr.msk.f32.gmra.mrb[28].mxu0 %vm1842_vm0, %v2326_v42 }
 0xb3f   : > { %v2328_v56 = vpop.permute.xlu0 %2327 }
 0xb40   : > { %6349 = vmatprep.mubr.msk.f32.mxu0 %vm1842_vm0, %v2328_v56 }
 0xb41   : > { %v2330_v37 = vpop.permute.xlu1 %2329 }
 0xb42   : > { %6350 = vmatmul.mubr.msk.f32.gmra.mrb[30].mxu0 %vm1842_vm0, %v2330_v37 }
 0xb9a   : > { %v6342_v52 = vpop.f32.mrb[24].mxu0 }
 0xb9b   : > { %v2414_v57 = vpop.f32.mrb[25].mxu0 }
 0xc0d   : > { %v6345_v62 = vpop.f32.mrb[26].mxu0 }
 0xc0e   : > { %2457 = vrot.lane.b32.xlu1 %v6345_v62, %s9487_s26  ;;  %v2424_v2 = vpop.f32.mrb[27].mxu0 }
 0xc0f   : > { %2455 = vrot.lane.b32.xlu0 %v2424_v2, %s9487_s26 }
 0xc11   : > { %v6348_v5 = vpop.f32.mrb[28].mxu0 }
 0xc12   : > { %2465 = vrot.lane.b32.xlu1 %v6348_v5, %s9519_s5  ;;  %v2434_v8 = vpop.f32.mrb[29].mxu0 }
 0xc13   : > { %2463 = vrot.lane.b32.xlu0 %v2434_v8, %s9519_s5 }
 0xc15   : > { %v6351_v9 = vpop.f32.mrb[30].mxu0 }
 0xc16   : > { %2473 = vrot.lane.b32.xlu1 %v6351_v9, %s9486_s8  ;;  %v2444_v6 = vpop.f32.mrb[31].mxu0 }
 0xc17   : > { %2471 = vrot.lane.b32.xlu0 %v2444_v6, %s9486_s8  ;;  %s9540_s8 = smov 40  }
 0xc80   : > { %v2458_v43 = vpop.permute.xlu1 %2457 }
 0xc81   : > { %v2456_v10 = vpop.permute.xlu0 %2455  ;;  %v2479_v12 = vsel %vm2477_vm1, %v6342_v52, %v2458_v43 }
 0xc82   : > { %v2478_v18 = vsel %vm2477_vm1, %v2414_v57, %v2456_v10 }
 0xc84   : > { %v2466_v7 = vpop.permute.xlu1 %2465 }
 0xc85   : > { %v2464_v11 = vpop.permute.xlu0 %2463  ;;  %v2481_v59 = vsel %vm1842_vm0, %v2479_v12, %v2466_v7  ;;  %v2669_v12 = vld [vmem:[%s9421_s11] sm:$0xff] }
 0xc86   : > { %v2480_v14 = vsel %vm1842_vm0, %v2478_v18, %v2464_v11  ;;  %v2670_v11 = vld [vmem:[%s9421_s11 + $0x8] sm:$0xff] }
 0xc87   : > { %v6776_v18 = vld [vmem:[%s9534_s2 + $0x4] ss:$8 sps:$4 sm:$0xff]  }
 0xc88   : > { %v2474_v20 = vpop.permute.xlu1 %2473  ;;  %5943 = vmatprep.mubr.msk.bf16.mxu0 %vm800_vm3, %v6776_v18 }
 0xc89   : > { %v2484_v54 = vsel %vm2482_vm4, %v2481_v59, %v2474_v20  ;;  %v2472_v60 = vpop.permute.xlu0 %2471 }
 0xc8a   : > { %v2483_v63 = vsel %vm2482_vm4, %v2480_v14, %v2472_v60  ;;  %2489 = vrot.lane.b32.xlu1 %v2484_v54, %s7195_s3 }
 0xc8b   : > { %2487 = vrot.lane.b32.xlu0 %v2483_v63, %s7195_s3 }
 0xc8e   : > { %2523 = vrot.lane.b32.xlu1 %v5934_v15, %s9517_s28 }
 0xc8f   : > { %2512 = vrot.lane.b32.xlu0 %v5933_v47, %s9518_s29  ;;  %s7196_s29 = smov 6  }
 0xc92   : > { %2545 = vrot.lane.b32.xlu1 %v5936_v53, %s7195_s3 }
 0xc93   : > { %2534 = vrot.lane.b32.xlu0 %v5935_v21, %s9487_s26  ;;  %s9532_s26 = smov 10  }
 0xc96   : > { %2567 = vrot.lane.b32.xlu1 %v5938_v46, %s9519_s5 }
 0xc97   : > { %2556 = vrot.lane.b32.xlu0 %v5937_v31, %s7196_s29  ;;  %s7204_s29 = smov 52  }
 0xc9a   : > { %2589 = vrot.lane.b32.xlu1 %v5940_v58, %s9532_s26  ;;  %s7198_s26 = smov 124  }
 0xc9b   : > { %2578 = vrot.lane.b32.xlu0 %v5939_v24, %s9528_s24  ;;  %s7197_s24 = smov 123  }
 0xcfc   : > { %v2490_v44 = vpop.permute.xlu1 %2489 }
 0xcfd   : > { %v2495_v38 = vsel %vm2493_vm6, 0.0, %v2490_v44  ;;  %v2488_v19 = vpop.permute.xlu0 %2487 }
 0xcfe   : > { %v2498_v22 = vsel %vm2496_vm7, %v2495_v38, 0.0  ;;  %v2494_v16 = vsel %vm2493_vm6, 0.0, %v2488_v19 }
 0xcff   : > { %v2497_v23 = vsel %vm2496_vm7, %v2494_v16, 0.0  ;;  %v2505_v30 = vmul.f32 %v8120_v17, %v2498_v22 }
 0xd00   : > { %v8127_v55 = vpop.permute.xlu1 %2523  ;;  %v2504_v41 = vmul.f32 %v8120_v17, %v2497_v23 }
 0xd01   : > { %v2526_v25 = vmul.f32 %v8127_v55, %v2497_v23  ;;  %v2527_v36 = vmul.f32 %v8127_v55, %v2498_v22  ;;  %v8132_v32 = vpop.permute.xlu0 %2512 }
 0xd02   : > { %v2515_v26 = vmul.f32 %v8132_v32, %v2497_v23  ;;  %v2516_v27 = vmul.f32 %v8132_v32, %v2498_v22  ;;  %v2658_v40 = vpack.c.bf16 %v2505_v30, %v2504_v41 }
 0xd03   : > { %v6689_v50 = vpack.i.bf16 %v2527_v36, %v2526_v25 }
 0xd04   : > { %v8136_v49 = vpop.permute.xlu1 %2545  ;;  %2694 = vmatpush1.bf16.msra.mxu0 %v2658_v40  ;;  %v6684_v35 = vpack.i.bf16 %v2516_v27, %v2515_v26 }
 0xd05   : > { %v2548_v39 = vmul.f32 %v8136_v49, %v2497_v23  ;;  %v2549_v29 = vmul.f32 %v8136_v49, %v2498_v22  ;;  %6690 = vrot.lane.b32.xlu1 %v6689_v50, %s9522_s4  ;;  %v8141_v61 = vpop.permute.xlu0 %2534  ;;  %2695 = vmatprep.subr.bf16.mxu0 %v7178_v28 }
 0xd06   : > { %v2537_v33 = vmul.f32 %v8141_v61, %v2497_v23  ;;  %v2538_v45 = vmul.f32 %v8141_v61, %v2498_v22  ;;  %6685 = vrot.lane.b32.xlu0 %v6684_v35, %s9523_s7 }
 0xd07   : > { %v6699_v48 = vpack.i.bf16 %v2549_v29, %v2548_v39 }
 0xd08   : > { %v8147_v13 = vpop.permute.xlu1 %2567  ;;  %v6694_v51 = vpack.i.bf16 %v2538_v45, %v2537_v33  ;;  %v6774_v45 = vld [vmem:[%s9534_s2] ss:$8 sps:$4 sm:$0xff]  }
 0xd09   : > { %v2570_v34 = vmul.f32 %v8147_v13, %v2497_v23  ;;  %v2571_v42 = vmul.f32 %v8147_v13, %v2498_v22  ;;  %6700 = vrot.lane.b32.xlu1 %v6699_v48, %s7197_s24  ;;  %v8152_v56 = vpop.permute.xlu0 %2556 }
 0xd0a   : > { %v2559_v37 = vmul.f32 %v8152_v56, %v2497_v23  ;;  %v2560_v52 = vmul.f32 %v8152_v56, %v2498_v22  ;;  %6695 = vrot.lane.b32.xlu0 %v6694_v51, %s7198_s26 }
 0xd0b   : > { %v6709_v57 = vpack.i.bf16 %v2571_v42, %v2570_v34 }
 0xd0c   : > { %v8157_v62 = vpop.permute.xlu1 %2589  ;;  %v6704_v2 = vpack.i.bf16 %v2560_v52, %v2559_v37 }
 0xd0d   : > { %v2592_v5 = vmul.f32 %v8157_v62, %v2497_v23  ;;  %v2593_v8 = vmul.f32 %v8157_v62, %v2498_v22  ;;  %6710 = vrot.lane.b32.xlu1 %v6709_v57, %s9530_s27  ;;  %v8162_v9 = vpop.permute.xlu0 %2578 }
 0xd0e   : > { %v2581_v6 = vmul.f32 %v8162_v9, %v2497_v23  ;;  %v2582_v43 = vmul.f32 %v8162_v9, %v2498_v22  ;;  %6705 = vrot.lane.b32.xlu0 %v6704_v2, %s7199_s9 }
 0xd0f   : > { %v6719_v10 = vpack.i.bf16 %v2593_v8, %v2592_v5 }
 0xd10   : > { %v6714_v7 = vpack.i.bf16 %v2582_v43, %v2581_v6 }
 0xd11   : > { %6720 = vrot.lane.b32.xlu1 %v6719_v10, %s9533_s23 }
 0xd12   : > { %6715 = vrot.lane.b32.xlu0 %v6714_v7, %s9529_s1 }
 0xd15   : > { %2678 = vperm.xlu1 %6483, %v2670_v11  }
 0xd16   : > { %2673 = vperm.xlu0 %6482, %v2669_v12  }
 0xd77   : > { %v6691_v59 = vpop.permute.xlu1 %6690 }
 0xd78   : > { %v6686_v20 = vpop.permute.xlu0 %6685  ;;  %v6693_v60 = vunpack.i.h.bf16 %v6691_v59  ;;  %v6692_v63 = vunpack.i.l.bf16 %v6691_v59 }
 0xd79   : > { %v6688_v14 = vunpack.i.h.bf16 %v6686_v20  ;;  %v6687_v54 = vunpack.i.l.bf16 %v6686_v20 }
 0xd7a   : > { %v2660_v53 = vpack.c.bf16 %v6693_v60, %v6692_v63 }
 0xd7b   : > { %v2659_v15 = vpack.c.bf16 %v6688_v14, %v6687_v54  ;;  %v6701_v31 = vpop.permute.xlu1 %6700 }
 0xd7c   : > { %v6696_v47 = vpop.permute.xlu0 %6695  ;;  %v6703_v58 = vunpack.i.h.bf16 %v6701_v31  ;;  %v6702_v24 = vunpack.i.l.bf16 %v6701_v31 }
 0xd7d   : > { %2696 = vmatpush1.bf16.msra.mxu0 %v2659_v15  ;;  %v6698_v21 = vunpack.i.h.bf16 %v6696_v47  ;;  %v6697_v46 = vunpack.i.l.bf16 %v6696_v47 }
 0xd7e   : > { %2697 = vmatprep.subr.bf16.mxu0 %v7178_v28  ;;  %v2662_v19 = vpack.c.bf16 %v6703_v58, %v6702_v24 }
 0xd7f   : > { %v2661_v44 = vpack.c.bf16 %v6698_v21, %v6697_v46  ;;  %v6711_v23 = vpop.permute.xlu1 %6710 }
 0xd80   : > { %v6706_v38 = vpop.permute.xlu0 %6705  ;;  %v6713_v30 = vunpack.i.h.bf16 %v6711_v23  ;;  %v6712_v41 = vunpack.i.l.bf16 %v6711_v23 }
 0xd81   : > { %2698 = vmatpush1.bf16.msra.mxu0 %v2660_v53  ;;  %v6708_v22 = vunpack.i.h.bf16 %v6706_v38  ;;  %v6707_v16 = vunpack.i.l.bf16 %v6706_v38 }
 0xd82   : > { %2699 = vmatprep.subr.bf16.mxu0 %v7178_v28  ;;  %v2664_v26 = vpack.c.bf16 %v6713_v30, %v6712_v41 }
 0xd83   : > { %v2663_v25 = vpack.c.bf16 %v6708_v22, %v6707_v16  ;;  %v6721_v50 = vpop.permute.xlu1 %6720 }
 0xd84   : > { %v6716_v36 = vpop.permute.xlu0 %6715  ;;  %v6723_v35 = vunpack.i.h.bf16 %v6721_v50  ;;  %v6722_v39 = vunpack.i.l.bf16 %v6721_v50 }
 0xd85   : > { %2700 = vmatpush1.bf16.msra.mxu0 %v2661_v44  ;;  %v6718_v27 = vunpack.i.h.bf16 %v6716_v36  ;;  %v6717_v40 = vunpack.i.l.bf16 %v6716_v36 }
 0xd86   : > { %2701 = vmatprep.subr.bf16.mxu0 %v7178_v28  ;;  %v2666_v33 = vpack.c.bf16 %v6723_v35, %v6722_v39 }
 0xd87   : > { %v2665_v29 = vpack.c.bf16 %v6718_v27, %v6717_v40 }
 0xd89   : > { %2702 = vmatpush1.bf16.msra.mxu0 %v2662_v19 }
 0xd8a   : > { %2703 = vmatprep.subr.bf16.mxu0 %v7178_v28 }
 0xd8d   : > { %2704 = vmatpush1.bf16.msra.mxu0 %v2663_v25 }
 0xd8e   : > { %2705 = vmatprep.subr.bf16.mxu0 %v7178_v28 }
 0xd91   : > { %2706 = vmatpush1.bf16.msra.mxu0 %v2664_v26 }
 0xd92   : > { %2707 = vmatprep.subr.bf16.mxu0 %v7178_v28 }
 0xd94   : > { %v2679_v37 = vpop.permute.xlu1 %2678 }
 0xd95   : > { %2708 = vmatpush1.bf16.msra.mxu0 %v2665_v29  ;;  %v2674_v48 = vpop.permute.xlu0 %2673 }
 0xd96   : > { %2709 = vmatprep.subr.bf16.mxu0 %v7178_v28 }
 0xd99   : > { %2710 = vmatpush1.bf16.msra.mxu0 %v2666_v33 }
 0xd9c   : > { %2726 = vmatmul.mubr.bf16.vlgmr.msra.gmra.mrb[32].mxu0 %v6774_v45 }
 0xe6f   : > { %v2727_v51 = vpop.f32.mrb[32].mxu0 }
 0xe70   : > { %v2728_v34 = vadd.f32 %v2727_v51, %v2674_v48  ;;  %v2729_v42 = vpop.f32.mrb[33].mxu0 }
 0xe71   : > { %v2730_v52 = vpop.f32.mrb[34].mxu0 }
 0xe72   : > { %vm2734_vm11 = vcmp.ge.f32.partialorder %v2728_v34, 0.0  ;;  %v2736_v57 = vmul.f32 0.01, %v2728_v34  ;;  %v2731_v2 = vadd.f32 %v2730_v52, %v2679_v37  ;;  %v2732_v5 = vpop.f32.mrb[35].mxu0 }
 0xe74   : > { %vm2735_vm12 = vcmp.ge.f32.partialorder %v2731_v2, 0.0  ;;  %v2737_v8 = vmul.f32 0.01, %v2731_v2  ;;  %v2738_v6 = vsel %vm2734_vm11, %v2728_v34, %v2736_v57  ;;  %vm3118_vm11 = vcmask 162816  }
 0xe75   : > { %2742 = vrot.lane.b32.xlu0 %v2738_v6, %s7195_s3 }
 0xe76   : > { %v2739_v43 = vsel %vm2735_vm12, %v2731_v2, %v2737_v8  ;;  %vm3121_vm12 = vcmask 228352  }
 0xe77   : > { %2744 = vrot.lane.b32.xlu1 %v2739_v43, %s7195_s3 }
 0xee7   : > { %v2743_v10 = vpop.permute.xlu0 %2742 }
 0xee8   : > { %v2748_v7 = vsel %vm2493_vm6, 0.0, %v2743_v10 }
 0xee9   : > { %v2750_v11 = vsel %vm2496_vm7, %v2748_v7, 0.0  ;;  %v2745_v12 = vpop.permute.xlu1 %2744 }
 0xeea   : > { %v2749_v18 = vsel %vm2493_vm6, 0.0, %v2745_v12  ;;  %v2756_v20 = vmul.f32 %v2750_v11, %v8127_v55  ;;  %v2754_v14 = vmul.f32 %v2750_v11, %v8132_v32  ;;  %v2752_v63 = vmul.f32 %v8120_v17, %v2750_v11 }
 0xeeb   : > { %v2751_v59 = vsel %vm2496_vm7, %v2749_v18, 0.0  ;;  %v2760_v58 = vmul.f32 %v2750_v11, %v8136_v49  ;;  %v2764_v38 = vmul.f32 %v2750_v11, %v8147_v13  ;;  %v2762_v19 = vmul.f32 %v2750_v11, %v8152_v56 }
 0xeec   : > { %v2757_v54 = vmul.f32 %v2751_v59, %v8127_v55  ;;  %v2755_v60 = vmul.f32 %v2751_v59, %v8132_v32  ;;  %v2753_v15 = vmul.f32 %v8120_v17, %v2751_v59  ;;  %v2761_v47 = vmul.f32 %v2751_v59, %v8136_v49 }
 0xeed   : > { %v2759_v31 = vmul.f32 %v2751_v59, %v8141_v61  ;;  %v2758_v55 = vmul.f32 %v2750_v11, %v8141_v61  ;;  %v2765_v17 = vmul.f32 %v2751_v59, %v8147_v13  ;;  %v2763_v44 = vmul.f32 %v2751_v59, %v8152_v56  ;;  %v2846_v13 = vld [vmem:[%s9422_s12 + $0x8] sm:$0xff]  ;;  %v2845_v56 = vld [vmem:[%s9422_s12] sm:$0xff] }
 0xeee   : > { %v6729_v53 = vpack.i.bf16 %v2757_v54, %v2756_v20  ;;  %v6724_v21 = vpack.i.bf16 %v2755_v60, %v2754_v14  ;;  %v2834_v46 = vpack.c.bf16 %v2753_v15, %v2752_v63  ;;  %v6739_v32 = vpack.i.bf16 %v2761_v47, %v2760_v58  ;;  %v6779_v60 = vld [vmem:[%s9535_s14] ss:$8 sps:$4 sm:$0xff]  }
 0xeef   : > { %v6734_v24 = vpack.i.bf16 %v2759_v31, %v2758_v55  ;;  %v6749_v49 = vpack.i.bf16 %v2765_v17, %v2764_v38  ;;  %v6744_v22 = vpack.i.bf16 %v2763_v44, %v2762_v19  ;;  %v2769_v61 = vmul.f32 %v2751_v59, %v8157_v62 }
 0xef0   : > { %6730 = vrot.lane.b32.xlu1 %v6729_v53, %s9522_s4  ;;  %6725 = vrot.lane.b32.xlu0 %v6724_v21, %s9523_s7  ;;  %v2767_v16 = vmul.f32 %v2751_v59, %v8162_v9  ;;  %v2768_v23 = vmul.f32 %v2750_v11, %v8157_v62  ;;  %v2766_v30 = vmul.f32 %v2750_v11, %v8162_v9  ;;  %v6777_v62 = vld [vmem:[%s9535_s14 + $0x4] ss:$8 sps:$4 sm:$0xff]   ;;  %vm9538_vm6 = vcmask 15360  }
 0xef1   : > { %2870 = vmatpush1.bf16.msra.mxu1 %v2834_v46  ;;  %5946 = vmatprep.mubr.msk.bf16.mxu1 %vm800_vm3, %v6777_v62  ;;  %vm9539_vm7 = vmmov %vm9538_vm6 }
 0xef2   : > { %2871 = vmatprep.subr.bf16.mxu1 %v7178_v28  ;;  %v6759_v41 = vpack.i.bf16 %v2769_v61, %v2768_v23  ;;  %v6754_v25 = vpack.i.bf16 %v2767_v16, %v2766_v30 }
 0xef4   : > { %6740 = vrot.lane.b32.xlu1 %v6739_v32, %s7197_s24  ;;  %6735 = vrot.lane.b32.xlu0 %v6734_v24, %s7198_s26  ;;  %v2946_v32 = vld [vmem:[%s9428_s18] sm:$0xf] }
 0xef5   : > { %6352 = vmatprep.subr.msk.mxu0 %vm9536_vm13, %v2946_v32  ;;  %vm3124_vm13 = vcmask 293888  }
 0xef6   : > { %6353 = vmatpush3.msk.msra.mxu0 %vm9537_vm14, %v2946_v32  ;;  %v3192_v32 = vld [vmem:[%s9429_s19 + $0x1c0] sm:$0xff] }
 0xef8   : > { %6750 = vrot.lane.b32.xlu1 %v6749_v49, %s9530_s27  ;;  %6745 = vrot.lane.b32.xlu0 %v6744_v22, %s7199_s9  ;;  %s7201_s9 = smov 44  }
 0xefc   : > { %6760 = vrot.lane.b32.xlu1 %v6759_v41, %s9533_s23  ;;  %6755 = vrot.lane.b32.xlu0 %v6754_v25, %s9529_s1  ;;  %s9544_s1 = smov 48   ;;  %s9545_s23 = smov 56  }
 0xf00   : > { %2854 = vperm.xlu1 %6483, %v2846_v13   ;;  %2849 = vperm.xlu0 %6482, %v2845_v56  }
 0xf62   : > { %v6731_v9 = vpop.permute.xlu1 %6730  ;;  %v6726_v36 = vpop.permute.xlu0 %6725 }
 0xf63   : > { %v6728_v26 = vunpack.i.h.bf16 %v6726_v36  ;;  %v6727_v27 = vunpack.i.l.bf16 %v6726_v36  ;;  %v6733_v40 = vunpack.i.h.bf16 %v6731_v9  ;;  %v6732_v50 = vunpack.i.l.bf16 %v6731_v9 }
 0xf65   : > { %v2835_v35 = vpack.c.bf16 %v6728_v26, %v6727_v27  ;;  %v2836_v29 = vpack.c.bf16 %v6733_v40, %v6732_v50 }
 0xf66   : > { %v6736_v39 = vpop.permute.xlu0 %6735  ;;  %v6741_v48 = vpop.permute.xlu1 %6740 }
 0xf67   : > { %2872 = vmatpush1.bf16.msra.mxu1 %v2835_v35  ;;  %v6738_v33 = vunpack.i.h.bf16 %v6736_v39  ;;  %v6737_v45 = vunpack.i.l.bf16 %v6736_v39  ;;  %v6743_v51 = vunpack.i.h.bf16 %v6741_v48  ;;  %v6742_v34 = vunpack.i.l.bf16 %v6741_v48  ;;  %v3144_v48 = vld [vmem:[%s9429_s19 + $0x40] sm:$0xff] }
 0xf68   : > { %2873 = vmatprep.subr.bf16.mxu1 %v7178_v28 }
 0xf69   : > { %v2837_v42 = vpack.c.bf16 %v6738_v33, %v6737_v45  ;;  %v2838_v52 = vpack.c.bf16 %v6743_v51, %v6742_v34  ;;  %v3136_v45 = vld [vmem:[%s9429_s19] sm:$0xff] }
 0xf6a   : > { %v6746_v37 = vpop.permute.xlu0 %6745  ;;  %v6751_v5 = vpop.permute.xlu1 %6750  ;;  %v5952_v34 = vcombine.low %v3136_v45, %v3144_v48 }
 0xf6b   : > { %2874 = vmatpush1.bf16.msra.mxu1 %v2836_v29  ;;  %v6748_v57 = vunpack.i.h.bf16 %v6746_v37  ;;  %v6747_v2 = vunpack.i.l.bf16 %v6746_v37  ;;  %v6753_v8 = vunpack.i.h.bf16 %v6751_v5  ;;  %v6752_v6 = vunpack.i.l.bf16 %v6751_v5  ;;  %v3145_v37 = vld [vmem:[%s9429_s19 + $0x48] sm:$0xff] }
 0xf6c   : > { %2875 = vmatprep.subr.bf16.mxu1 %v7178_v28 }
 0xf6d   : > { %v2839_v43 = vpack.c.bf16 %v6748_v57, %v6747_v2  ;;  %v2840_v7 = vpack.c.bf16 %v6753_v8, %v6752_v6  ;;  %v5953_v57 = vcombine.high %v3136_v45, %v3144_v48  ;;  %v3152_v6 = vld [vmem:[%s9429_s19 + $0x80] sm:$0xff] }
 0xf6e   : > { %v6756_v10 = vpop.permute.xlu0 %6755  ;;  %v6761_v18 = vpop.permute.xlu1 %6760 }
 0xf6f   : > { %2876 = vmatpush1.bf16.msra.mxu1 %v2837_v42  ;;  %v6758_v11 = vunpack.i.h.bf16 %v6756_v10  ;;  %v6757_v12 = vunpack.i.l.bf16 %v6756_v10  ;;  %v6763_v59 = vunpack.i.h.bf16 %v6761_v18  ;;  %v6762_v20 = vunpack.i.l.bf16 %v6761_v18  ;;  %v3137_v42 = vld [vmem:[%s9429_s19 + $0x8] sm:$0xff] }
 0xf70   : > { %2877 = vmatprep.subr.bf16.mxu1 %v7178_v28  ;;  %v5954_v2 = vcombine.low %v3137_v42, %v3145_v37  ;;  %v5955_v5 = vcombine.high %v3137_v42, %v3145_v37  ;;  %v3153_v10 = vld [vmem:[%s9429_s19 + $0x88] sm:$0xff] }
 0xf71   : > { %v2841_v14 = vpack.c.bf16 %v6758_v11, %v6757_v12  ;;  %v2842_v54 = vpack.c.bf16 %v6763_v59, %v6762_v20  ;;  %v3161_v12 = vld [vmem:[%s9429_s19 + $0xc8] sm:$0xff] }
 0xf72   : > { %3648 = vmatprep.subr.bf16.mxu0 %v5955_v5  ;;  %v5970_v59 = vcombine.low %v3153_v10, %v3161_v12  ;;  %v5971_v20 = vcombine.high %v3153_v10, %v3161_v12 }
 0xf73   : > { %2878 = vmatpush1.bf16.msra.mxu1 %v2838_v52 }
 0xf74   : > { %2879 = vmatprep.subr.bf16.mxu1 %v7178_v28 }
 0xf77   : > { %2880 = vmatpush1.bf16.msra.mxu1 %v2839_v43  ;;  %v3160_v43 = vld [vmem:[%s9429_s19 + $0xc0] sm:$0xff] }
 0xf78   : > { %2881 = vmatprep.subr.bf16.mxu1 %v7178_v28  ;;  %v5969_v11 = vcombine.high %v3152_v6, %v3160_v43 }
 0xf7b   : > { %2882 = vmatpush1.bf16.msra.mxu1 %v2840_v7  ;;  %v5968_v7 = vcombine.low %v3152_v6, %v3160_v43 }
 0xf7c   : > { %2883 = vmatprep.subr.bf16.mxu1 %v7178_v28 }
 0xf7f   : > { %2884 = vmatpush1.bf16.msra.mxu1 %v2841_v14  ;;  %v2850_v63 = vpop.permute.xlu0 %2849  ;;  %v2855_v21 = vpop.permute.xlu1 %2854 }
 0xf80   : > { %2885 = vmatprep.subr.bf16.mxu1 %v7178_v28 }
 0xf83   : > { %2886 = vmatpush1.bf16.msra.mxu1 %v2842_v54  ;;  %v3168_v54 = vld [vmem:[%s9429_s19 + $0x100] sm:$0xff] }
 0xf84   : > { %3607 = vmatprep.subr.bf16.mxu1 %v5953_v57 }
 0xf86   : > { %2902 = vmatmul.mubr.bf16.vlgmr.msra.gmra.mrb[8].mxu1 %v6779_v60  ;;  %v3176_v60 = vld [vmem:[%s9429_s19 + $0x140] sm:$0xff] }
 0xf87   : > { %3639 = vmatprep.mubr.bf16.mxu1 %v7178_v28  ;;  %3608 = vmatpush1.bf16.msra.mxu1 %v5952_v34 }
 0xf88   : > { %3609 = vmatprep.subr.bf16.mxu1 %v5969_v11 }
 0xf8b   : > { %3610 = vmatpush1.bf16.msra.mxu1 %v5968_v7 }
0x1059   : > { %v2903_v15 = vpop.f32.mrb[8].mxu1 }
0x105a   : > { %v2904_v47 = vadd.f32 %v2903_v15, %v2850_v63  ;;  %v2905_v53 = vpop.f32.mrb[9].mxu1  ;;  %v3169_v63 = vld [vmem:[%s9429_s19 + $0x108] sm:$0xff] }
0x105b   : > { %v2906_v46 = vpop.f32.mrb[10].mxu1  ;;  %v5985_v53 = vcombine.high %v3168_v54, %v3176_v60 }
0x105c   : > { %v2910_v31 = vmax.f32 %v2904_v47, 0.0  ;;  %v2907_v58 = vadd.f32 %v2906_v46, %v2855_v21  ;;  %v2908_v55 = vpop.f32.mrb[11].mxu1  ;;  %v5984_v47 = vcombine.low %v3168_v54, %v3176_v60  ;;  %v3177_v21 = vld [vmem:[%s9429_s19 + $0x148] sm:$0xff]  ;;  %v3162_v60 = vld [vmem:[%s9429_s19 + $0xd0] sm:$0xff] }
0x105d   : > { %v5986_v46 = vcombine.low %v3169_v63, %v3177_v21  ;;  %3611 = vmatprep.subr.bf16.mxu1 %v5985_v53  ;;  %v3184_v55 = vld [vmem:[%s9429_s19 + $0x180] sm:$0xff] }
0x105e   : > { %v2912_v24 = vsel %vm800_vm3, %v2910_v31, 0.0  ;;  %v2911_v17 = vmax.f32 %v2907_v58, 0.0  ;;  %3612 = vmatpush1.bf16.msra.mxu1 %v5984_v47 }
0x105f   : > { %2916 = vrot.lane.b32.xlu0 %v2912_v24, %s9523_s7 }
0x1060   : > { %v2913_v44 = vsel %vm800_vm3, %v2911_v17, 0.0 }
0x1061   : > { %2918 = vrot.lane.b32.xlu1 %v2913_v44, %s9523_s7  ;;  %s7200_s7 = smov 36  }
0x1063   : > { %2924 = vrot.lane.b32.xlu0 %v2912_v24, %s7198_s26 }
0x1065   : > { %2926 = vrot.lane.b32.xlu1 %v2913_v44, %s7198_s26  ;;  %s9541_s26 = smov 4  }
0x1067   : > { %2932 = vrot.lane.b32.xlu0 %v2912_v24, %s7197_s24  ;;  %v3185_v24 = vld [vmem:[%s9429_s19 + $0x188] sm:$0xff] }
0x1069   : > { %2934 = vrot.lane.b32.xlu1 %v2913_v44, %s7197_s24  ;;  %v6000_v44 = vcombine.low %v3184_v55, %v3192_v32 }
0x10d1   : > { %v2917_v38 = vpop.permute.xlu0 %2916 }
0x10d2   : > { %v2922_v22 = vmax.f32 %v2910_v31, %v2917_v38  ;;  %v5987_v31 = vcombine.high %v3169_v63, %v3177_v21  ;;  %v6001_v38 = vcombine.high %v3184_v55, %v3192_v32  ;;  %v3155_v63 = vld [vmem:[%s9429_s19 + $0x98] sm:$0xff]  ;;  %v3170_v55 = vld [vmem:[%s9429_s19 + $0x110] sm:$0xff] }
0x10d3   : > { %v2919_v19 = vpop.permute.xlu1 %2918  ;;  %v3178_v32 = vld [vmem:[%s9429_s19 + $0x150] sm:$0xff] }
0x10d4   : > { %v2923_v16 = vmax.f32 %v2911_v17, %v2919_v19  ;;  %v3193_v19 = vld [vmem:[%s9429_s19 + $0x1c8] sm:$0xff]  ;;  %3613 = vmatprep.subr.bf16.mxu1 %v6001_v38 }
0x10d5   : > { %v2925_v49 = vpop.permute.xlu0 %2924  ;;  %3614 = vmatpush1.bf16.msra.mxu1 %v6000_v44 }
0x10d6   : > { %v2930_v23 = vmax.f32 %v2922_v22, %v2925_v49  ;;  %v6002_v49 = vcombine.low %v3185_v24, %v3193_v19  ;;  %v6003_v22 = vcombine.high %v3185_v24, %v3193_v19  ;;  %v3171_v24 = vld [vmem:[%s9429_s19 + $0x118] sm:$0xff]  ;;  %v5989_v19 = vcombine.high %v3170_v55, %v3178_v32 }
0x10d7   : > { %v2927_v61 = vpop.permute.xlu1 %2926 }
0x10d8   : > { %v2931_v41 = vmax.f32 %v2923_v16, %v2927_v61  ;;  %v8340_v16 = vld [vmem:[%s9429_s19 + $0x10] sm:$0xff] }
0x10d9   : > { %v2933_v30 = vpop.permute.xlu0 %2932 }
0x10da   : > { %v2938_v25 = vmax.f32 %v2930_v23, %v2933_v30  ;;  %v8345_v23 = vld [vmem:[%s9429_s19 + $0x50] sm:$0xff]  ;;  %v8350_v30 = vld [vmem:[%s9429_s19 + $0x18] sm:$0xff] }
0x10db   : > { %v2935_v13 = vpop.permute.xlu1 %2934 }
0x10dc   : > { %v2939_v56 = vmax.f32 %v2931_v41, %v2935_v13  ;;  %2942 = vrot.lane.b32.xlu0 %v2938_v25, %s9530_s27  ;;  %6354 = vmatprep.mubr.msk.f32.mxu0 %vm2477_vm1, %v2938_v25  ;;  %v5956_v41 = vcombine.low %v8340_v16, %v8345_v23  ;;  %v5957_v25 = vcombine.high %v8340_v16, %v8345_v23  ;;  %v8359_v13 = vld [vmem:[%s9429_s19 + $0x58] sm:$0xff] }
0x10dd   : > { %v3187_v16 = vld [vmem:[%s9429_s19 + $0x198] sm:$0xff] }
0x10de   : > { %2944 = vrot.lane.b32.xlu1 %v2939_v56, %s9530_s27  ;;  %6355 = vmatmul.mubr.msk.f32.vlgmr.msra.gmra.mrb[36].mxu0 %vm2477_vm1, %v2939_v56  ;;  %s9543_s27 = smov 24   ;;  %v3195_v23 = vld [vmem:[%s9429_s19 + $0x1d8] sm:$0xff] }
0x10df   : > { %3649 = vmatpush1.bf16.msra.mxu0 %v5954_v2  ;;  %3689 = vmatprep.subr.bf16.mxu1 %v5957_v25 }
0x10e0   : > { %3650 = vmatprep.subr.bf16.mxu0 %v5971_v20  ;;  %v3154_v20 = vld [vmem:[%s9429_s19 + $0x90] sm:$0xff] }
0x10e1   : > { %v5972_v44 = vcombine.low %v3154_v20, %v3162_v60 }
0x10e3   : > { %3651 = vmatpush1.bf16.msra.mxu0 %v5970_v59 }
0x10e4   : > { %3652 = vmatprep.subr.bf16.mxu0 %v5987_v31  ;;  %v5973_v31 = vcombine.high %v3154_v20, %v3162_v60  ;;  %v3143_v60 = vld [vmem:[%s9429_s19 + $0x38] sm:$0xff] }
0x10e7   : > { %3653 = vmatpush1.bf16.msra.mxu0 %v5986_v46 }
0x10e8   : > { %3654 = vmatprep.subr.bf16.mxu0 %v6003_v22  ;;  %v3186_v22 = vld [vmem:[%s9429_s19 + $0x190] sm:$0xff] }
0x10eb   : > { %3655 = vmatpush1.bf16.msra.mxu0 %v6002_v49 }
0x114e   : > { %v2943_v62 = vpop.permute.xlu0 %2942 }
0x114f   : > { %6357 = vmatprep.mubr.msk.f32.mxu0 %vm2477_vm1, %v2943_v62  ;;  %v5958_v62 = vcombine.low %v8350_v30, %v8359_v13 }
0x1150   : > { %v2945_v9 = vpop.permute.xlu1 %2944 }
0x1151   : > { %6358 = vmatmul.mubr.msk.f32.gmra.mrb[38].mxu0 %vm2477_vm1, %v2945_v9  ;;  %v5959_v9 = vcombine.high %v8350_v30, %v8359_v13  ;;  %v5988_v30 = vcombine.low %v3170_v55, %v3178_v32  ;;  %v6007_v13 = vcombine.high %v3187_v16, %v3195_v23  ;;  %v3159_v55 = vld [vmem:[%s9429_s19 + $0xb8] sm:$0xff] }
0x1152   : > { %3680 = vmatprep.mubr.bf16.mxu0 %v7178_v28  ;;  %v3167_v32 = vld [vmem:[%s9429_s19 + $0xf8] sm:$0xff] }
0x1153   : > { %3730 = vmatprep.subr.bf16.mxu0 %v5959_v9  ;;  %v3141_v9 = vld [vmem:[%s9429_s19 + $0x28] sm:$0xff] }
0x11b1   : > { %v6356_v36 = vpop.f32.mrb[36].mxu0 }
0x11b2   : > { %v3024_v26 = vpop.f32.mrb[37].mxu0 }
0x1224   : > { %v6359_v27 = vpop.f32.mrb[38].mxu0 }
0x1225   : > { %3047 = vrot.lane.b32.xlu1 %v6359_v27, %s9517_s28  ;;  %v3034_v40 = vpop.f32.mrb[39].mxu0 }
0x1226   : > { %3045 = vrot.lane.b32.xlu0 %v3034_v40, %s9517_s28  ;;  %s7202_s28 = smov 20  }
0x1297   : > { %v3048_v50 = vpop.permute.xlu1 %3047 }
0x1298   : > { %v8266_v35 = vsel %vm9538_vm6, %v6356_v36, %v3048_v50  ;;  %v3046_v39 = vpop.permute.xlu0 %3045 }
0x1299   : > { %3083 = vrot.lane.b32.xlu1 %v8266_v35, %s9514_s0  ;;  %v3086_v29 = vrot.slane %v8266_v35, 1  ;;  %v3090_v33 = vrot.slane %v8266_v35, 2  ;;  %v8279_v51 = vsel %vm9539_vm7, %v3024_v26, %v3046_v39  ;;  %v3094_v52 = vrot.slane %v8266_v35, 3 }
0x129a   : > { %v3058_v8 = vrot.slane %v8279_v51, 2  ;;  %v3054_v18 = vrot.slane %v8279_v51, 1  ;;  %v3066_v14 = vrot.slane %v8279_v51, 4  ;;  %v3062_v15 = vrot.slane %v8279_v51, 3 }
0x129b   : > { %3087 = vrot.lane.b32.xlu0 %v3086_v29, %s7200_s7  ;;  %v3074_v58 = vrot.slane %v8279_v51, 6  ;;  %v3070_v17 = vrot.slane %v8279_v51, 5  ;;  %v3098_v61 = vrot.slane %v8266_v35, 4  ;;  %v3078_v56 = vrot.slane %v8279_v51, 7  ;;  %s9546_s7 = sld [smem:[#allocation3_spill]] }
0x129c   : > { %v3106_v36 = vrot.slane %v8266_v35, 6  ;;  %v3102_v26 = vrot.slane %v8266_v35, 5  ;;  %v3110_v27 = vrot.slane %v8266_v35, 7 }
0x129d   : > { %3091 = vrot.lane.b32.xlu1 %v3090_v33, %s9540_s8 }
0x129f   : > { %3095 = vrot.lane.b32.xlu0 %v3094_v52, %s7201_s9 }
0x12a1   : > { %3059 = vrot.lane.b32.xlu1 %v3058_v8, %s9519_s5 }
0x12a3   : > { %3055 = vrot.lane.b32.xlu0 %v3054_v18, %s9541_s26 }
0x12a5   : > { %3067 = vrot.lane.b32.xlu1 %v3066_v14, %s9515_s6  ;;  %s7203_s6 = smov 28  }
0x12a7   : > { %3063 = vrot.lane.b32.xlu0 %v3062_v15, %s9542_s16  ;;  %v3163_v15 = vld [vmem:[%s9429_s19 + $0xd8] sm:$0xff] }
0x12a8   : > { %v5974_v38 = vcombine.low %v3155_v63, %v3163_v15 }
0x12a9   : > { %3075 = vrot.lane.b32.xlu1 %v3074_v58, %s9543_s27  ;;  %v5975_v58 = vcombine.high %v3155_v63, %v3163_v15  ;;  %v3151_v63 = vld [vmem:[%s9429_s19 + $0x78] sm:$0xff]  ;;  %s5878_s27 = sshll.u32 %s9546_s7, 1 }
0x12ab   : > { %3071 = vrot.lane.b32.xlu0 %v3070_v17, %s7202_s28  ;;  %v3179_v17 = vld [vmem:[%s9429_s19 + $0x158] sm:$0xff]  ;;  %s9547_s28 = sld [smem:[#allocation17_spill]] }
0x12ac   : > { %v5991_v49 = vcombine.high %v3171_v24, %v3179_v17 }
0x12ad   : > { %3099 = vrot.lane.b32.xlu1 %v3098_v61, %s9544_s1  ;;  %v3194_v61 = vld [vmem:[%s9429_s19 + $0x1d0] sm:$0xff] }
0x12ae   : > { %v6005_v25 = vcombine.high %v3186_v22, %v3194_v61 }
0x12af   : > { %3079 = vrot.lane.b32.xlu0 %v3078_v56, %s7203_s6  ;;  %v3140_v56 = vld [vmem:[%s9429_s19 + $0x20] sm:$0xff] }
0x12b1   : > { %3107 = vrot.lane.b32.xlu1 %v3106_v36, %s9545_s23  ;;  %v3149_v36 = vld [vmem:[%s9429_s19 + $0x68] sm:$0xff]  ;;  %s708_s4 = scalar_lea.vmem %s9547_s28, %s5878_s27 }
0x12b3   : > { %3103 = vrot.lane.b32.xlu0 %v3102_v26, %s7204_s29  ;;  %v6004_v26 = vcombine.low %v3186_v22, %v3194_v61  ;;  %v3175_v22 = vld [vmem:[%s9429_s19 + $0x138] sm:$0xff] }
0x12b4   : > { %v3183_v61 = vld [vmem:[%s9429_s19 + $0x178] sm:$0xff] }
0x12b7   : > { %3111 = vrot.lane.b32.xlu0 %v3110_v27, %s7205_s25  ;;  %v6006_v27 = vcombine.low %v3187_v16, %v3195_v23  ;;  %v5982_v23 = vcombine.low %v3159_v55, %v3167_v32 }
0x130b   : > { %v3084_v40 = vpop.permute.xlu1 %3083 }
0x130d   : > { %v3088_v50 = vpop.permute.xlu0 %3087 }
0x130f   : > { %v3092_v39 = vpop.permute.xlu1 %3091 }
0x1311   : > { %v3096_v29 = vpop.permute.xlu0 %3095 }
0x1313   : > { %v3060_v33 = vpop.permute.xlu1 %3059 }
0x1315   : > { %v3056_v45 = vpop.permute.xlu0 %3055 }
0x1316   : > { %v3114_v48 = vsel %vm2477_vm1, %v8279_v51, %v3056_v45  ;;  %vm3127_vm1 = vcmask 359424   ;;  %v3165_v45 = vld [vmem:[%s9429_s19 + $0xe8] sm:$0xff] }
0x1317   : > { %v3068_v34 = vpop.permute.xlu1 %3067  ;;  %v3115_v42 = vsel %vm1842_vm0, %v3114_v48, %v3060_v33  ;;  %vm3130_vm0 = vcmask 424960   ;;  %v3157_v33 = vld [vmem:[%s9429_s19 + $0xa8] sm:$0xff] }
0x1319   : > { %v3064_v37 = vpop.permute.xlu0 %3063 }
0x131a   : > { %v3116_v52 = vsel %vm2482_vm4, %v3115_v42, %v3064_v37  ;;  %v5979_v37 = vcombine.high %v3157_v33, %v3165_v45 }
0x131b   : > { %v3076_v57 = vpop.permute.xlu1 %3075  ;;  %v3117_v35 = vsel %vm800_vm3, %v3116_v52, %v3068_v34  ;;  %vm3133_vm3 = vcmask 490496   ;;  %v5962_v34 = vcombine.low %v3141_v9, %v3149_v36  ;;  %v3172_v52 = vld [vmem:[%s9429_s19 + $0x120] sm:$0xff] }
0x131d   : > { %v3072_v2 = vpop.permute.xlu0 %3071 }
0x131e   : > { %v3119_v5 = vsel %vm3118_vm11, %v3117_v35, %v3072_v2  ;;  %v3173_v35 = vld [vmem:[%s9429_s19 + $0x128] sm:$0xff] }
0x131f   : > { %v3120_v8 = vsel %vm1847_vm2, %v3119_v5, %v3076_v57  ;;  %v3100_v43 = vpop.permute.xlu1 %3099  ;;  %v3180_v57 = vld [vmem:[%s9429_s19 + $0x160] sm:$0xff]  ;;  %v3181_v2 = vld [vmem:[%s9429_s19 + $0x168] sm:$0xff]  ;;  %vm5815_vm2 = vcmp.lt.s32.totalorder %v727_v0, 256 }
0x1321   : > { %v3080_v6 = vpop.permute.xlu0 %3079 }
0x1322   : > { %v3122_v10 = vsel %vm3121_vm12, %v3120_v8, %v3080_v6  ;;  %v5978_v8 = vcombine.low %v3157_v33, %v3165_v45  ;;  %v5993_v6 = vcombine.high %v3172_v52, %v3180_v57  ;;  %v6792_v33 = vld [vmem:[%s9431_s21 + $0x300] ss:$8 sps:$4 sm:$0xff]   ;;  %v6785_v45 = vld [vmem:[%s9431_s21 + $0x14] ss:$8 sps:$4 sm:$0xff]  }
0x1323   : > { %v3123_v51 = vsel %vm868_vm5, %v3122_v10, %v3084_v40  ;;  %v3108_v14 = vpop.permute.xlu1 %3107  ;;  %v3188_v10 = vld [vmem:[%s9429_s19 + $0x1a0] sm:$0xff]  ;;  %vm5463_vm5 = vcmask 654336  }
0x1324   : > { %v3125_v7 = vsel %vm3124_vm13, %v3123_v51, %v3088_v50  ;;  %v5963_v50 = vcombine.high %v3141_v9, %v3149_v36  ;;  %v3196_v51 = vld [vmem:[%s9429_s19 + $0x1e0] sm:$0xff]  ;;  %v5998_v36 = vcombine.low %v3175_v22, %v3183_v61 }
0x1325   : > { %v3126_v11 = vsel %vm1852_vm8, %v3125_v7, %v3092_v39  ;;  %v3104_v12 = vpop.permute.xlu0 %3103  ;;  %v3156_v39 = vld [vmem:[%s9429_s19 + $0xa0] sm:$0xff]  ;;  %v3189_v7 = vld [vmem:[%s9429_s19 + $0x1a8] sm:$0xff]  ;;  %v6008_v15 = vcombine.low %v3188_v10, %v3196_v51 }
0x1326   : > { %v3128_v18 = vsel %vm3127_vm1, %v3126_v11, %v3096_v29  ;;  %v3164_v29 = vld [vmem:[%s9429_s19 + $0xe0] sm:$0xff]  ;;  %v3197_v11 = vld [vmem:[%s9429_s19 + $0x1e8] sm:$0xff] }
0x1327   : > { %v3129_v59 = vsel %vm1855_vm9, %v3128_v18, %v3100_v43  ;;  %v5977_v42 = vcombine.high %v3156_v39, %v3164_v29  ;;  %v5976_v5 = vcombine.low %v3156_v39, %v3164_v29  ;;  %v5995_v43 = vcombine.high %v3173_v35, %v3181_v2  ;;  %v6782_v39 = vld [vmem:[%s9431_s21 + $0x4] ss:$8 sps:$4 sm:$0xff]   ;;  %v6780_v29 = vld [vmem:[%s9431_s21] ss:$8 sps:$4 sm:$0xff]  }
0x1328   : > { %v3131_v54 = vsel %vm3130_vm0, %v3129_v59, %v3104_v12  ;;  %v5992_v12 = vcombine.low %v3172_v52, %v3180_v57  ;;  %v5994_v18 = vcombine.low %v3173_v35, %v3181_v2  ;;  %v6009_v59 = vcombine.high %v3188_v10, %v3196_v51  ;;  %v6786_v52 = vld [vmem:[%s9431_s21 + $0x20] ss:$8 sps:$4 sm:$0xff]   ;;  %v6791_v35 = vld [vmem:[%s9431_s21 + $0x34] ss:$8 sps:$4 sm:$0xff]  }
0x1329   : > { %v3132_v47 = vsel %vm1858_vm10, %v3131_v54, %v3108_v14  ;;  %v3112_v53 = vpop.permute.xlu0 %3111  ;;  %v6011_v20 = vcombine.high %v3189_v7, %v3197_v11  ;;  %v3142_v14 = vld [vmem:[%s9429_s19 + $0x30] sm:$0xff]  ;;  %v6804_v57 = vld [vmem:[%s9431_s21 + $0x320] ss:$8 sps:$4 sm:$0xff]  }
0x132a   : > { %v3134_v21 = vsel %vm3133_vm3, %v3132_v47, %v3112_v53  ;;  %v3150_v54 = vld [vmem:[%s9429_s19 + $0x70] sm:$0xff]  ;;  %v6010_v47 = vcombine.low %v3189_v7, %v3197_v11  ;;  %v6795_v10 = vld [vmem:[%s9431_s21 + $0x40] ss:$8 sps:$4 sm:$0xff]  }
0x132b   : > { %v8393_v46 = vpack.c.bf16 %v3134_v21, %v3134_v21  ;;  %v5965_v53 = vcombine.high %v3142_v14, %v3150_v54  ;;  %v5967_v21 = vcombine.high %v3143_v60, %v3151_v63  ;;  %v6812_v2 = vld [vmem:[%s9431_s21 + $0x334] ss:$8 sps:$4 sm:$0xff]   ;;  %v6816_v51 = vld [vmem:[%s9431_s21 + $0x340] ss:$8 sps:$4 sm:$0xff]  }
0x132c   : > { %v6803_v7 = vld [vmem:[%s9431_s21 + $0x54] ss:$8 sps:$4 sm:$0xff]  }
0x132d   : > { %6016 = vmatmul.mubr.msk.bf16.vlgmr.msra.gmra.mrb[12].mxu1 %vm2288_vm15, %v8393_v46  ;;  %6017 = vmatmul.mubr.msk.bf16.vlgmr.msra.gmra.mrb[40].mxu0 %vm2288_vm15, %v8393_v46  ;;  %v6824_v11 = vld [vmem:[%s9431_s21 + $0x354] ss:$8 sps:$4 sm:$0xff]  }
0x132e   : > { %3690 = vmatpush1.bf16.msra.mxu1 %v5956_v41  ;;  %3731 = vmatpush1.bf16.msra.mxu0 %v5958_v62  ;;  %v5990_v41 = vcombine.low %v3171_v24, %v3179_v17  ;;  %v3148_v62 = vld [vmem:[%s9429_s19 + $0x60] sm:$0xff]  ;;  %v5964_v24 = vcombine.low %v3142_v14, %v3150_v54  ;;  %v5966_v17 = vcombine.low %v3143_v60, %v3151_v63  ;;  %v6815_v60 = vld [vmem:[%s9431_s21 + $0x74] ss:$8 sps:$4 sm:$0xff]  }
0x132f   : > { %3691 = vmatprep.subr.bf16.mxu1 %v5973_v31  ;;  %3732 = vmatprep.subr.bf16.mxu0 %v5975_v58  ;;  %v5961_v40 = vcombine.high %v3140_v56, %v3148_v62  ;;  %v5960_v48 = vcombine.low %v3140_v56, %v3148_v62  ;;  %v3158_v31 = vld [vmem:[%s9429_s19 + $0xb0] sm:$0xff]  ;;  %v3191_v56 = vld [vmem:[%s9429_s19 + $0x1b8] sm:$0xff]  ;;  %v6807_v14 = vld [vmem:[%s9431_s21 + $0x60] ss:$8 sps:$4 sm:$0xff]  }
0x1330   : > { %3721 = vmatprep.mubr.bf16.mxu1 %v7178_v28  ;;  %3762 = vmatprep.mubr.bf16.mxu0 %v7178_v28  ;;  %v3166_v58 = vld [vmem:[%s9429_s19 + $0xf0] sm:$0xff]  ;;  %v3199_v62 = vld [vmem:[%s9429_s19 + $0x1f8] sm:$0xff]  ;;  %v6828_v54 = vld [vmem:[%s9431_s21 + $0x360] ss:$8 sps:$4 sm:$0xff]  }
0x1331   : > { %v5980_v16 = vcombine.low %v3158_v31, %v3166_v58  ;;  %v6836_v63 = vld [vmem:[%s9431_s21 + $0x374] ss:$8 sps:$4 sm:$0xff]  }
0x1332   : > { %3692 = vmatpush1.bf16.msra.mxu1 %v5972_v44  ;;  %3733 = vmatpush1.bf16.msra.mxu0 %v5974_v38  ;;  %v5981_v44 = vcombine.high %v3158_v31, %v3166_v58  ;;  %v5983_v38 = vcombine.high %v3159_v55, %v3167_v32  ;;  %v6819_v31 = vld [vmem:[%s9431_s21 + $0x80] ss:$8 sps:$4 sm:$0xff]   ;;  %v6827_v55 = vld [vmem:[%s9431_s21 + $0x94] ss:$8 sps:$4 sm:$0xff]  }
0x1333   : > { %3693 = vmatprep.subr.bf16.mxu1 %v5989_v19  ;;  %3734 = vmatprep.subr.bf16.mxu0 %v5991_v49  ;;  %v3174_v19 = vld [vmem:[%s9429_s19 + $0x130] sm:$0xff]  ;;  %v6840_v58 = vld [vmem:[%s9431_s21 + $0x380] ss:$8 sps:$4 sm:$0xff]  }
0x1334   : > { %v3182_v49 = vld [vmem:[%s9429_s19 + $0x170] sm:$0xff] }
0x1335   : > { %v5996_v9 = vcombine.low %v3174_v19, %v3182_v49  ;;  %v6848_v32 = vld [vmem:[%s9431_s21 + $0x394] ss:$8 sps:$4 sm:$0xff]  }
0x1336   : > { %3694 = vmatpush1.bf16.msra.mxu1 %v5988_v30  ;;  %3735 = vmatpush1.bf16.msra.mxu0 %v5990_v41  ;;  %v5997_v30 = vcombine.high %v3174_v19, %v3182_v49  ;;  %v5999_v41 = vcombine.high %v3175_v22, %v3183_v61  ;;  %v6831_v19 = vld [vmem:[%s9431_s21 + $0xa0] ss:$8 sps:$4 sm:$0xff]   ;;  %v6839_v22 = vld [vmem:[%s9431_s21 + $0xb4] ss:$8 sps:$4 sm:$0xff]  }
0x1337   : > { %3695 = vmatprep.subr.bf16.mxu1 %v6005_v25  ;;  %3736 = vmatprep.subr.bf16.mxu0 %v6007_v13  ;;  %v3190_v25 = vld [vmem:[%s9429_s19 + $0x1b0] sm:$0xff]  ;;  %v6852_v49 = vld [vmem:[%s9431_s21 + $0x3a0] ss:$8 sps:$4 sm:$0xff]  }
0x1338   : > { %v3198_v13 = vld [vmem:[%s9429_s19 + $0x1f0] sm:$0xff] }
0x1339   : > { %v6860_v61 = vld [vmem:[%s9431_s21 + $0x3b4] ss:$8 sps:$4 sm:$0xff]  }
0x133a   : > { %3696 = vmatpush1.bf16.msra.mxu1 %v6004_v26  ;;  %3737 = vmatpush1.bf16.msra.mxu0 %v6006_v27  ;;  %v6013_v26 = vcombine.high %v3190_v25, %v3198_v13  ;;  %v6015_v27 = vcombine.high %v3191_v56, %v3199_v62 }
0x133b   : > { %3771 = vmatprep.subr.bf16.mxu1 %v5961_v40  ;;  %3812 = vmatprep.subr.bf16.mxu0 %v5963_v50  ;;  %v6012_v40 = vcombine.low %v3190_v25, %v3198_v13  ;;  %v6014_v50 = vcombine.low %v3191_v56, %v3199_v62  ;;  %v6843_v25 = vld [vmem:[%s9431_s21 + $0xc0] ss:$8 sps:$4 sm:$0xff]   ;;  %v6851_v56 = vld [vmem:[%s9431_s21 + $0xd4] ss:$8 sps:$4 sm:$0xff]  }
0x133c   : > { %v6864_v13 = vld [vmem:[%s9431_s21 + $0x3c0] ss:$8 sps:$4 sm:$0xff]   ;;  %v6872_v62 = vld [vmem:[%s9431_s21 + $0x3d4] ss:$8 sps:$4 sm:$0xff]  }
0x133d   : > { %6018 = vmatmul.mubr.msk.bf16.vlgmr.msra.gmra.mrb[16].mxu1 %vm2288_vm15, %v8393_v46  ;;  %6019 = vmatmul.mubr.msk.bf16.vlgmr.msra.gmra.mrb[44].mxu0 %vm2288_vm15, %v8393_v46 }
0x133e   : > { %3772 = vmatpush1.bf16.msra.mxu1 %v5960_v48  ;;  %3813 = vmatpush1.bf16.msra.mxu0 %v5962_v34  ;;  %v6800_v48 = vld [vmem:[%s9431_s21 + $0x314] ss:$8 sps:$4 sm:$0xff]   ;;  %v6783_v34 = vld [vmem:[%s9431_s21 + $0x10] ss:$8 sps:$4 sm:$0xff]  }
0x133f   : > { %3773 = vmatprep.subr.bf16.mxu1 %v5977_v42  ;;  %3814 = vmatprep.subr.bf16.mxu0 %v5979_v37  ;;  %v6798_v42 = vld [vmem:[%s9431_s21 + $0x310] ss:$8 sps:$4 sm:$0xff]   ;;  %v6788_v37 = vld [vmem:[%s9431_s21 + $0x24] ss:$8 sps:$4 sm:$0xff]  }
0x1340   : > { %3803 = vmatprep.mubr.bf16.mxu1 %v7178_v28  ;;  %3844 = vmatprep.mubr.bf16.mxu0 %v7178_v28 }
0x1342   : > { %3774 = vmatpush1.bf16.msra.mxu1 %v5976_v5  ;;  %3815 = vmatpush1.bf16.msra.mxu0 %v5978_v8  ;;  %v6789_v5 = vld [vmem:[%s9431_s21 + $0x30] ss:$8 sps:$4 sm:$0xff]  }
0x1343   : > { %3775 = vmatprep.subr.bf16.mxu1 %v5993_v6  ;;  %3816 = vmatprep.subr.bf16.mxu0 %v5995_v43  ;;  %v6810_v8 = vld [vmem:[%s9431_s21 + $0x330] ss:$8 sps:$4 sm:$0xff]   ;;  %v6797_v6 = vld [vmem:[%s9431_s21 + $0x44] ss:$8 sps:$4 sm:$0xff]  }
0x1344   : > { %v6818_v43 = vld [vmem:[%s9431_s21 + $0x344] ss:$8 sps:$4 sm:$0xff]  }
0x1346   : > { %3776 = vmatpush1.bf16.msra.mxu1 %v5992_v12  ;;  %3817 = vmatpush1.bf16.msra.mxu0 %v5994_v18  ;;  %v6801_v12 = vld [vmem:[%s9431_s21 + $0x50] ss:$8 sps:$4 sm:$0xff]  }
0x1347   : > { %3777 = vmatprep.subr.bf16.mxu1 %v6009_v59  ;;  %3818 = vmatprep.subr.bf16.mxu0 %v6011_v20  ;;  %v6822_v18 = vld [vmem:[%s9431_s21 + $0x350] ss:$8 sps:$4 sm:$0xff]   ;;  %v6809_v59 = vld [vmem:[%s9431_s21 + $0x64] ss:$8 sps:$4 sm:$0xff]  }
0x1348   : > { %v6830_v20 = vld [vmem:[%s9431_s21 + $0x364] ss:$8 sps:$4 sm:$0xff]  }
0x134a   : > { %3778 = vmatpush1.bf16.msra.mxu1 %v6008_v15  ;;  %3819 = vmatpush1.bf16.msra.mxu0 %v6010_v47  ;;  %v6813_v15 = vld [vmem:[%s9431_s21 + $0x70] ss:$8 sps:$4 sm:$0xff]  }
0x134b   : > { %3853 = vmatprep.subr.bf16.mxu1 %v5965_v53  ;;  %3894 = vmatprep.subr.bf16.mxu0 %v5967_v21  ;;  %v6834_v47 = vld [vmem:[%s9431_s21 + $0x370] ss:$8 sps:$4 sm:$0xff]   ;;  %v6821_v53 = vld [vmem:[%s9431_s21 + $0x84] ss:$8 sps:$4 sm:$0xff]  }
0x134c   : > { %v6842_v21 = vld [vmem:[%s9431_s21 + $0x384] ss:$8 sps:$4 sm:$0xff]  }
0x134d   : > { %6020 = vmatmul.mubr.msk.bf16.vlgmr.msra.gmra.mrb[20].mxu1 %vm2288_vm15, %v8393_v46  ;;  %6021 = vmatmul.mubr.msk.bf16.vlgmr.msra.gmra.mrb[48].mxu0 %vm2288_vm15, %v8393_v46 }
0x134e   : > { %3854 = vmatpush1.bf16.msra.mxu1 %v5964_v24  ;;  %3895 = vmatpush1.bf16.msra.mxu0 %v5966_v17  ;;  %v6825_v24 = vld [vmem:[%s9431_s21 + $0x90] ss:$8 sps:$4 sm:$0xff]  }
0x134f   : > { %3855 = vmatprep.subr.bf16.mxu1 %v5981_v44  ;;  %3896 = vmatprep.subr.bf16.mxu0 %v5983_v38  ;;  %v6846_v17 = vld [vmem:[%s9431_s21 + $0x390] ss:$8 sps:$4 sm:$0xff]   ;;  %v6833_v44 = vld [vmem:[%s9431_s21 + $0xa4] ss:$8 sps:$4 sm:$0xff]  }
0x1350   : > { %3885 = vmatprep.mubr.bf16.mxu1 %v7178_v28  ;;  %3926 = vmatprep.mubr.bf16.mxu0 %v7178_v28  ;;  %v6794_v28 = vld [vmem:[%s9431_s21 + $0x304] ss:$8 sps:$4 sm:$0xff]  }
0x1351   : > { %v6854_v38 = vld [vmem:[%s9431_s21 + $0x3a4] ss:$8 sps:$4 sm:$0xff]  }
0x1352   : > { %3856 = vmatpush1.bf16.msra.mxu1 %v5980_v16  ;;  %3897 = vmatpush1.bf16.msra.mxu0 %v5982_v23  ;;  %v6837_v16 = vld [vmem:[%s9431_s21 + $0xb0] ss:$8 sps:$4 sm:$0xff]  }
0x1353   : > { %3857 = vmatprep.subr.bf16.mxu1 %v5997_v30  ;;  %3898 = vmatprep.subr.bf16.mxu0 %v5999_v41  ;;  %v6858_v23 = vld [vmem:[%s9431_s21 + $0x3b0] ss:$8 sps:$4 sm:$0xff]   ;;  %v6845_v30 = vld [vmem:[%s9431_s21 + $0xc4] ss:$8 sps:$4 sm:$0xff]  }
0x1354   : > { %v6866_v41 = vld [vmem:[%s9431_s21 + $0x3c4] ss:$8 sps:$4 sm:$0xff]  }
0x1356   : > { %3858 = vmatpush1.bf16.msra.mxu1 %v5996_v9  ;;  %3899 = vmatpush1.bf16.msra.mxu0 %v5998_v36  ;;  %v6849_v9 = vld [vmem:[%s9431_s21 + $0xd0] ss:$8 sps:$4 sm:$0xff]  }
0x1357   : > { %3859 = vmatprep.subr.bf16.mxu1 %v6013_v26  ;;  %3900 = vmatprep.subr.bf16.mxu0 %v6015_v27  ;;  %v6870_v36 = vld [vmem:[%s9431_s21 + $0x3d0] ss:$8 sps:$4 sm:$0xff]   ;;  %v6857_v26 = vld [vmem:[%s9431_s21 + $0xe4] ss:$8 sps:$4 sm:$0xff]  }
0x1358   : > { %v6878_v27 = vld [vmem:[%s9431_s21 + $0x3e4] ss:$8 sps:$4 sm:$0xff]  }
0x135a   : > { %3860 = vmatpush1.bf16.msra.mxu1 %v6012_v40  ;;  %3901 = vmatpush1.bf16.msra.mxu0 %v6014_v50  ;;  %v6855_v40 = vld [vmem:[%s9431_s21 + $0xe0] ss:$8 sps:$4 sm:$0xff]  }
0x135b   : > { %5467 = vmatprep.subr.bf16.mxu0 %v6782_v39  ;;  %5590 = vmatprep.subr.bf16.mxu1 %v6794_v28  ;;  %v6876_v50 = vld [vmem:[%s9431_s21 + $0x3e0] ss:$8 sps:$4 sm:$0xff]   ;;  %v6863_v39 = vld [vmem:[%s9431_s21 + $0xf4] ss:$8 sps:$4 sm:$0xff]  }
0x135c   : > { %v6884_v28 = vld [vmem:[%s9431_s21 + $0x3f4] ss:$8 sps:$4 sm:$0xff]  }
0x135d   : > { %6022 = vmatmul.mubr.msk.bf16.vlgmr.msra.gmra.mrb[24].mxu1 %vm2288_vm15, %v8393_v46  ;;  %6023 = vmatmul.mubr.msk.bf16.vlgmr.msra.gmra.mrb[52].mxu0 %vm2288_vm15, %v8393_v46  ;;  %v6806_v46 = vld [vmem:[%s9431_s21 + $0x324] ss:$8 sps:$4 sm:$0xff]  }
0x135e   : > { %5468 = vmatpush1.bf16.msra.mxu0 %v6780_v29  ;;  %5591 = vmatpush1.bf16.msra.mxu1 %v6792_v33  ;;  %v6861_v29 = vld [vmem:[%s9431_s21 + $0xf0] ss:$8 sps:$4 sm:$0xff]  }
0x135f   : > { %5469 = vmatprep.subr.bf16.mxu0 %v6785_v45  ;;  %5592 = vmatprep.subr.bf16.mxu1 %v6800_v48  ;;  %v6882_v33 = vld [vmem:[%s9431_s21 + $0x3f0] ss:$8 sps:$4 sm:$0xff]   ;;  %v6869_v45 = vld [vmem:[%s9431_s21 + $0x104] ss:$8 sps:$4 sm:$0xff]  }
0x1360   : > { %v6890_v48 = vld [vmem:[%s9431_s21 + $0x404] ss:$8 sps:$4 sm:$0xff]  }
0x1362   : > { %5470 = vmatpush1.bf16.msra.mxu0 %v6783_v34  ;;  %5593 = vmatpush1.bf16.msra.mxu1 %v6798_v42  ;;  %v8744_v34 = vld [vmem:[%s9430_s20 + $0x8] sm:$0xff]  ;;  %v3534_v42 = vsub.s32 2, %v7338_v1 }
0x1363   : > { %5471 = vmatprep.subr.bf16.mxu0 %v6788_v37  ;;  %5594 = vmatprep.subr.bf16.mxu1 %v6806_v46  ;;  %v3542_v46 = vsub.s32 4, %v7338_v1 }
0x1364   : > { %v8750_v37 = vrot.slane %v8744_v34, %v3534_v42 }
0x1366   : > { %5472 = vmatpush1.bf16.msra.mxu0 %v6786_v52  ;;  %5595 = vmatpush1.bf16.msra.mxu1 %v6804_v57  ;;  %v8756_v52 = vrot.slane %v8744_v34, %v3542_v46  ;;  %v3550_v57 = vsub.s32 6, %v7338_v1 }
0x1367   : > { %5473 = vmatprep.subr.bf16.mxu0 %v6791_v35  ;;  %5596 = vmatprep.subr.bf16.mxu1 %v6812_v2  ;;  %v3546_v35 = vsub.s32 5, %v7338_v1  ;;  %v3554_v2 = vsub.s32 7, %v7338_v1 }
0x136a   : > { %5474 = vmatpush1.bf16.msra.mxu0 %v6789_v5  ;;  %5597 = vmatpush1.bf16.msra.mxu1 %v6810_v8  ;;  %v8762_v5 = vrot.slane %v8744_v34, %v3550_v57  ;;  %v8767_v8 = vrot.slane %v8744_v34, %v3546_v35 }
0x136b   : > { %5475 = vmatprep.subr.bf16.mxu0 %v6797_v6  ;;  %5598 = vmatprep.subr.bf16.mxu1 %v6818_v43  ;;  %v8770_v6 = vrot.slane %v8744_v34, %v3554_v2  ;;  %v8775_v43 = vld [vmem:[%s9430_s20] sm:$0xff] }
0x136e   : > { %5476 = vmatpush1.bf16.msra.mxu0 %v6795_v10  ;;  %5599 = vmatpush1.bf16.msra.mxu1 %v6816_v51  ;;  %v3538_v10 = vsub.s32 3, %v7338_v1  ;;  %v3527_v51 = vrot.slane %v8775_v43, %v7345_v3 }
0x136f   : > { %5477 = vmatprep.subr.bf16.mxu0 %v6803_v7  ;;  %5600 = vmatprep.subr.bf16.mxu1 %v6824_v11  ;;  %v3531_v7 = vrot.slane %v8775_v43, %v7348_v4 }
0x1370   : > { %v3539_v11 = vrot.slane %v8775_v43, %v3538_v10 }
0x1372   : > { %5478 = vmatpush1.bf16.msra.mxu0 %v6801_v12  ;;  %5601 = vmatpush1.bf16.msra.mxu1 %v6822_v18 }
0x1373   : > { %5479 = vmatprep.subr.bf16.mxu0 %v6809_v59  ;;  %5602 = vmatprep.subr.bf16.mxu1 %v6830_v20 }
0x1376   : > { %5480 = vmatpush1.bf16.msra.mxu0 %v6807_v14  ;;  %5603 = vmatpush1.bf16.msra.mxu1 %v6828_v54 }
0x1377   : > { %5481 = vmatprep.subr.bf16.mxu0 %v6815_v60  ;;  %5604 = vmatprep.subr.bf16.mxu1 %v6836_v63 }
0x137a   : > { %5482 = vmatpush1.bf16.msra.mxu0 %v6813_v15  ;;  %5605 = vmatpush1.bf16.msra.mxu1 %v6834_v47 }
0x137b   : > { %5483 = vmatprep.subr.bf16.mxu0 %v6821_v53  ;;  %5606 = vmatprep.subr.bf16.mxu1 %v6842_v21 }
0x137e   : > { %5484 = vmatpush1.bf16.msra.mxu0 %v6819_v31  ;;  %5607 = vmatpush1.bf16.msra.mxu1 %v6840_v58  ;;  %v6867_v31 = vld [vmem:[%s9431_s21 + $0x100] ss:$8 sps:$4 sm:$0xff]  }
0x137f   : > { %5485 = vmatprep.subr.bf16.mxu0 %v6827_v55  ;;  %5608 = vmatprep.subr.bf16.mxu1 %v6848_v32  ;;  %v6875_v55 = vld [vmem:[%s9431_s21 + $0x114] ss:$8 sps:$4 sm:$0xff]  }
0x1382   : > { %5486 = vmatpush1.bf16.msra.mxu0 %v6825_v24  ;;  %5609 = vmatpush1.bf16.msra.mxu1 %v6846_v17  ;;  %v6873_v24 = vld [vmem:[%s9431_s21 + $0x110] ss:$8 sps:$4 sm:$0xff]   ;;  %v6881_v17 = vld [vmem:[%s9431_s21 + $0x124] ss:$8 sps:$4 sm:$0xff]  }
0x1383   : > { %5487 = vmatprep.subr.bf16.mxu0 %v6833_v44  ;;  %5610 = vmatprep.subr.bf16.mxu1 %v6854_v38  ;;  %v6879_v44 = vld [vmem:[%s9431_s21 + $0x120] ss:$8 sps:$4 sm:$0xff]   ;;  %v3551_v38 = vrot.slane %v8775_v43, %v3550_v57 }
0x1384   : > { %v6900_v57 = vld [vmem:[%s9431_s21 + $0x420] ss:$8 sps:$4 sm:$0xff]  }
0x1386   : > { %5488 = vmatpush1.bf16.msra.mxu0 %v6831_v19  ;;  %5611 = vmatpush1.bf16.msra.mxu1 %v6852_v49  ;;  %v6887_v19 = vld [vmem:[%s9431_s21 + $0x134] ss:$8 sps:$4 sm:$0xff]   ;;  %v3555_v49 = vrot.slane %v8775_v43, %v3554_v2  ;;  %v6903_v2 = vld [vmem:[%s9431_s21 + $0x160] ss:$8 sps:$4 sm:$0xff]  }
0x1387   : > { %5489 = vmatprep.subr.bf16.mxu0 %v6839_v22  ;;  %5612 = vmatprep.subr.bf16.mxu1 %v6860_v61 }
0x138a   : > { %5490 = vmatpush1.bf16.msra.mxu0 %v6837_v16  ;;  %5613 = vmatpush1.bf16.msra.mxu1 %v6858_v23  ;;  %v6885_v16 = vld [vmem:[%s9431_s21 + $0x130] ss:$8 sps:$4 sm:$0xff]  }
0x138b   : > { %5491 = vmatprep.subr.bf16.mxu0 %v6845_v30  ;;  %5614 = vmatprep.subr.bf16.mxu1 %v6866_v41 }
0x138e   : > { %5492 = vmatpush1.bf16.msra.mxu0 %v6843_v25  ;;  %5615 = vmatpush1.bf16.msra.mxu1 %v6864_v13  ;;  %v6893_v25 = vld [vmem:[%s9431_s21 + $0x144] ss:$8 sps:$4 sm:$0xff]  }
0x138f   : > { %5493 = vmatprep.subr.bf16.mxu0 %v6851_v56  ;;  %5616 = vmatprep.subr.bf16.mxu1 %v6872_v62 }
0x1392   : > { %5494 = vmatpush1.bf16.msra.mxu0 %v6849_v9  ;;  %5617 = vmatpush1.bf16.msra.mxu1 %v6870_v36 }
0x1393   : > { %5495 = vmatprep.subr.bf16.mxu0 %v6857_v26  ;;  %5618 = vmatprep.subr.bf16.mxu1 %v6878_v27  ;;  %v6888_v27 = vld [vmem:[%s9431_s21 + $0x400] ss:$8 sps:$4 sm:$0xff]  }
0x1396   : > { %5496 = vmatpush1.bf16.msra.mxu0 %v6855_v40  ;;  %5619 = vmatpush1.bf16.msra.mxu1 %v6876_v50  ;;  %v6891_v40 = vld [vmem:[%s9431_s21 + $0x140] ss:$8 sps:$4 sm:$0xff]  }
0x1397   : > { %5497 = vmatprep.subr.bf16.mxu0 %v6863_v39  ;;  %5620 = vmatprep.subr.bf16.mxu1 %v6884_v28  ;;  %v6896_v39 = vld [vmem:[%s9431_s21 + $0x414] ss:$8 sps:$4 sm:$0xff]  }
0x1398   : > { %v6899_v28 = vld [vmem:[%s9431_s21 + $0x154] ss:$8 sps:$4 sm:$0xff]  }
0x139a   : > { %5498 = vmatpush1.bf16.msra.mxu0 %v6861_v29  ;;  %5621 = vmatpush1.bf16.msra.mxu1 %v6882_v33  ;;  %v6894_v29 = vld [vmem:[%s9431_s21 + $0x410] ss:$8 sps:$4 sm:$0xff]  }
0x139b   : > { %5508 = vmatprep.subr.bf16.mxu0 %v6869_v45  ;;  %5631 = vmatprep.subr.bf16.mxu1 %v6890_v48  ;;  %v6897_v33 = vld [vmem:[%s9431_s21 + $0x150] ss:$8 sps:$4 sm:$0xff]   ;;  %v6902_v45 = vld [vmem:[%s9431_s21 + $0x424] ss:$8 sps:$4 sm:$0xff]  }
0x139c   : > { %v6905_v48 = vld [vmem:[%s9431_s21 + $0x164] ss:$8 sps:$4 sm:$0xff]  }
0x1400   : > { %v3641_v12 = vpop.f32.mrb[12].mxu1  ;;  %v8785_v18 = vpop.f32.mrb[40].mxu0 }
0x1401   : > { %v3642_v59 = vadd.f32 %v3641_v12, %v3527_v51  ;;  %v3643_v20 = vpop.f32.mrb[13].mxu1  ;;  %v3684_v14 = vpop.f32.mrb[41].mxu0  ;;  %v6908_v51 = vld [vmem:[%s9431_s21 + $0x434] ss:$8 sps:$4 sm:$0xff]   ;;  %v3571_v12 = vrot.slane %v8744_v34, %v3538_v10  ;;  %v6914_v10 = vld [vmem:[%s9431_s21 + $0x444] ss:$8 sps:$4 sm:$0xff]  }
0x1402   : > { %v3644_v54 = vadd.f32 %v3643_v20, %v3531_v7  ;;  %v3685_v60 = vadd.f32 %v3684_v14, %v3539_v11  ;;  %v3645_v63 = vpop.f32.mrb[14].mxu1  ;;  %v3686_v15 = vpop.f32.mrb[42].mxu0  ;;  %v6911_v7 = vld [vmem:[%s9431_s21 + $0x174] ss:$8 sps:$4 sm:$0xff]   ;;  %v3563_v11 = vrot.slane %v8744_v34, %v7348_v4  ;;  %v6906_v14 = vld [vmem:[%s9431_s21 + $0x430] ss:$8 sps:$4 sm:$0xff]  }
0x1403   : > { %v3646_v47 = vpop.f32.mrb[15].mxu1  ;;  %v3687_v53 = vpop.f32.mrb[43].mxu0  ;;  %v3935_v58 = vpack.c.bf16 %v3642_v59, %v3642_v59 }
0x1404   : > { %v3936_v21 = vpack.c.bf16 %v3644_v54, %v3644_v54  ;;  %v3938_v32 = vpack.c.bf16 %v3685_v60, %v3685_v60  ;;  %v6909_v54 = vld [vmem:[%s9431_s21 + $0x170] ss:$8 sps:$4 sm:$0xff]   ;;  %v6917_v47 = vld [vmem:[%s9431_s21 + $0x184] ss:$8 sps:$4 sm:$0xff]  }
0x1406   : > { %5499 = vmatprep.mubr.bf16.mxu0 %v3936_v21 }
0x1407   : > { %5500 = vmatmul.mubr.bf16.vlgmr.msra.gmra.mrb[56].mxu0 %v3935_v58 }
0x1408   : > { %5509 = vmatpush1.bf16.msra.mxu0 %v6867_v31  ;;  %5540 = vmatprep.mubr.bf16.mxu0 %v3938_v32 }
0x1409   : > { %5510 = vmatprep.subr.bf16.mxu0 %v6875_v55 }
0x140c   : > { %5511 = vmatpush1.bf16.msra.mxu0 %v6873_v24  ;;  %v6912_v24 = vld [vmem:[%s9431_s21 + $0x440] ss:$8 sps:$4 sm:$0xff]  }
0x140d   : > { %5512 = vmatprep.subr.bf16.mxu0 %v6881_v17  ;;  %v6915_v17 = vld [vmem:[%s9431_s21 + $0x180] ss:$8 sps:$4 sm:$0xff]  }
0x1410   : > { %v8807_v22 = vpop.f32.mrb[16].mxu1  ;;  %v3764_v61 = vpop.f32.mrb[44].mxu0  ;;  %5513 = vmatpush1.bf16.msra.mxu0 %v6879_v44  ;;  %v6920_v44 = vld [vmem:[%s9431_s21 + $0x454] ss:$8 sps:$4 sm:$0xff]  }
0x1411   : > { %v3765_v23 = vadd.f32 %v3764_v61, %v3551_v38  ;;  %v8812_v30 = vpop.f32.mrb[17].mxu1  ;;  %v3766_v41 = vpop.f32.mrb[45].mxu0  ;;  %5514 = vmatprep.subr.bf16.mxu0 %v6887_v19  ;;  %v6923_v38 = vld [vmem:[%s9431_s21 + $0x194] ss:$8 sps:$4 sm:$0xff]   ;;  %v6918_v19 = vld [vmem:[%s9431_s21 + $0x450] ss:$8 sps:$4 sm:$0xff]  }
0x1412   : > { %v3767_v13 = vadd.f32 %v3766_v41, %v3555_v49  ;;  %v3727_v56 = vpop.f32.mrb[18].mxu1  ;;  %v3768_v62 = vpop.f32.mrb[46].mxu0  ;;  %v6921_v49 = vld [vmem:[%s9431_s21 + $0x190] ss:$8 sps:$4 sm:$0xff]   ;;  %v6926_v61 = vld [vmem:[%s9431_s21 + $0x464] ss:$8 sps:$4 sm:$0xff]  }
0x1413   : > { %v3728_v9 = vpop.f32.mrb[19].mxu1  ;;  %v3769_v36 = vpop.f32.mrb[47].mxu0  ;;  %v3941_v50 = vpack.c.bf16 %v3765_v23, %v3765_v23  ;;  %v6924_v23 = vld [vmem:[%s9431_s21 + $0x460] ss:$8 sps:$4 sm:$0xff]  }
0x1414   : > { %v3942_v26 = vpack.c.bf16 %v3767_v13, %v3767_v13  ;;  %5515 = vmatpush1.bf16.msra.mxu0 %v6885_v16  ;;  %v6929_v16 = vld [vmem:[%s9431_s21 + $0x1a4] ss:$8 sps:$4 sm:$0xff]   ;;  %v6927_v41 = vld [vmem:[%s9431_s21 + $0x1a0] ss:$8 sps:$4 sm:$0xff]   ;;  %v6935_v13 = vld [vmem:[%s9431_s21 + $0x1b4] ss:$8 sps:$4 sm:$0xff]  }
0x1415   : > { %5516 = vmatprep.subr.bf16.mxu0 %v6893_v25  ;;  %v6932_v25 = vld [vmem:[%s9431_s21 + $0x474] ss:$8 sps:$4 sm:$0xff]   ;;  %v6930_v9 = vld [vmem:[%s9431_s21 + $0x470] ss:$8 sps:$4 sm:$0xff]  }
0x1416   : > { %5622 = vmatprep.mubr.bf16.mxu1 %v3942_v26  ;;  %v6933_v36 = vld [vmem:[%s9431_s21 + $0x1b0] ss:$8 sps:$4 sm:$0xff]  }
0x1417   : > { %5623 = vmatmul.mubr.bf16.vlgmr.msra.gmra.mrb[28].mxu1 %v3941_v50 }
0x1418   : > { %5632 = vmatpush1.bf16.msra.mxu1 %v6888_v27  ;;  %5517 = vmatpush1.bf16.msra.mxu0 %v6891_v40 }
0x1419   : > { %5633 = vmatprep.subr.bf16.mxu1 %v6896_v39  ;;  %5518 = vmatprep.subr.bf16.mxu0 %v6899_v28  ;;  %v6938_v39 = vld [vmem:[%s9431_s21 + $0x484] ss:$8 sps:$4 sm:$0xff]  }
0x141a   : > { %v6941_v28 = vld [vmem:[%s9431_s21 + $0x1c4] ss:$8 sps:$4 sm:$0xff]  }
0x141c   : > { %5634 = vmatpush1.bf16.msra.mxu1 %v6894_v29  ;;  %5519 = vmatpush1.bf16.msra.mxu0 %v6897_v33 }
0x141d   : > { %5635 = vmatprep.subr.bf16.mxu1 %v6902_v45  ;;  %5520 = vmatprep.subr.bf16.mxu0 %v6905_v48 }
0x1420   : > { %5636 = vmatpush1.bf16.msra.mxu1 %v6900_v57  ;;  %v8858_v59 = vpop.f32.mrb[20].mxu1  ;;  %v3846_v20 = vpop.f32.mrb[48].mxu0  ;;  %5521 = vmatpush1.bf16.msra.mxu0 %v6903_v2  ;;  %v6936_v57 = vld [vmem:[%s9431_s21 + $0x480] ss:$8 sps:$4 sm:$0xff]  }
0x1421   : > { %v8867_v60 = vadd.f32 %v3846_v20, %v8750_v37  ;;  %v3807_v63 = vpop.f32.mrb[21].mxu1  ;;  %v3848_v15 = vpop.f32.mrb[49].mxu0  ;;  %5637 = vmatprep.subr.bf16.mxu1 %v6908_v51  ;;  %5522 = vmatprep.subr.bf16.mxu0 %v6911_v7  ;;  %v6939_v2 = vld [vmem:[%s9431_s21 + $0x1c0] ss:$8 sps:$4 sm:$0xff]   ;;  %v6942_v51 = vld [vmem:[%s9431_s21 + $0x490] ss:$8 sps:$4 sm:$0xff]  }
0x1422   : > { %v3808_v53 = vadd.f32 %v3807_v63, %v3563_v11  ;;  %v8875_v21 = vadd.f32 %v3848_v15, %v3571_v12  ;;  %v3809_v31 = vpop.f32.mrb[22].mxu1  ;;  %v3850_v58 = vpop.f32.mrb[50].mxu0  ;;  %v6945_v7 = vld [vmem:[%s9431_s21 + $0x1d0] ss:$8 sps:$4 sm:$0xff]   ;;  %v6950_v11 = vld [vmem:[%s9431_s21 + $0x4a4] ss:$8 sps:$4 sm:$0xff]  }
0x1423   : > { %v3810_v55 = vpop.f32.mrb[23].mxu1  ;;  %v3851_v37 = vpop.f32.mrb[51].mxu0  ;;  %v6953_v12 = vld [vmem:[%s9431_s21 + $0x1e4] ss:$8 sps:$4 sm:$0xff]   ;;  %v6948_v20 = vld [vmem:[%s9431_s21 + $0x4a0] ss:$8 sps:$4 sm:$0xff]  }
0x1424   : > { %v3944_v32 = vpack.c.bf16 %v3808_v53, %v3808_v53  ;;  %5638 = vmatpush1.bf16.msra.mxu1 %v6906_v14  ;;  %5523 = vmatpush1.bf16.msra.mxu0 %v6909_v54  ;;  %v6951_v14 = vld [vmem:[%s9431_s21 + $0x1e0] ss:$8 sps:$4 sm:$0xff]   ;;  %v3535_v54 = vrot.slane %v8775_v43, %v3534_v42  ;;  %v6956_v63 = vld [vmem:[%s9431_s21 + $0x4b4] ss:$8 sps:$4 sm:$0xff]   ;;  %v6954_v42 = vld [vmem:[%s9431_s21 + $0x4b0] ss:$8 sps:$4 sm:$0xff]  }
0x1425   : > { %5639 = vmatprep.subr.bf16.mxu1 %v6914_v10  ;;  %5524 = vmatprep.subr.bf16.mxu0 %v6917_v47  ;;  %v6959_v15 = vld [vmem:[%s9431_s21 + $0x1f4] ss:$8 sps:$4 sm:$0xff]   ;;  %v3547_v10 = vrot.slane %v8775_v43, %v3546_v35  ;;  %v6957_v47 = vld [vmem:[%s9431_s21 + $0x1f0] ss:$8 sps:$4 sm:$0xff]   ;;  %v6962_v31 = vld [vmem:[%s9431_s21 + $0x4c4] ss:$8 sps:$4 sm:$0xff]  }
0x1426   : > { %5663 = vmatprep.mubr.bf16.mxu1 %v3944_v32  ;;  %v3683_v53 = vadd.f32 %v8785_v18, %v3535_v54  ;;  %v6965_v35 = vld [vmem:[%s9431_s21 + $0x204] ss:$8 sps:$4 sm:$0xff]   ;;  %v6960_v55 = vld [vmem:[%s9431_s21 + $0x4c0] ss:$8 sps:$4 sm:$0xff]   ;;  %v6968_v32 = vld [vmem:[%s9431_s21 + $0x4d4] ss:$8 sps:$4 sm:$0xff]  }
0x1427   : > { %v3726_v58 = vadd.f32 %v8812_v30, %v3547_v10  ;;  %v6963_v18 = vld [vmem:[%s9431_s21 + $0x200] ss:$8 sps:$4 sm:$0xff]   ;;  %v6971_v30 = vld [vmem:[%s9431_s21 + $0x214] ss:$8 sps:$4 sm:$0xff]   ;;  %v7014_v54 = vld [vmem:[%s9431_s21 + $0x550] ss:$8 sps:$4 sm:$0xff]  }
0x1428   : > { %5640 = vmatpush1.bf16.msra.mxu1 %v6912_v24  ;;  %5525 = vmatpush1.bf16.msra.mxu0 %v6915_v17  ;;  %v3937_v37 = vpack.c.bf16 %v3683_v53, %v3683_v53  ;;  %v6966_v17 = vld [vmem:[%s9431_s21 + $0x4d0] ss:$8 sps:$4 sm:$0xff]   ;;  %v7025_v10 = vld [vmem:[%s9431_s21 + $0x2a4] ss:$8 sps:$4 sm:$0xff]   ;;  %v7028_v53 = vld [vmem:[%s9431_s21 + $0x574] ss:$8 sps:$4 sm:$0xff]  }
0x1429   : > { %5641 = vmatprep.subr.bf16.mxu1 %v6920_v44  ;;  %5526 = vmatprep.subr.bf16.mxu0 %v6923_v38  ;;  %v3940_v24 = vpack.c.bf16 %v3726_v58, %v3726_v58  ;;  %v6969_v44 = vld [vmem:[%s9431_s21 + $0x210] ss:$8 sps:$4 sm:$0xff]   ;;  %v6974_v38 = vld [vmem:[%s9431_s21 + $0x4e4] ss:$8 sps:$4 sm:$0xff]  }
0x142a   : > { %v7029_v58 = vld [vmem:[%s9431_s21 + $0x2b0] ss:$8 sps:$4 sm:$0xff]  }
0x142c   : > { %5642 = vmatpush1.bf16.msra.mxu1 %v6918_v19  ;;  %5527 = vmatpush1.bf16.msra.mxu0 %v6921_v49  ;;  %v6977_v19 = vld [vmem:[%s9431_s21 + $0x224] ss:$8 sps:$4 sm:$0xff]   ;;  %v6972_v49 = vld [vmem:[%s9431_s21 + $0x4e0] ss:$8 sps:$4 sm:$0xff]  }
0x142d   : > { %5643 = vmatprep.subr.bf16.mxu1 %v6926_v61  ;;  %5528 = vmatprep.subr.bf16.mxu0 %v6929_v16  ;;  %v6975_v61 = vld [vmem:[%s9431_s21 + $0x220] ss:$8 sps:$4 sm:$0xff]   ;;  %v3559_v16 = vrot.slane %v8744_v34, %v7345_v3  ;;  %v6981_v34 = vld [vmem:[%s9431_s21 + $0x230] ss:$8 sps:$4 sm:$0xff]  }
0x1430   : > { %5644 = vmatpush1.bf16.msra.mxu1 %v6924_v23  ;;  %v3887_v56 = vpop.f32.mrb[24].mxu1  ;;  %v3928_v62 = vpop.f32.mrb[52].mxu0  ;;  %5529 = vmatpush1.bf16.msra.mxu0 %v6927_v41  ;;  %v6980_v23 = vld [vmem:[%s9431_s21 + $0x4f4] ss:$8 sps:$4 sm:$0xff]  }
0x1431   : > { %v8920_v26 = vadd.f32 %v3887_v56, %v8756_v52  ;;  %v8923_v27 = vadd.f32 %v3928_v62, %v8762_v5  ;;  %v3889_v40 = vpop.f32.mrb[25].mxu1  ;;  %v3930_v50 = vpop.f32.mrb[53].mxu0  ;;  %5645 = vmatprep.subr.bf16.mxu1 %v6932_v25  ;;  %5530 = vmatprep.subr.bf16.mxu0 %v6935_v13  ;;  %v6983_v41 = vld [vmem:[%s9431_s21 + $0x234] ss:$8 sps:$4 sm:$0xff]   ;;  %v6978_v25 = vld [vmem:[%s9431_s21 + $0x4f0] ss:$8 sps:$4 sm:$0xff]   ;;  %v3806_v13 = vadd.f32 %v8858_v59, %v3559_v16 }
0x1432   : > { %v8932_v29 = vadd.f32 %v3889_v40, %v8767_v8  ;;  %v8935_v52 = vadd.f32 %v3930_v50, %v8770_v6  ;;  %v3891_v5 = vpop.f32.mrb[26].mxu1  ;;  %v3932_v33 = vpop.f32.mrb[54].mxu0  ;;  %v6944_v8 = vld [vmem:[%s9431_s21 + $0x494] ss:$8 sps:$4 sm:$0xff]   ;;  %v6986_v56 = vld [vmem:[%s9431_s21 + $0x504] ss:$8 sps:$4 sm:$0xff]   ;;  %v3946_v50 = vpack.c.bf16 %v8875_v21, %v8875_v21 }
0x1433   : > { %v3892_v45 = vpop.f32.mrb[27].mxu1  ;;  %v3933_v48 = vpop.f32.mrb[55].mxu0  ;;  %v6947_v6 = vld [vmem:[%s9431_s21 + $0x1d4] ss:$8 sps:$4 sm:$0xff]   ;;  %v6989_v62 = vld [vmem:[%s9431_s21 + $0x244] ss:$8 sps:$4 sm:$0xff]  }
0x1434   : > { %5646 = vmatpush1.bf16.msra.mxu1 %v6930_v9  ;;  %5531 = vmatpush1.bf16.msra.mxu0 %v6933_v36  ;;  %v6984_v9 = vld [vmem:[%s9431_s21 + $0x500] ss:$8 sps:$4 sm:$0xff]   ;;  %v3943_v36 = vpack.c.bf16 %v3806_v13, %v3806_v13  ;;  %v6992_v40 = vld [vmem:[%s9431_s21 + $0x514] ss:$8 sps:$4 sm:$0xff]   ;;  %v6993_v5 = vld [vmem:[%s9431_s21 + $0x250] ss:$8 sps:$4 sm:$0xff]  }
0x1435   : > { %5647 = vmatprep.subr.bf16.mxu1 %v6938_v39  ;;  %5532 = vmatprep.subr.bf16.mxu0 %v6941_v28  ;;  %v6987_v59 = vld [vmem:[%s9431_s21 + $0x240] ss:$8 sps:$4 sm:$0xff]   ;;  %v6995_v39 = vld [vmem:[%s9431_s21 + $0x254] ss:$8 sps:$4 sm:$0xff]   ;;  %v6990_v28 = vld [vmem:[%s9431_s21 + $0x510] ss:$8 sps:$4 sm:$0xff]  }
0x1436   : > { %v6998_v21 = vld [vmem:[%s9431_s21 + $0x524] ss:$8 sps:$4 sm:$0xff]   ;;  %v6996_v45 = vld [vmem:[%s9431_s21 + $0x520] ss:$8 sps:$4 sm:$0xff]   ;;  %v7052_v16 = vld [vmem:[%s9431_s21 + $0x5b4] ss:$8 sps:$4 sm:$0xff]  }
0x1437   : > { %v7001_v33 = vld [vmem:[%s9431_s21 + $0x264] ss:$8 sps:$4 sm:$0xff]   ;;  %v6999_v48 = vld [vmem:[%s9431_s21 + $0x260] ss:$8 sps:$4 sm:$0xff]  }
0x1438   : > { %5648 = vmatpush1.bf16.msra.mxu1 %v6936_v57  ;;  %5533 = vmatpush1.bf16.msra.mxu0 %v6939_v2  ;;  %v7004_v57 = vld [vmem:[%s9431_s21 + $0x534] ss:$8 sps:$4 sm:$0xff]   ;;  %v7061_v13 = vld [vmem:[%s9431_s21 + $0x704] ss:$8 sps:$4 sm:$0xff]  }
0x1439   : > { %5649 = vmatprep.subr.bf16.mxu1 %v6944_v8  ;;  %5534 = vmatprep.subr.bf16.mxu0 %v6947_v6  ;;  %v7007_v2 = vld [vmem:[%s9431_s21 + $0x274] ss:$8 sps:$4 sm:$0xff]   ;;  %v7002_v8 = vld [vmem:[%s9431_s21 + $0x530] ss:$8 sps:$4 sm:$0xff]  }
0x143a   : > { %v7005_v6 = vld [vmem:[%s9431_s21 + $0x270] ss:$8 sps:$4 sm:$0xff]  }
0x143c   : > { %5650 = vmatpush1.bf16.msra.mxu1 %v6942_v51  ;;  %5535 = vmatpush1.bf16.msra.mxu0 %v6945_v7  ;;  %v7010_v51 = vld [vmem:[%s9431_s21 + $0x544] ss:$8 sps:$4 sm:$0xff]  }
0x143d   : > { %5651 = vmatprep.subr.bf16.mxu1 %v6950_v11  ;;  %5536 = vmatprep.subr.bf16.mxu0 %v6953_v12  ;;  %v7013_v7 = vld [vmem:[%s9431_s21 + $0x284] ss:$8 sps:$4 sm:$0xff]   ;;  %v7008_v11 = vld [vmem:[%s9431_s21 + $0x540] ss:$8 sps:$4 sm:$0xff]  }
0x143e   : > { %v7011_v12 = vld [vmem:[%s9431_s21 + $0x280] ss:$8 sps:$4 sm:$0xff]  }
0x1440   : > { %5652 = vmatpush1.bf16.msra.mxu1 %v6948_v20  ;;  %5537 = vmatpush1.bf16.msra.mxu0 %v6951_v14  ;;  %v7016_v20 = vld [vmem:[%s9431_s21 + $0x554] ss:$8 sps:$4 sm:$0xff]  }
0x1441   : > { %5653 = vmatprep.subr.bf16.mxu1 %v6956_v63  ;;  %5538 = vmatprep.subr.bf16.mxu0 %v6959_v15  ;;  %v7019_v14 = vld [vmem:[%s9431_s21 + $0x294] ss:$8 sps:$4 sm:$0xff]   ;;  %v7017_v63 = vld [vmem:[%s9431_s21 + $0x290] ss:$8 sps:$4 sm:$0xff]   ;;  %v7022_v15 = vld [vmem:[%s9431_s21 + $0x564] ss:$8 sps:$4 sm:$0xff]  }
0x1444   : > { %5654 = vmatpush1.bf16.msra.mxu1 %v6954_v42  ;;  %5539 = vmatpush1.bf16.msra.mxu0 %v6957_v47  ;;  %v7020_v42 = vld [vmem:[%s9431_s21 + $0x560] ss:$8 sps:$4 sm:$0xff]  }
0x1445   : > { %5655 = vmatprep.subr.bf16.mxu1 %v6962_v31  ;;  %5549 = vmatprep.subr.bf16.mxu0 %v6965_v35  ;;  %v7023_v47 = vld [vmem:[%s9431_s21 + $0x2a0] ss:$8 sps:$4 sm:$0xff]   ;;  %v7031_v31 = vld [vmem:[%s9431_s21 + $0x2b4] ss:$8 sps:$4 sm:$0xff]   ;;  %v7026_v35 = vld [vmem:[%s9431_s21 + $0x570] ss:$8 sps:$4 sm:$0xff]  }
0x1447   : > { %5541 = vmatmul.mubr.bf16.vlgmr.msra.gmra.mrb[56].mxu0 %v3937_v37  ;;  %v7032_v37 = vld [vmem:[%s9431_s21 + $0x580] ss:$8 sps:$4 sm:$0xff]  }
0x1448   : > { %5656 = vmatpush1.bf16.msra.mxu1 %v6960_v55  ;;  %5550 = vmatpush1.bf16.msra.mxu0 %v6963_v18  ;;  %v7034_v55 = vld [vmem:[%s9431_s21 + $0x584] ss:$8 sps:$4 sm:$0xff]  }
0x1449   : > { %5581 = vmatprep.mubr.bf16.mxu0 %v3940_v24  ;;  %5657 = vmatprep.subr.bf16.mxu1 %v6968_v32  ;;  %v7037_v18 = vld [vmem:[%s9431_s21 + $0x2c4] ss:$8 sps:$4 sm:$0xff]   ;;  %v7035_v32 = vld [vmem:[%s9431_s21 + $0x2c0] ss:$8 sps:$4 sm:$0xff]   ;;  %v7043_v24 = vld [vmem:[%s9431_s21 + $0x2d4] ss:$8 sps:$4 sm:$0xff]  }
0x144a   : > { %5551 = vmatprep.subr.bf16.mxu0 %v6971_v30  ;;  %v7040_v30 = vld [vmem:[%s9431_s21 + $0x594] ss:$8 sps:$4 sm:$0xff]  }
0x144c   : > { %5658 = vmatpush1.bf16.msra.mxu1 %v6966_v17  ;;  %5552 = vmatpush1.bf16.msra.mxu0 %v6969_v44  ;;  %v7038_v17 = vld [vmem:[%s9431_s21 + $0x590] ss:$8 sps:$4 sm:$0xff]  }
0x144d   : > { %5659 = vmatprep.subr.bf16.mxu1 %v6974_v38  ;;  %5553 = vmatprep.subr.bf16.mxu0 %v6977_v19  ;;  %v7041_v44 = vld [vmem:[%s9431_s21 + $0x2d0] ss:$8 sps:$4 sm:$0xff]   ;;  %v7046_v38 = vld [vmem:[%s9431_s21 + $0x5a4] ss:$8 sps:$4 sm:$0xff]  }
0x144e   : > { %v7049_v19 = vld [vmem:[%s9431_s21 + $0x2e4] ss:$8 sps:$4 sm:$0xff]  }
0x1450   : > { %5660 = vmatpush1.bf16.msra.mxu1 %v6972_v49  ;;  %5554 = vmatpush1.bf16.msra.mxu0 %v6975_v61  ;;  %v7044_v49 = vld [vmem:[%s9431_s21 + $0x5a0] ss:$8 sps:$4 sm:$0xff]  }
0x1451   : > { %5661 = vmatprep.subr.bf16.mxu1 %v6980_v23  ;;  %5555 = vmatprep.subr.bf16.mxu0 %v6983_v41  ;;  %v7047_v61 = vld [vmem:[%s9431_s21 + $0x2e0] ss:$8 sps:$4 sm:$0xff]   ;;  %v3543_v23 = vrot.slane %v8775_v43, %v3542_v46  ;;  %v7055_v41 = vld [vmem:[%s9431_s21 + $0x2f4] ss:$8 sps:$4 sm:$0xff]   ;;  %v7058_v46 = vld [vmem:[%s9431_s21 + $0x5c4] ss:$8 sps:$4 sm:$0xff]  }
0x1453   : > { %v3724_v43 = vadd.f32 %v8807_v22, %v3543_v23  ;;  %v7064_v22 = vld [vmem:[%s9431_s21 + $0x5d4] ss:$8 sps:$4 sm:$0xff]   ;;  %v7133_v23 = vld [vmem:[%s9431_s21 + $0x7c4] ss:$8 sps:$4 sm:$0xff]  }
0x1454   : > { %5662 = vmatpush1.bf16.msra.mxu1 %v6978_v25  ;;  %5556 = vmatpush1.bf16.msra.mxu0 %v6981_v34  ;;  %v7050_v25 = vld [vmem:[%s9431_s21 + $0x5b0] ss:$8 sps:$4 sm:$0xff]  }
0x1455   : > { %5672 = vmatprep.subr.bf16.mxu1 %v6986_v56  ;;  %5557 = vmatprep.subr.bf16.mxu0 %v6989_v62  ;;  %v7053_v34 = vld [vmem:[%s9431_s21 + $0x2f0] ss:$8 sps:$4 sm:$0xff]   ;;  %v7056_v56 = vld [vmem:[%s9431_s21 + $0x5c0] ss:$8 sps:$4 sm:$0xff]  }
0x1456   : > { %v7059_v62 = vld [vmem:[%s9431_s21 + $0x700] ss:$8 sps:$4 sm:$0xff]  }
0x1457   : > { %5664 = vmatmul.mubr.bf16.vlgmr.msra.gmra.mrb[28].mxu1 %v3943_v36  ;;  %v7067_v36 = vld [vmem:[%s9431_s21 + $0x714] ss:$8 sps:$4 sm:$0xff]  }
0x1458   : > { %5673 = vmatpush1.bf16.msra.mxu1 %v6984_v9  ;;  %5704 = vmatprep.mubr.bf16.mxu1 %v3946_v50  ;;  %v3939_v9 = vpack.c.bf16 %v3724_v43, %v3724_v43  ;;  %v7065_v50 = vld [vmem:[%s9431_s21 + $0x710] ss:$8 sps:$4 sm:$0xff]   ;;  %v7139_v43 = vld [vmem:[%s9431_s21 + $0x6a4] ss:$8 sps:$4 sm:$0xff]  }
0x1459   : > { %5558 = vmatpush1.bf16.msra.mxu0 %v6987_v59  ;;  %5674 = vmatprep.subr.bf16.mxu1 %v6992_v40  ;;  %v3950_v59 = vpack.c.bf16 %v8935_v52, %v8935_v52  ;;  %v7062_v40 = vld [vmem:[%s9431_s21 + $0x5d0] ss:$8 sps:$4 sm:$0xff]   ;;  %v7073_v52 = vld [vmem:[%s9431_s21 + $0x724] ss:$8 sps:$4 sm:$0xff]  }
0x145a   : > { %5559 = vmatprep.subr.bf16.mxu0 %v6995_v39  ;;  %v7070_v39 = vld [vmem:[%s9431_s21 + $0x5e4] ss:$8 sps:$4 sm:$0xff]  }
0x145c   : > { %5675 = vmatpush1.bf16.msra.mxu1 %v6990_v28  ;;  %v7068_v28 = vld [vmem:[%s9431_s21 + $0x5e0] ss:$8 sps:$4 sm:$0xff]  }
0x145d   : > { %5560 = vmatpush1.bf16.msra.mxu0 %v6993_v5  ;;  %5676 = vmatprep.subr.bf16.mxu1 %v6998_v21  ;;  %v7071_v5 = vld [vmem:[%s9431_s21 + $0x720] ss:$8 sps:$4 sm:$0xff]   ;;  %v7076_v21 = vld [vmem:[%s9431_s21 + $0x5f4] ss:$8 sps:$4 sm:$0xff]  }
0x145e   : > { %5561 = vmatprep.subr.bf16.mxu0 %v7001_v33  ;;  %v7079_v33 = vld [vmem:[%s9431_s21 + $0x734] ss:$8 sps:$4 sm:$0xff]  }
0x1460   : > { %5677 = vmatpush1.bf16.msra.mxu1 %v6996_v45  ;;  %v7074_v45 = vld [vmem:[%s9431_s21 + $0x5f0] ss:$8 sps:$4 sm:$0xff]  }
0x1461   : > { %5562 = vmatpush1.bf16.msra.mxu0 %v6999_v48  ;;  %5678 = vmatprep.subr.bf16.mxu1 %v7004_v57  ;;  %v7077_v48 = vld [vmem:[%s9431_s21 + $0x730] ss:$8 sps:$4 sm:$0xff]   ;;  %v7082_v57 = vld [vmem:[%s9431_s21 + $0x604] ss:$8 sps:$4 sm:$0xff]  }
0x1462   : > { %5563 = vmatprep.subr.bf16.mxu0 %v7007_v2  ;;  %v7085_v2 = vld [vmem:[%s9431_s21 + $0x744] ss:$8 sps:$4 sm:$0xff]  }
0x1464   : > { %5679 = vmatpush1.bf16.msra.mxu1 %v7002_v8  ;;  %v7080_v8 = vld [vmem:[%s9431_s21 + $0x600] ss:$8 sps:$4 sm:$0xff]  }
0x1465   : > { %5564 = vmatpush1.bf16.msra.mxu0 %v7005_v6  ;;  %5680 = vmatprep.subr.bf16.mxu1 %v7010_v51  ;;  %v3945_v6 = vpack.c.bf16 %v8867_v60, %v8867_v60  ;;  %v7083_v51 = vld [vmem:[%s9431_s21 + $0x740] ss:$8 sps:$4 sm:$0xff]   ;;  %v7086_v60 = vld [vmem:[%s9431_s21 + $0x610] ss:$8 sps:$4 sm:$0xff]  }
0x1466   : > { %5565 = vmatprep.subr.bf16.mxu0 %v7013_v7  ;;  %v7088_v7 = vld [vmem:[%s9431_s21 + $0x614] ss:$8 sps:$4 sm:$0xff]  }
0x1468   : > { %5681 = vmatpush1.bf16.msra.mxu1 %v7008_v11  ;;  %v3948_v11 = vpack.c.bf16 %v8932_v29, %v8932_v29  ;;  %v7094_v29 = vld [vmem:[%s9431_s21 + $0x624] ss:$8 sps:$4 sm:$0xff]  }
0x1469   : > { %5566 = vmatpush1.bf16.msra.mxu0 %v7011_v12  ;;  %5682 = vmatprep.subr.bf16.mxu1 %v7016_v20  ;;  %v7091_v12 = vld [vmem:[%s9431_s21 + $0x754] ss:$8 sps:$4 sm:$0xff]   ;;  %v7089_v20 = vld [vmem:[%s9431_s21 + $0x750] ss:$8 sps:$4 sm:$0xff]  }
0x146a   : > { %5567 = vmatprep.subr.bf16.mxu0 %v7019_v14  ;;  %v7097_v14 = vld [vmem:[%s9431_s21 + $0x764] ss:$8 sps:$4 sm:$0xff]  }
0x146c   : > { %5683 = vmatpush1.bf16.msra.mxu1 %v7014_v54  ;;  %v7092_v54 = vld [vmem:[%s9431_s21 + $0x620] ss:$8 sps:$4 sm:$0xff]  }
0x146d   : > { %5568 = vmatpush1.bf16.msra.mxu0 %v7017_v63  ;;  %5684 = vmatprep.subr.bf16.mxu1 %v7022_v15  ;;  %v7095_v63 = vld [vmem:[%s9431_s21 + $0x760] ss:$8 sps:$4 sm:$0xff]   ;;  %v7100_v15 = vld [vmem:[%s9431_s21 + $0x634] ss:$8 sps:$4 sm:$0xff]  }
0x146e   : > { %5569 = vmatprep.subr.bf16.mxu0 %v7025_v10  ;;  %v7103_v10 = vld [vmem:[%s9431_s21 + $0x774] ss:$8 sps:$4 sm:$0xff]  }
0x1470   : > { %5685 = vmatpush1.bf16.msra.mxu1 %v7020_v42  ;;  %v7098_v42 = vld [vmem:[%s9431_s21 + $0x630] ss:$8 sps:$4 sm:$0xff]  }
0x1471   : > { %5570 = vmatpush1.bf16.msra.mxu0 %v7023_v47  ;;  %5686 = vmatprep.subr.bf16.mxu1 %v7028_v53  ;;  %v7101_v47 = vld [vmem:[%s9431_s21 + $0x770] ss:$8 sps:$4 sm:$0xff]   ;;  %v7106_v53 = vld [vmem:[%s9431_s21 + $0x644] ss:$8 sps:$4 sm:$0xff]  }
0x1472   : > { %5571 = vmatprep.subr.bf16.mxu0 %v7031_v31  ;;  %v7109_v31 = vld [vmem:[%s9431_s21 + $0x784] ss:$8 sps:$4 sm:$0xff]  }
0x1474   : > { %5687 = vmatpush1.bf16.msra.mxu1 %v7026_v35  ;;  %v7104_v35 = vld [vmem:[%s9431_s21 + $0x640] ss:$8 sps:$4 sm:$0xff]  }
0x1475   : > { %5572 = vmatpush1.bf16.msra.mxu0 %v7029_v58  ;;  %5688 = vmatprep.subr.bf16.mxu1 %v7034_v55  ;;  %v7107_v58 = vld [vmem:[%s9431_s21 + $0x780] ss:$8 sps:$4 sm:$0xff]   ;;  %v7112_v55 = vld [vmem:[%s9431_s21 + $0x654] ss:$8 sps:$4 sm:$0xff]  }
0x1476   : > { %5573 = vmatprep.subr.bf16.mxu0 %v7037_v18  ;;  %v7115_v18 = vld [vmem:[%s9431_s21 + $0x794] ss:$8 sps:$4 sm:$0xff]  }
0x1478   : > { %5689 = vmatpush1.bf16.msra.mxu1 %v7032_v37  ;;  %v7110_v37 = vld [vmem:[%s9431_s21 + $0x650] ss:$8 sps:$4 sm:$0xff]  }
0x1479   : > { %5574 = vmatpush1.bf16.msra.mxu0 %v7035_v32  ;;  %5690 = vmatprep.subr.bf16.mxu1 %v7040_v30  ;;  %v7113_v32 = vld [vmem:[%s9431_s21 + $0x790] ss:$8 sps:$4 sm:$0xff]   ;;  %v7118_v30 = vld [vmem:[%s9431_s21 + $0x664] ss:$8 sps:$4 sm:$0xff]  }
0x147a   : > { %5575 = vmatprep.subr.bf16.mxu0 %v7043_v24  ;;  %v7121_v24 = vld [vmem:[%s9431_s21 + $0x7a4] ss:$8 sps:$4 sm:$0xff]  }
0x147c   : > { %5691 = vmatpush1.bf16.msra.mxu1 %v7038_v17  ;;  %v7116_v17 = vld [vmem:[%s9431_s21 + $0x660] ss:$8 sps:$4 sm:$0xff]  }
0x147d   : > { %5576 = vmatpush1.bf16.msra.mxu0 %v7041_v44  ;;  %5692 = vmatprep.subr.bf16.mxu1 %v7046_v38  ;;  %v7119_v44 = vld [vmem:[%s9431_s21 + $0x7a0] ss:$8 sps:$4 sm:$0xff]   ;;  %v7124_v38 = vld [vmem:[%s9431_s21 + $0x674] ss:$8 sps:$4 sm:$0xff]  }
0x147e   : > { %5577 = vmatprep.subr.bf16.mxu0 %v7049_v19  ;;  %v7127_v19 = vld [vmem:[%s9431_s21 + $0x7b4] ss:$8 sps:$4 sm:$0xff]  }
0x1480   : > { %5693 = vmatpush1.bf16.msra.mxu1 %v7044_v49  ;;  %v7122_v49 = vld [vmem:[%s9431_s21 + $0x670] ss:$8 sps:$4 sm:$0xff]  }
0x1481   : > { %5578 = vmatpush1.bf16.msra.mxu0 %v7047_v61  ;;  %5694 = vmatprep.subr.bf16.mxu1 %v7052_v16  ;;  %v7125_v61 = vld [vmem:[%s9431_s21 + $0x7b0] ss:$8 sps:$4 sm:$0xff]   ;;  %v7130_v16 = vld [vmem:[%s9431_s21 + $0x684] ss:$8 sps:$4 sm:$0xff]  }
0x1482   : > { %5579 = vmatprep.subr.bf16.mxu0 %v7055_v41  ;;  %v7128_v41 = vld [vmem:[%s9431_s21 + $0x680] ss:$8 sps:$4 sm:$0xff]  }
0x1484   : > { %5695 = vmatpush1.bf16.msra.mxu1 %v7050_v25  ;;  %v7131_v25 = vld [vmem:[%s9431_s21 + $0x7c0] ss:$8 sps:$4 sm:$0xff]  }
0x1485   : > { %5580 = vmatpush1.bf16.msra.mxu0 %v7053_v34  ;;  %5696 = vmatprep.subr.bf16.mxu1 %v7058_v46  ;;  %v7136_v34 = vld [vmem:[%s9431_s21 + $0x694] ss:$8 sps:$4 sm:$0xff]   ;;  %v7134_v46 = vld [vmem:[%s9431_s21 + $0x690] ss:$8 sps:$4 sm:$0xff]  }
0x1486   : > { %5754 = vmatprep.subr.bf16.mxu0 %v7061_v13  ;;  %v3949_v13 = vpack.c.bf16 %v8923_v27, %v8923_v27  ;;  %v7145_v27 = vld [vmem:[%s9431_s21 + $0x6c4] ss:$8 sps:$4 sm:$0xff]  }
0x1488   : > { %5582 = vmatmul.mubr.bf16.vlgmr.msra.gmra.mrb[56].mxu0 %v3939_v9  ;;  %5697 = vmatpush1.bf16.msra.mxu1 %v7056_v56  ;;  %v7137_v56 = vld [vmem:[%s9431_s21 + $0x6a0] ss:$8 sps:$4 sm:$0xff]   ;;  %v7140_v9 = vld [vmem:[%s9431_s21 + $0x6b0] ss:$8 sps:$4 sm:$0xff]  }
0x1489   : > { %5755 = vmatpush1.bf16.msra.mxu0 %v7059_v62  ;;  %6274 = vmatprep.mubr.msk.bf16.mxu0 %vm5463_vm5, %v3950_v59  ;;  %v7142_v62 = vld [vmem:[%s9431_s21 + $0x6b4] ss:$8 sps:$4 sm:$0xff]   ;;  %v7146_v59 = vld [vmem:[%s9431_s21 + $0x6d0] ss:$8 sps:$4 sm:$0xff]  }
0x148a   : > { %5698 = vmatprep.subr.bf16.mxu1 %v7064_v22  ;;  %5756 = vmatprep.subr.bf16.mxu0 %v7067_v36  ;;  %v7143_v22 = vld [vmem:[%s9431_s21 + $0x6c0] ss:$8 sps:$4 sm:$0xff]   ;;  %v7148_v36 = vld [vmem:[%s9431_s21 + $0x6d4] ss:$8 sps:$4 sm:$0xff]  }
0x148c   : > { %5699 = vmatpush1.bf16.msra.mxu1 %v7062_v40  ;;  %v7151_v40 = vld [vmem:[%s9431_s21 + $0x6e4] ss:$8 sps:$4 sm:$0xff]  }
0x148d   : > { %5757 = vmatpush1.bf16.msra.mxu0 %v7065_v50  ;;  %5700 = vmatprep.subr.bf16.mxu1 %v7070_v39  ;;  %v7149_v50 = vld [vmem:[%s9431_s21 + $0x6e0] ss:$8 sps:$4 sm:$0xff]   ;;  %v7154_v39 = vld [vmem:[%s9431_s21 + $0x6f4] ss:$8 sps:$4 sm:$0xff]  }
0x148e   : > { %5758 = vmatprep.subr.bf16.mxu0 %v7073_v52  ;;  %v7152_v52 = vld [vmem:[%s9431_s21 + $0x6f0] ss:$8 sps:$4 sm:$0xff]  }
0x1490   : > { %5701 = vmatpush1.bf16.msra.mxu1 %v7068_v28  ;;  %v3947_v28 = vpack.c.bf16 %v8920_v26, %v8920_v26 }
0x1491   : > { %5759 = vmatpush1.bf16.msra.mxu0 %v7071_v5  ;;  %5702 = vmatprep.subr.bf16.mxu1 %v7076_v21 }
0x1492   : > { %5760 = vmatprep.subr.bf16.mxu0 %v7079_v33 }
0x1494   : > { %5703 = vmatpush1.bf16.msra.mxu1 %v7074_v45 }
0x1495   : > { %5761 = vmatpush1.bf16.msra.mxu0 %v7077_v48  ;;  %5713 = vmatprep.subr.bf16.mxu1 %v7082_v57 }
0x1496   : > { %5762 = vmatprep.subr.bf16.mxu0 %v7085_v2 }
0x1497   : > { %5705 = vmatmul.mubr.bf16.vlgmr.msra.gmra.mrb[28].mxu1 %v3945_v6  ;;  %v4201_v6 = vld [vmem:[%s9432_s22] sm:$0x3] }
0x1498   : > { %5714 = vmatpush1.bf16.msra.mxu1 %v7080_v8  ;;  %5745 = vmatprep.mubr.bf16.mxu1 %v3948_v11  ;;  %v7206_v11 = vmov 1966171168  }
0x1499   : > { %5763 = vmatpush1.bf16.msra.mxu0 %v7083_v51  ;;  %5715 = vmatprep.subr.bf16.mxu1 %v7088_v7  ;;  %v5456_v51 = vrot.slane %v4201_v6, %v7345_v3  ;;  %v5460_v7 = vrot.slane %v4201_v6, %v7348_v4  ;;  %v5799_v26 = vunpack.c.l.s4 %v7206_v11 }
0x149a   : > { %5764 = vmatprep.subr.bf16.mxu0 %v7091_v12 }
0x149c   : > { %5716 = vmatpush1.bf16.msra.mxu1 %v7086_v60 }
0x149d   : > { %5765 = vmatpush1.bf16.msra.mxu0 %v7089_v20  ;;  %5717 = vmatprep.subr.bf16.mxu1 %v7094_v29  ;;  %v5800_v29 = vunpack.c.0.s8 %v5799_v26 }
0x149e   : > { %5766 = vmatprep.subr.bf16.mxu0 %v7097_v14 }
0x14a0   : > { %5718 = vmatpush1.bf16.msra.mxu1 %v7092_v54 }
0x14a1   : > { %5767 = vmatpush1.bf16.msra.mxu0 %v7095_v63  ;;  %5719 = vmatprep.subr.bf16.mxu1 %v7100_v15 }
0x14a2   : > { %5768 = vmatprep.subr.bf16.mxu0 %v7103_v10 }
0x14a4   : > { %5720 = vmatpush1.bf16.msra.mxu1 %v7098_v42 }
0x14a5   : > { %5769 = vmatpush1.bf16.msra.mxu0 %v7101_v47  ;;  %5721 = vmatprep.subr.bf16.mxu1 %v7106_v53  ;;  %v5803_v53 = vsub.s32 %v5800_v29, %v7338_v1 }
0x14a6   : > { %5770 = vmatprep.subr.bf16.mxu0 %v7109_v31 }
0x14a8   : > { %5722 = vmatpush1.bf16.msra.mxu1 %v7104_v35 }
0x14a9   : > { %5771 = vmatpush1.bf16.msra.mxu0 %v7107_v58  ;;  %5723 = vmatprep.subr.bf16.mxu1 %v7112_v55 }
0x14aa   : > { %5772 = vmatprep.subr.bf16.mxu0 %v7115_v18 }
0x14ac   : > { %5724 = vmatpush1.bf16.msra.mxu1 %v7110_v37 }
0x14ad   : > { %5773 = vmatpush1.bf16.msra.mxu0 %v7113_v32  ;;  %5725 = vmatprep.subr.bf16.mxu1 %v7118_v30 }
0x14ae   : > { %5774 = vmatprep.subr.bf16.mxu0 %v7121_v24 }
0x14b0   : > { %5726 = vmatpush1.bf16.msra.mxu1 %v7116_v17 }
0x14b1   : > { %5775 = vmatpush1.bf16.msra.mxu0 %v7119_v44  ;;  %5727 = vmatprep.subr.bf16.mxu1 %v7124_v38 }
0x14b2   : > { %5776 = vmatprep.subr.bf16.mxu0 %v7127_v19 }
0x14b4   : > { %5728 = vmatpush1.bf16.msra.mxu1 %v7122_v49 }
0x14b5   : > { %5777 = vmatpush1.bf16.msra.mxu0 %v7125_v61  ;;  %5729 = vmatprep.subr.bf16.mxu1 %v7130_v16 }
0x14b6   : > { %5778 = vmatprep.subr.bf16.mxu0 %v7133_v23 }
0x14b8   : > { %5730 = vmatpush1.bf16.msra.mxu1 %v7128_v41 }
0x14b9   : > { %5779 = vmatpush1.bf16.msra.mxu0 %v7131_v25  ;;  %5731 = vmatprep.subr.bf16.mxu1 %v7136_v34 }
0x14bc   : > { %5732 = vmatpush1.bf16.msra.mxu1 %v7134_v46  ;;  %5787 = vmatmul.mubr.bf16.vlgmr.msra.gmra.mrb[60].mxu0 %v3949_v13 }
0x14bd   : > { %5733 = vmatprep.subr.bf16.mxu1 %v7139_v43 }
0x14c0   : > { %5734 = vmatpush1.bf16.msra.mxu1 %v7137_v56 }
0x14c1   : > { %5735 = vmatprep.subr.bf16.mxu1 %v7142_v62 }
0x14c4   : > { %5736 = vmatpush1.bf16.msra.mxu1 %v7140_v9 }
0x14c5   : > { %5737 = vmatprep.subr.bf16.mxu1 %v7145_v27 }
0x14c8   : > { %5738 = vmatpush1.bf16.msra.mxu1 %v7143_v22 }
0x14c9   : > { %5739 = vmatprep.subr.bf16.mxu1 %v7148_v36 }
0x14cc   : > { %5740 = vmatpush1.bf16.msra.mxu1 %v7146_v59 }
0x14cd   : > { %5741 = vmatprep.subr.bf16.mxu1 %v7151_v40 }
0x14d0   : > { %5742 = vmatpush1.bf16.msra.mxu1 %v7149_v50 }
0x14d1   : > { %5743 = vmatprep.subr.bf16.mxu1 %v7154_v39 }
0x14d4   : > { %5744 = vmatpush1.bf16.msra.mxu1 %v7152_v52 }
0x14d7   : > { %5746 = vmatmul.mubr.bf16.vlgmr.msra.gmra.mrb[28].mxu1 %v3947_v28 }
0x155b   : > { %v5583_v5 = vpop.f32.mrb[56].mxu0 }
0x155c   : > { %v5585_v21 = vpop.f32.mrb[57].mxu0  ;;  %v6364_v12 = vadd.f32 %v5583_v5, %v5456_v51 }
0x155d   : > { %v5587_v33 = vpop.f32.mrb[58].mxu0  ;;  %v6367_v60 = vadd.f32 %v5585_v21, %v5460_v7 }
0x155e   : > { %v5588_v45 = vpop.f32.mrb[59].mxu0 }
0x158f   : > { %v5788_v48 = vpop.f32.mrb[60].mxu0 }
0x1590   : > { %v5790_v57 = vpop.f32.mrb[61].mxu0 }
0x1591   : > { %v5792_v2 = vpop.f32.mrb[62].mxu0 }
0x1592   : > { %v5793_v8 = vpop.f32.mrb[63].mxu0 }
0x15aa   : > { %v5747_v20 = vpop.f32.mrb[28].mxu1 }
0x15ab   : > { %v6365_v14 = vadd.f32 %v6364_v12, %v5747_v20  ;;  %v5749_v54 = vpop.f32.mrb[29].mxu1 }
0x15ac   : > { %v6368_v63 = vadd.f32 %v6367_v60, %v5749_v54  ;;  %v5751_v15 = vpop.f32.mrb[30].mxu1 }
0x15ad   : > { %v6366_v10 = vadd.f32 %v6365_v14, %v5788_v48  ;;  %v5752_v42 = vpop.f32.mrb[31].mxu1 }
0x15ae   : > { %v6369_v47 = vadd.f32 %v6368_v63, %v5790_v57 }
0x15b0   : > { %v5797_v3 = vcombine.low %v6366_v10, %v6369_v47 }
0x15b2   : > { %v5804_v31 = vrot.slane %v5797_v3, %v5803_v53 }
0x15b4   : > { %v5811_v4 = vrot.slane %v5804_v31, %v5803_v53 }
0x15b6   : > { %5817 = vst.msk [vmem:[%s708_s4] sm:$0x3] %vm5815_vm2, %v5811_v4 }
0x15b7 PF: > { %s9548_s0 = sld [smem:[#allocation2_spill]] }
0x15bd   : > { %s33_s4 = sadd.s32 1, %s9548_s0  }
0x15be   : > { %p30_p4 = scmp.ge.s32.totalorder %s33_s4, 4  }
0x15c0   :  { %32 = sbr.rel (!%p30_p4) target bundleno = 15 (0xf), region = 150 }

</bundles_post_ra>
